<compile_context>
chip_gen: v6e
topology: v6e:2x2x1
jax: 0.10.0
libtpu: 0.0.40
codegen_flags: <defaults>
</compile_context>

<pallas_src>
import jax
import jax.numpy as jnp
from jax.experimental import pallas as pl
from jax.experimental.pallas import tpu as pltpu

C_OUT = 64      # conv1 out channels / LSTM input size
HID = 128       # LSTM hidden size


def hybrid_kernel(taps_ref, cw_ref, cb_ref,           # conv taps / params
                  wih_ref, whh_ref, bl_ref,           # LSTM params (i,f,o,g order)
                  w1_ref, b1_ref, hw_ref, hb_ref,     # fc1 + fused heads
                  out_ref,                            # (BP, 5) fused output
                  xg_ref):                            # VMEM scratch (L*BP, 512)
    BP = out_ref.shape[0]
    L = xg_ref.shape[0] // BP

    # ---- Conv1d(1, 64, k=3, pad=1) + ReLU on the lane-dense tap slab (bf16) ----
    conv = jnp.maximum(
        jnp.dot(taps_ref[...], cw_ref[...], preferred_element_type=jnp.float32)
        + cb_ref[...], 0.0)                                     # (L*BP, 64) f32

    # ---- Hoisted input projection: all timesteps in one bf16 MXU pass ----
    xg_ref[...] = (jnp.dot(conv.astype(jnp.bfloat16), wih_ref[...],
                           preferred_element_type=jnp.float32)
                   + bl_ref[...])                               # (L*BP, 512) f32

    # ---- LSTM recurrence (batch_first), fully unrolled (L small & static) ----
    h = jnp.zeros((BP, HID), jnp.float32)
    c = jnp.zeros((BP, HID), jnp.float32)
    # TODO(synk): keep W_hh stationary via explicit MXU driving if bundles show
    # per-step weight re-pushes (matmul_push_rhs / matmul_acc_lhs / matmul_pop).
    for t in range(L):
        # Only h @ W_hh sits on the serial dependency chain (bf16 MXU operands,
        # f32 accumulate); x-gates are a static sublane-group slice of scratch.
        g_pre = xg_ref[t * BP:(t + 1) * BP, :] + jnp.dot(
            h.astype(jnp.bfloat16), whh_ref[...],
            preferred_element_type=jnp.float32)                 # (BP, 512)
        sig = jax.nn.sigmoid(g_pre[:, :3 * HID])    # i, f, o in one EUP push
        i_g = sig[:, 0 * HID:1 * HID]
        f_g = sig[:, 1 * HID:2 * HID]
        o_g = sig[:, 2 * HID:3 * HID]
        g_g = jnp.tanh(g_pre[:, 3 * HID:])
        c = f_g * c + i_g * g_g
        h = o_g * jnp.tanh(c)

    # ---- Dense heads: fc1 -> ReLU -> fused [fc2 | fc2 | fc_classifier] ----
    dense = jnp.maximum(
        jnp.dot(h.astype(jnp.bfloat16), w1_ref[...],
                preferred_element_type=jnp.float32) + b1_ref[...], 0.0)   # (BP, 64)
    heads = (jnp.dot(dense.astype(jnp.bfloat16), hw_ref[...],
                     preferred_element_type=jnp.float32)
             + hb_ref[...])                                     # (BP, 5)
    # Columns: [pred, pred(dup), cls0, cls1, cls2]; sigmoid only column 1.
    lane = jax.lax.broadcasted_iota(jnp.int32, heads.shape, 1)
    out_ref[...] = jnp.where(lane == 1, jax.nn.sigmoid(heads), heads)


def prepare_params(p):
    """One-time parameter re-layout: gate reorder, bf16 casts, head fusion."""
    def reorder(w):  # gate columns: PyTorch (i, f, g, o) -> kernel (i, f, o, g)
        return jnp.concatenate(
            [w[..., :2 * HID], w[..., 3 * HID:4 * HID], w[..., 2 * HID:3 * HID]],
            axis=-1)

    heads_w = jnp.concatenate([p["fc2_w"], p["fc2_w"], p["fcc_w"]], axis=1)  # (64, 5)
    heads_b = jnp.concatenate([p["fc2_b"], p["fc2_b"], p["fcc_b"]], axis=1)  # (1, 5)
    return {
        "conv_w": p["conv_w"].astype(jnp.bfloat16),
        "conv_b": p["conv_b"],
        "w_ih": reorder(p["w_ih"]).astype(jnp.bfloat16),
        "w_hh": reorder(p["w_hh"]).astype(jnp.bfloat16),
        "b_l": reorder(p["b_l"]),
        "fc1_w": p["fc1_w"].astype(jnp.bfloat16),
        "fc1_b": p["fc1_b"],
        "heads_w": heads_w.astype(jnp.bfloat16),
        "heads_b": heads_b,
    }


@jax.jit
def hybrid_forward(x, dp):
    """x: (B, 1, L) float32 (NCL like the PyTorch module); dp = prepare_params()."""
    B, _, L = x.shape
    BP = max(8, ((B + 7) // 8) * 8)          # pad batch to a sublane group

    sig = x[:, 0, :]                                        # (B, L)
    sig = jnp.pad(sig, ((0, BP - B), (0, 0)))               # (BP, L)
    xpad = jnp.pad(sig, ((0, 0), (1, 1)))                   # conv padding=1
    # taps[t*BP + b, k] = xpad[b, t + k]  -> lane-dense (L*BP, 3) slab (bf16)
    taps = jnp.stack([xpad[:, k:k + L] for k in range(3)], axis=-1)  # (BP, L, 3)
    taps = taps.transpose(1, 0, 2).reshape(L * BP, 3).astype(jnp.bfloat16)

    vmem = pl.BlockSpec(memory_space=pltpu.MemorySpace.VMEM)
    out = pl.pallas_call(
        hybrid_kernel,
        out_shape=jax.ShapeDtypeStruct((BP, 5), jnp.float32),
        in_specs=[vmem] * 10,
        out_specs=vmem,
        scratch_shapes=[pltpu.VMEM((L * BP, 4 * HID), jnp.float32)],
        # TODO(synk): if B grows past a few sublane groups, add a batch grid with
        # dimension_semantics=("parallel",); cap the batch tile at ~256 rows on
        # v7x (64 MiB VMEM) vs ~512-1024 on v5e/v6e.
    )(taps, dp["conv_w"], dp["conv_b"], dp["w_ih"], dp["w_hh"], dp["b_l"],
      dp["fc1_w"], dp["fc1_b"], dp["heads_w"], dp["heads_b"])

    return {"predicted_multiplier": out[:B, 0:1],
            "confidence_score": out[:B, 1:2],
            "classifier_output": out[:B, 2:5]}


def init_params(key):
    """Deterministic init mimicking PyTorch default uniform(-1/sqrt(fan_in))."""
    ks = jax.random.split(key, 12)

    def u(k, shape, fan_in):
        b = 1.0 / (fan_in ** 0.5)
        return jax.random.uniform(k, shape, jnp.float32, -b, b)

    return {
        # Conv1d(1, 64, 3): PyTorch weight (64, 1, 3) stored here as (k, out)
        "conv_w": u(ks[0], (3, C_OUT), 3.0),
        "conv_b": u(ks[1], (1, C_OUT), 3.0),
        # LSTM(64, 128): PyTorch (4H, in)/(4H, H) stored transposed; gates i,f,g,o
        "w_ih": u(ks[2], (C_OUT, 4 * HID), HID),
        "w_hh": u(ks[3], (HID, 4 * HID), HID),
        "b_l": u(ks[4], (1, 4 * HID), HID) + u(ks[5], (1, 4 * HID), HID),
        # Linear layers stored as (in, out)
        "fc1_w": u(ks[6], (HID, 64), HID), "fc1_b": u(ks[7], (1, 64), HID),
        "fc2_w": u(ks[8], (64, 1), 64.0), "fc2_b": u(ks[9], (1, 1), 64.0),
        "fcc_w": u(ks[10], (64, 3), 64.0), "fcc_b": u(ks[11], (1, 3), 64.0),
    }


def ref_forward(x, p):
    """Pure-JAX f32 reference matching PyTorch semantics, for verification."""
    B, _, L = x.shape
    sig = x[:, 0, :]
    xpad = jnp.pad(sig, ((0, 0), (1, 1)))
    taps = jnp.stack([xpad[:, k:k + L] for k in range(3)], axis=-1)  # (B, L, 3)
    conv = jnp.maximum(taps @ p["conv_w"] + p["conv_b"], 0.0)        # (B, L, 64)
    h = jnp.zeros((B, HID)); c = jnp.zeros((B, HID))
    for t in range(L):
        g = conv[:, t, :] @ p["w_ih"] + h @ p["w_hh"] + p["b_l"]
        i = jax.nn.sigmoid(g[:, :HID]); f = jax.nn.sigmoid(g[:, HID:2 * HID])
        gg = jnp.tanh(g[:, 2 * HID:3 * HID]); o = jax.nn.sigmoid(g[:, 3 * HID:])
        c = f * c + i * gg
        h = o * jnp.tanh(c)
    dense = jnp.maximum(h @ p["fc1_w"] + p["fc1_b"], 0.0)
    pred = dense @ p["fc2_w"] + p["fc2_b"]
    return pred, jax.nn.sigmoid(pred), dense @ p["fcc_w"] + p["fcc_b"]


if __name__ == "__main__":
    key = jax.random.PRNGKey(0)
    kx, kp = jax.random.split(key)

    B, L = 2, 16                     # max_seq_length = 16
    x = jax.random.normal(kx, (B, 1, L), jnp.float32)
    params = init_params(kp)
    dev_params = prepare_params(params)   # one-time re-layout (hot-path hoisted)

    out = jax.block_until_ready(hybrid_forward(x, dev_params))

    # Sanity-check against the pure-JAX f32 reference; tolerance is relaxed
    # because MXU operands (conv, projection, W_hh, fc1, heads) are bf16 and the
    # recurrence compounds rounding over 16 steps (observed error << 1e-2).
    r_pred, r_conf, r_cls = ref_forward(x, params)
    assert jnp.allclose(out["predicted_multiplier"], r_pred, atol=3e-2, rtol=3e-2)
    assert jnp.allclose(out["confidence_score"], r_conf, atol=3e-2, rtol=3e-2)
    assert jnp.allclose(out["classifier_output"], r_cls, atol=3e-2, rtol=3e-2)

    print("KERNEL_OK")
</pallas_src>

<mosaic_0001>
module attributes {stable_mosaic.version = 11 : i64} {
  func.func @hybrid_kernel(%arg0: memref<128x3xbf16, #tpu.memory_space<vmem>>, %arg1: memref<3x64xbf16, #tpu.memory_space<vmem>>, %arg2: memref<1x64xf32, #tpu.memory_space<vmem>>, %arg3: memref<64x512xbf16, #tpu.memory_space<vmem>>, %arg4: memref<128x512xbf16, #tpu.memory_space<vmem>>, %arg5: memref<1x512xf32, #tpu.memory_space<vmem>>, %arg6: memref<128x64xbf16, #tpu.memory_space<vmem>>, %arg7: memref<1x64xf32, #tpu.memory_space<vmem>>, %arg8: memref<64x5xbf16, #tpu.memory_space<vmem>>, %arg9: memref<1x5xf32, #tpu.memory_space<vmem>>, %arg10: memref<8x5xf32, #tpu.memory_space<vmem>>, %arg11: memref<128x512xf32, #tpu.memory_space<vmem>>) attributes {dimension_semantics = [], scalar_prefetch = 0 : i64, scratch_operands = 1 : i64, tpu.core_type = #tpu.core_type<tc>} {
    %c0 = arith.constant 0 : index
    %c0_0 = arith.constant 0 : index
    %0 = vector.load %arg0[%c0, %c0_0] : memref<128x3xbf16, #tpu.memory_space<vmem>>, vector<128x3xbf16>
    %c0_1 = arith.constant 0 : index
    %c0_2 = arith.constant 0 : index
    %1 = vector.load %arg1[%c0_1, %c0_2] : memref<3x64xbf16, #tpu.memory_space<vmem>>, vector<3x64xbf16>
    %cst = arith.constant dense<0.000000e+00> : vector<128x64xf32>
    %2 = tpu.matmul %0, %1, %cst {dimension_numbers = #tpu.dot_dimension_numbers<[1], [0], [0], [1], [0, 0, 1, 1], [], []>} : vector<128x3xbf16>, vector<3x64xbf16>, vector<128x64xf32> -> vector<128x64xf32>
    %c0_3 = arith.constant 0 : index
    %c0_4 = arith.constant 0 : index
    %3 = vector.load %arg2[%c0_3, %c0_4] : memref<1x64xf32, #tpu.memory_space<vmem>>, vector<1x64xf32>
    %4 = vector.broadcast %3 : vector<1x64xf32> to vector<128x64xf32>
    %5 = arith.addf %2, %4 : vector<128x64xf32>
    %cst_5 = arith.constant 0.000000e+00 : f32
    %6 = vector.broadcast %cst_5 : f32 to vector<128x64xf32>
    %7 = arith.maximumf %5, %6 : vector<128x64xf32>
    %8 = arith.truncf %7 : vector<128x64xf32> to vector<128x64xbf16>
    %c0_6 = arith.constant 0 : index
    %c0_7 = arith.constant 0 : index
    %9 = vector.load %arg3[%c0_6, %c0_7] : memref<64x512xbf16, #tpu.memory_space<vmem>>, vector<64x512xbf16>
    %cst_8 = arith.constant dense<0.000000e+00> : vector<128x512xf32>
    %10 = tpu.matmul %8, %9, %cst_8 {dimension_numbers = #tpu.dot_dimension_numbers<[1], [0], [0], [1], [0, 0, 1, 1], [], []>} : vector<128x64xbf16>, vector<64x512xbf16>, vector<128x512xf32> -> vector<128x512xf32>
    %c0_9 = arith.constant 0 : index
    %c0_10 = arith.constant 0 : index
    %11 = vector.load %arg5[%c0_9, %c0_10] : memref<1x512xf32, #tpu.memory_space<vmem>>, vector<1x512xf32>
    %12 = vector.broadcast %11 : vector<1x512xf32> to vector<128x512xf32>
    %13 = arith.addf %10, %12 : vector<128x512xf32>
    %c0_11 = arith.constant 0 : index
    %c0_12 = arith.constant 0 : index
    %14 = vector.load %arg11[%c0_11, %c0_12] : memref<128x512xf32, #tpu.memory_space<vmem>>, vector<128x512xf32>
    tpu.vector_store %arg11[%c0_11, %c0_12], %13 {strides = array<i32>} : memref<128x512xf32, #tpu.memory_space<vmem>>, vector<128x512xf32>,
    %cst_13 = arith.constant 0.000000e+00 : f32
    %15 = vector.broadcast %cst_13 : f32 to vector<8x128xf32>
    %cst_14 = arith.constant 0.000000e+00 : f32
    %16 = vector.broadcast %cst_14 : f32 to vector<8x128xf32>
    %c0_15 = arith.constant 0 : index
    %c0_16 = arith.constant 0 : index
    %17 = vector.load %arg11[%c0_15, %c0_16] : memref<128x512xf32, #tpu.memory_space<vmem>>, vector<8x512xf32>
    %18 = arith.truncf %15 : vector<8x128xf32> to vector<8x128xbf16>
    %c0_17 = arith.constant 0 : index
    %c0_18 = arith.constant 0 : index
    %19 = vector.load %arg4[%c0_17, %c0_18] : memref<128x512xbf16, #tpu.memory_space<vmem>>, vector<128x512xbf16>
    %cst_19 = arith.constant dense<0.000000e+00> : vector<8x512xf32>
    %20 = tpu.matmul %18, %19, %cst_19 {dimension_numbers = #tpu.dot_dimension_numbers<[1], [0], [0], [1], [0, 0, 1, 1], [], []>} : vector<8x128xbf16>, vector<128x512xbf16>, vector<8x512xf32> -> vector<8x512xf32>
    %21 = arith.addf %17, %20 : vector<8x512xf32>
    %22 = vector.extract_strided_slice %21 {offsets = [0, 0], sizes = [8, 384], strides = [1, 1]} : vector<8x512xf32> to vector<8x384xf32>
    %23 = arith.negf %22 : vector<8x384xf32>
    %24 = math.exp %23 : vector<8x384xf32>
    %cst_20 = arith.constant 1.000000e+00 : f32
    %25 = vector.broadcast %cst_20 : f32 to vector<8x384xf32>
    %26 = arith.addf %25, %24 : vector<8x384xf32>
    %27 = arith.divf %25, %26 : vector<8x384xf32>
    %28 = vector.extract_strided_slice %27 {offsets = [0, 0], sizes = [8, 128], strides = [1, 1]} : vector<8x384xf32> to vector<8x128xf32>
    %29 = vector.extract_strided_slice %27 {offsets = [0, 128], sizes = [8, 128], strides = [1, 1]} : vector<8x384xf32> to vector<8x128xf32>
    %30 = vector.extract_strided_slice %27 {offsets = [0, 256], sizes = [8, 128], strides = [1, 1]} : vector<8x384xf32> to vector<8x128xf32>
    %31 = vector.extract_strided_slice %21 {offsets = [0, 384], sizes = [8, 128], strides = [1, 1]} : vector<8x512xf32> to vector<8x128xf32>
    %32 = math.tanh %31 : vector<8x128xf32>
    %33 = arith.mulf %29, %16 : vector<8x128xf32>
    %34 = arith.mulf %28, %32 : vector<8x128xf32>
    %35 = arith.addf %33, %34 : vector<8x128xf32>
    %36 = math.tanh %35 : vector<8x128xf32>
    %37 = arith.mulf %30, %36 : vector<8x128xf32>
    %c8 = arith.constant 8 : index
    %c0_21 = arith.constant 0 : index
    %38 = vector.load %arg11[%c8, %c0_21] : memref<128x512xf32, #tpu.memory_space<vmem>>, vector<8x512xf32>
    %39 = arith.truncf %37 : vector<8x128xf32> to vector<8x128xbf16>
    %c0_22 = arith.constant 0 : index
    %c0_23 = arith.constant 0 : index
    %40 = vector.load %arg4[%c0_22, %c0_23] : memref<128x512xbf16, #tpu.memory_space<vmem>>, vector<128x512xbf16>
    %cst_24 = arith.constant dense<0.000000e+00> : vector<8x512xf32>
    %41 = tpu.matmul %39, %40, %cst_24 {dimension_numbers = #tpu.dot_dimension_numbers<[1], [0], [0], [1], [0, 0, 1, 1], [], []>} : vector<8x128xbf16>, vector<128x512xbf16>, vector<8x512xf32> -> vector<8x512xf32>
    %42 = arith.addf %38, %41 : vector<8x512xf32>
    %43 = vector.extract_strided_slice %42 {offsets = [0, 0], sizes = [8, 384], strides = [1, 1]} : vector<8x512xf32> to vector<8x384xf32>
    %44 = arith.negf %43 : vector<8x384xf32>
    %45 = math.exp %44 : vector<8x384xf32>
    %cst_25 = arith.constant 1.000000e+00 : f32
    %46 = vector.broadcast %cst_25 : f32 to vector<8x384xf32>
    %47 = arith.addf %46, %45 : vector<8x384xf32>
    %48 = arith.divf %46, %47 : vector<8x384xf32>
    %49 = vector.extract_strided_slice %48 {offsets = [0, 0], sizes = [8, 128], strides = [1, 1]} : vector<8x384xf32> to vector<8x128xf32>
    %50 = vector.extract_strided_slice %48 {offsets = [0, 128], sizes = [8, 128], strides = [1, 1]} : vector<8x384xf32> to vector<8x128xf32>
    %51 = vector.extract_strided_slice %48 {offsets = [0, 256], sizes = [8, 128], strides = [1, 1]} : vector<8x384xf32> to vector<8x128xf32>
    %52 = vector.extract_strided_slice %42 {offsets = [0, 384], sizes = [8, 128], strides = [1, 1]} : vector<8x512xf32> to vector<8x128xf32>
    %53 = math.tanh %52 : vector<8x128xf32>
    %54 = arith.mulf %50, %35 : vector<8x128xf32>
    %55 = arith.mulf %49, %53 : vector<8x128xf32>
    %56 = arith.addf %54, %55 : vector<8x128xf32>
    %57 = math.tanh %56 : vector<8x128xf32>
    %58 = arith.mulf %51, %57 : vector<8x128xf32>
    %c16 = arith.constant 16 : index
    %c0_26 = arith.constant 0 : index
    %59 = vector.load %arg11[%c16, %c0_26] : memref<128x512xf32, #tpu.memory_space<vmem>>, vector<8x512xf32>
    %60 = arith.truncf %58 : vector<8x128xf32> to vector<8x128xbf16>
    %c0_27 = arith.constant 0 : index
    %c0_28 = arith.constant 0 : index
    %61 = vector.load %arg4[%c0_27, %c0_28] : memref<128x512xbf16, #tpu.memory_space<vmem>>, vector<128x512xbf16>
    %cst_29 = arith.constant dense<0.000000e+00> : vector<8x512xf32>
    %62 = tpu.matmul %60, %61, %cst_29 {dimension_numbers = #tpu.dot_dimension_numbers<[1], [0], [0], [1], [0, 0, 1, 1], [], []>} : vector<8x128xbf16>, vector<128x512xbf16>, vector<8x512xf32> -> vector<8x512xf32>
    %63 = arith.addf %59, %62 : vector<8x512xf32>
    %64 = vector.extract_strided_slice %63 {offsets = [0, 0], sizes = [8, 384], strides = [1, 1]} : vector<8x512xf32> to vector<8x384xf32>
    %65 = arith.negf %64 : vector<8x384xf32>
    %66 = math.exp %65 : vector<8x384xf32>
    %cst_30 = arith.constant 1.000000e+00 : f32
    %67 = vector.broadcast %cst_30 : f32 to vector<8x384xf32>
    %68 = arith.addf %67, %66 : vector<8x384xf32>
    %69 = arith.divf %67, %68 : vector<8x384xf32>
    %70 = vector.extract_strided_slice %69 {offsets = [0, 0], sizes = [8, 128], strides = [1, 1]} : vector<8x384xf32> to vector<8x128xf32>
    %71 = vector.extract_strided_slice %69 {offsets = [0, 128], sizes = [8, 128], strides = [1, 1]} : vector<8x384xf32> to vector<8x128xf32>
    %72 = vector.extract_strided_slice %69 {offsets = [0, 256], sizes = [8, 128], strides = [1, 1]} : vector<8x384xf32> to vector<8x128xf32>
    %73 = vector.extract_strided_slice %63 {offsets = [0, 384], sizes = [8, 128], strides = [1, 1]} : vector<8x512xf32> to vector<8x128xf32>
    %74 = math.tanh %73 : vector<8x128xf32>
    %75 = arith.mulf %71, %56 : vector<8x128xf32>
    %76 = arith.mulf %70, %74 : vector<8x128xf32>
    %77 = arith.addf %75, %76 : vector<8x128xf32>
    %78 = math.tanh %77 : vector<8x128xf32>
    %79 = arith.mulf %72, %78 : vector<8x128xf32>
    %c24 = arith.constant 24 : index
    %c0_31 = arith.constant 0 : index
    %80 = vector.load %arg11[%c24, %c0_31] : memref<128x512xf32, #tpu.memory_space<vmem>>, vector<8x512xf32>
    %81 = arith.truncf %79 : vector<8x128xf32> to vector<8x128xbf16>
    %c0_32 = arith.constant 0 : index
    %c0_33 = arith.constant 0 : index
    %82 = vector.load %arg4[%c0_32, %c0_33] : memref<128x512xbf16, #tpu.memory_space<vmem>>, vector<128x512xbf16>
    %cst_34 = arith.constant dense<0.000000e+00> : vector<8x512xf32>
    %83 = tpu.matmul %81, %82, %cst_34 {dimension_numbers = #tpu.dot_dimension_numbers<[1], [0], [0], [1], [0, 0, 1, 1], [], []>} : vector<8x128xbf16>, vector<128x512xbf16>, vector<8x512xf32> -> vector<8x512xf32>
    %84 = arith.addf %80, %83 : vector<8x512xf32>
    %85 = vector.extract_strided_slice %84 {offsets = [0, 0], sizes = [8, 384], strides = [1, 1]} : vector<8x512xf32> to vector<8x384xf32>
    %86 = arith.negf %85 : vector<8x384xf32>
    %87 = math.exp %86 : vector<8x384xf32>
    %cst_35 = arith.constant 1.000000e+00 : f32
    %88 = vector.broadcast %cst_35 : f32 to vector<8x384xf32>
    %89 = arith.addf %88, %87 : vector<8x384xf32>
    %90 = arith.divf %88, %89 : vector<8x384xf32>
    %91 = vector.extract_strided_slice %90 {offsets = [0, 0], sizes = [8, 128], strides = [1, 1]} : vector<8x384xf32> to vector<8x128xf32>
    %92 = vector.extract_strided_slice %90 {offsets = [0, 128], sizes = [8, 128], strides = [1, 1]} : vector<8x384xf32> to vector<8x128xf32>
    %93 = vector.extract_strided_slice %90 {offsets = [0, 256], sizes = [8, 128], strides = [1, 1]} : vector<8x384xf32> to vector<8x128xf32>
    %94 = vector.extract_strided_slice %84 {offsets = [0, 384], sizes = [8, 128], strides = [1, 1]} : vector<8x512xf32> to vector<8x128xf32>
    %95 = math.tanh %94 : vector<8x128xf32>
    %96 = arith.mulf %92, %77 : vector<8x128xf32>
    %97 = arith.mulf %91, %95 : vector<8x128xf32>
    %98 = arith.addf %96, %97 : vector<8x128xf32>
    %99 = math.tanh %98 : vector<8x128xf32>
    %100 = arith.mulf %93, %99 : vector<8x128xf32>
    %c32 = arith.constant 32 : index
    %c0_36 = arith.constant 0 : index
    %101 = vector.load %arg11[%c32, %c0_36] : memref<128x512xf32, #tpu.memory_space<vmem>>, vector<8x512xf32>
    %102 = arith.truncf %100 : vector<8x128xf32> to vector<8x128xbf16>
    %c0_37 = arith.constant 0 : index
    %c0_38 = arith.constant 0 : index
    %103 = vector.load %arg4[%c0_37, %c0_38] : memref<128x512xbf16, #tpu.memory_space<vmem>>, vector<128x512xbf16>
    %cst_39 = arith.constant dense<0.000000e+00> : vector<8x512xf32>
    %104 = tpu.matmul %102, %103, %cst_39 {dimension_numbers = #tpu.dot_dimension_numbers<[1], [0], [0], [1], [0, 0, 1, 1], [], []>} : vector<8x128xbf16>, vector<128x512xbf16>, vector<8x512xf32> -> vector<8x512xf32>
    %105 = arith.addf %101, %104 : vector<8x512xf32>
    %106 = vector.extract_strided_slice %105 {offsets = [0, 0], sizes = [8, 384], strides = [1, 1]} : vector<8x512xf32> to vector<8x384xf32>
    %107 = arith.negf %106 : vector<8x384xf32>
    %108 = math.exp %107 : vector<8x384xf32>
    %cst_40 = arith.constant 1.000000e+00 : f32
    %109 = vector.broadcast %cst_40 : f32 to vector<8x384xf32>
    %110 = arith.addf %109, %108 : vector<8x384xf32>
    %111 = arith.divf %109, %110 : vector<8x384xf32>
    %112 = vector.extract_strided_slice %111 {offsets = [0, 0], sizes = [8, 128], strides = [1, 1]} : vector<8x384xf32> to vector<8x128xf32>
    %113 = vector.extract_strided_slice %111 {offsets = [0, 128], sizes = [8, 128], strides = [1, 1]} : vector<8x384xf32> to vector<8x128xf32>
    %114 = vector.extract_strided_slice %111 {offsets = [0, 256], sizes = [8, 128], strides = [1, 1]} : vector<8x384xf32> to vector<8x128xf32>
    %115 = vector.extract_strided_slice %105 {offsets = [0, 384], sizes = [8, 128], strides = [1, 1]} : vector<8x512xf32> to vector<8x128xf32>
    %116 = math.tanh %115 : vector<8x128xf32>
    %117 = arith.mulf %113, %98 : vector<8x128xf32>
    %118 = arith.mulf %112, %116 : vector<8x128xf32>
    %119 = arith.addf %117, %118 : vector<8x128xf32>
    %120 = math.tanh %119 : vector<8x128xf32>
    %121 = arith.mulf %114, %120 : vector<8x128xf32>
    %c40 = arith.constant 40 : index
    %c0_41 = arith.constant 0 : index
    %122 = vector.load %arg11[%c40, %c0_41] : memref<128x512xf32, #tpu.memory_space<vmem>>, vector<8x512xf32>
    %123 = arith.truncf %121 : vector<8x128xf32> to vector<8x128xbf16>
    %c0_42 = arith.constant 0 : index
    %c0_43 = arith.constant 0 : index
    %124 = vector.load %arg4[%c0_42, %c0_43] : memref<128x512xbf16, #tpu.memory_space<vmem>>, vector<128x512xbf16>
    %cst_44 = arith.constant dense<0.000000e+00> : vector<8x512xf32>
    %125 = tpu.matmul %123, %124, %cst_44 {dimension_numbers = #tpu.dot_dimension_numbers<[1], [0], [0], [1], [0, 0, 1, 1], [], []>} : vector<8x128xbf16>, vector<128x512xbf16>, vector<8x512xf32> -> vector<8x512xf32>
    %126 = arith.addf %122, %125 : vector<8x512xf32>
    %127 = vector.extract_strided_slice %126 {offsets = [0, 0], sizes = [8, 384], strides = [1, 1]} : vector<8x512xf32> to vector<8x384xf32>
    %128 = arith.negf %127 : vector<8x384xf32>
    %129 = math.exp %128 : vector<8x384xf32>
    %cst_45 = arith.constant 1.000000e+00 : f32
    %130 = vector.broadcast %cst_45 : f32 to vector<8x384xf32>
    %131 = arith.addf %130, %129 : vector<8x384xf32>
    %132 = arith.divf %130, %131 : vector<8x384xf32>
    %133 = vector.extract_strided_slice %132 {offsets = [0, 0], sizes = [8, 128], strides = [1, 1]} : vector<8x384xf32> to vector<8x128xf32>
    %134 = vector.extract_strided_slice %132 {offsets = [0, 128], sizes = [8, 128], strides = [1, 1]} : vector<8x384xf32> to vector<8x128xf32>
    %135 = vector.extract_strided_slice %132 {offsets = [0, 256], sizes = [8, 128], strides = [1, 1]} : vector<8x384xf32> to vector<8x128xf32>
    %136 = vector.extract_strided_slice %126 {offsets = [0, 384], sizes = [8, 128], strides = [1, 1]} : vector<8x512xf32> to vector<8x128xf32>
    %137 = math.tanh %136 : vector<8x128xf32>
    %138 = arith.mulf %134, %119 : vector<8x128xf32>
    %139 = arith.mulf %133, %137 : vector<8x128xf32>
    %140 = arith.addf %138, %139 : vector<8x128xf32>
    %141 = math.tanh %140 : vector<8x128xf32>
    %142 = arith.mulf %135, %141 : vector<8x128xf32>
    %c48 = arith.constant 48 : index
    %c0_46 = arith.constant 0 : index
    %143 = vector.load %arg11[%c48, %c0_46] : memref<128x512xf32, #tpu.memory_space<vmem>>, vector<8x512xf32>
    %144 = arith.truncf %142 : vector<8x128xf32> to vector<8x128xbf16>
    %c0_47 = arith.constant 0 : index
    %c0_48 = arith.constant 0 : index
    %145 = vector.load %arg4[%c0_47, %c0_48] : memref<128x512xbf16, #tpu.memory_space<vmem>>, vector<128x512xbf16>
    %cst_49 = arith.constant dense<0.000000e+00> : vector<8x512xf32>
    %146 = tpu.matmul %144, %145, %cst_49 {dimension_numbers = #tpu.dot_dimension_numbers<[1], [0], [0], [1], [0, 0, 1, 1], [], []>} : vector<8x128xbf16>, vector<128x512xbf16>, vector<8x512xf32> -> vector<8x512xf32>
    %147 = arith.addf %143, %146 : vector<8x512xf32>
    %148 = vector.extract_strided_slice %147 {offsets = [0, 0], sizes = [8, 384], strides = [1, 1]} : vector<8x512xf32> to vector<8x384xf32>
    %149 = arith.negf %148 : vector<8x384xf32>
    %150 = math.exp %149 : vector<8x384xf32>
    %cst_50 = arith.constant 1.000000e+00 : f32
    %151 = vector.broadcast %cst_50 : f32 to vector<8x384xf32>
    %152 = arith.addf %151, %150 : vector<8x384xf32>
    %153 = arith.divf %151, %152 : vector<8x384xf32>
    %154 = vector.extract_strided_slice %153 {offsets = [0, 0], sizes = [8, 128], strides = [1, 1]} : vector<8x384xf32> to vector<8x128xf32>
    %155 = vector.extract_strided_slice %153 {offsets = [0, 128], sizes = [8, 128], strides = [1, 1]} : vector<8x384xf32> to vector<8x128xf32>
    %156 = vector.extract_strided_slice %153 {offsets = [0, 256], sizes = [8, 128], strides = [1, 1]} : vector<8x384xf32> to vector<8x128xf32>
    %157 = vector.extract_strided_slice %147 {offsets = [0, 384], sizes = [8, 128], strides = [1, 1]} : vector<8x512xf32> to vector<8x128xf32>
    %158 = math.tanh %157 : vector<8x128xf32>
    %159 = arith.mulf %155, %140 : vector<8x128xf32>
    %160 = arith.mulf %154, %158 : vector<8x128xf32>
    %161 = arith.addf %159, %160 : vector<8x128xf32>
    %162 = math.tanh %161 : vector<8x128xf32>
    %163 = arith.mulf %156, %162 : vector<8x128xf32>
    %c56 = arith.constant 56 : index
    %c0_51 = arith.constant 0 : index
    %164 = vector.load %arg11[%c56, %c0_51] : memref<128x512xf32, #tpu.memory_space<vmem>>, vector<8x512xf32>
    %165 = arith.truncf %163 : vector<8x128xf32> to vector<8x128xbf16>
    %c0_52 = arith.constant 0 : index
    %c0_53 = arith.constant 0 : index
    %166 = vector.load %arg4[%c0_52, %c0_53] : memref<128x512xbf16, #tpu.memory_space<vmem>>, vector<128x512xbf16>
    %cst_54 = arith.constant dense<0.000000e+00> : vector<8x512xf32>
    %167 = tpu.matmul %165, %166, %cst_54 {dimension_numbers = #tpu.dot_dimension_numbers<[1], [0], [0], [1], [0, 0, 1, 1], [], []>} : vector<8x128xbf16>, vector<128x512xbf16>, vector<8x512xf32> -> vector<8x512xf32>
    %168 = arith.addf %164, %167 : vector<8x512xf32>
    %169 = vector.extract_strided_slice %168 {offsets = [0, 0], sizes = [8, 384], strides = [1, 1]} : vector<8x512xf32> to vector<8x384xf32>
    %170 = arith.negf %169 : vector<8x384xf32>
    %171 = math.exp %170 : vector<8x384xf32>
    %cst_55 = arith.constant 1.000000e+00 : f32
    %172 = vector.broadcast %cst_55 : f32 to vector<8x384xf32>
    %173 = arith.addf %172, %171 : vector<8x384xf32>
    %174 = arith.divf %172, %173 : vector<8x384xf32>
    %175 = vector.extract_strided_slice %174 {offsets = [0, 0], sizes = [8, 128], strides = [1, 1]} : vector<8x384xf32> to vector<8x128xf32>
    %176 = vector.extract_strided_slice %174 {offsets = [0, 128], sizes = [8, 128], strides = [1, 1]} : vector<8x384xf32> to vector<8x128xf32>
    %177 = vector.extract_strided_slice %174 {offsets = [0, 256], sizes = [8, 128], strides = [1, 1]} : vector<8x384xf32> to vector<8x128xf32>
    %178 = vector.extract_strided_slice %168 {offsets = [0, 384], sizes = [8, 128], strides = [1, 1]} : vector<8x512xf32> to vector<8x128xf32>
    %179 = math.tanh %178 : vector<8x128xf32>
    %180 = arith.mulf %176, %161 : vector<8x128xf32>
    %181 = arith.mulf %175, %179 : vector<8x128xf32>
    %182 = arith.addf %180, %181 : vector<8x128xf32>
    %183 = math.tanh %182 : vector<8x128xf32>
    %184 = arith.mulf %177, %183 : vector<8x128xf32>
    %c64 = arith.constant 64 : index
    %c0_56 = arith.constant 0 : index
    %185 = vector.load %arg11[%c64, %c0_56] : memref<128x512xf32, #tpu.memory_space<vmem>>, vector<8x512xf32>
    %186 = arith.truncf %184 : vector<8x128xf32> to vector<8x128xbf16>
    %c0_57 = arith.constant 0 : index
    %c0_58 = arith.constant 0 : index
    %187 = vector.load %arg4[%c0_57, %c0_58] : memref<128x512xbf16, #tpu.memory_space<vmem>>, vector<128x512xbf16>
    %cst_59 = arith.constant dense<0.000000e+00> : vector<8x512xf32>
    %188 = tpu.matmul %186, %187, %cst_59 {dimension_numbers = #tpu.dot_dimension_numbers<[1], [0], [0], [1], [0, 0, 1, 1], [], []>} : vector<8x128xbf16>, vector<128x512xbf16>, vector<8x512xf32> -> vector<8x512xf32>
    %189 = arith.addf %185, %188 : vector<8x512xf32>
    %190 = vector.extract_strided_slice %189 {offsets = [0, 0], sizes = [8, 384], strides = [1, 1]} : vector<8x512xf32> to vector<8x384xf32>
    %191 = arith.negf %190 : vector<8x384xf32>
    %192 = math.exp %191 : vector<8x384xf32>
    %cst_60 = arith.constant 1.000000e+00 : f32
    %193 = vector.broadcast %cst_60 : f32 to vector<8x384xf32>
    %194 = arith.addf %193, %192 : vector<8x384xf32>
    %195 = arith.divf %193, %194 : vector<8x384xf32>
    %196 = vector.extract_strided_slice %195 {offsets = [0, 0], sizes = [8, 128], strides = [1, 1]} : vector<8x384xf32> to vector<8x128xf32>
    %197 = vector.extract_strided_slice %195 {offsets = [0, 128], sizes = [8, 128], strides = [1, 1]} : vector<8x384xf32> to vector<8x128xf32>
    %198 = vector.extract_strided_slice %195 {offsets = [0, 256], sizes = [8, 128], strides = [1, 1]} : vector<8x384xf32> to vector<8x128xf32>
    %199 = vector.extract_strided_slice %189 {offsets = [0, 384], sizes = [8, 128], strides = [1, 1]} : vector<8x512xf32> to vector<8x128xf32>
    %200 = math.tanh %199 : vector<8x128xf32>
    %201 = arith.mulf %197, %182 : vector<8x128xf32>
    %202 = arith.mulf %196, %200 : vector<8x128xf32>
    %203 = arith.addf %201, %202 : vector<8x128xf32>
    %204 = math.tanh %203 : vector<8x128xf32>
    %205 = arith.mulf %198, %204 : vector<8x128xf32>
    %c72 = arith.constant 72 : index
    %c0_61 = arith.constant 0 : index
    %206 = vector.load %arg11[%c72, %c0_61] : memref<128x512xf32, #tpu.memory_space<vmem>>, vector<8x512xf32>
    %207 = arith.truncf %205 : vector<8x128xf32> to vector<8x128xbf16>
    %c0_62 = arith.constant 0 : index
    %c0_63 = arith.constant 0 : index
    %208 = vector.load %arg4[%c0_62, %c0_63] : memref<128x512xbf16, #tpu.memory_space<vmem>>, vector<128x512xbf16>
    %cst_64 = arith.constant dense<0.000000e+00> : vector<8x512xf32>
    %209 = tpu.matmul %207, %208, %cst_64 {dimension_numbers = #tpu.dot_dimension_numbers<[1], [0], [0], [1], [0, 0, 1, 1], [], []>} : vector<8x128xbf16>, vector<128x512xbf16>, vector<8x512xf32> -> vector<8x512xf32>
    %210 = arith.addf %206, %209 : vector<8x512xf32>
    %211 = vector.extract_strided_slice %210 {offsets = [0, 0], sizes = [8, 384], strides = [1, 1]} : vector<8x512xf32> to vector<8x384xf32>
    %212 = arith.negf %211 : vector<8x384xf32>
    %213 = math.exp %212 : vector<8x384xf32>
    %cst_65 = arith.constant 1.000000e+00 : f32
    %214 = vector.broadcast %cst_65 : f32 to vector<8x384xf32>
    %215 = arith.addf %214, %213 : vector<8x384xf32>
    %216 = arith.divf %214, %215 : vector<8x384xf32>
    %217 = vector.extract_strided_slice %216 {offsets = [0, 0], sizes = [8, 128], strides = [1, 1]} : vector<8x384xf32> to vector<8x128xf32>
    %218 = vector.extract_strided_slice %216 {offsets = [0, 128], sizes = [8, 128], strides = [1, 1]} : vector<8x384xf32> to vector<8x128xf32>
    %219 = vector.extract_strided_slice %216 {offsets = [0, 256], sizes = [8, 128], strides = [1, 1]} : vector<8x384xf32> to vector<8x128xf32>
    %220 = vector.extract_strided_slice %210 {offsets = [0, 384], sizes = [8, 128], strides = [1, 1]} : vector<8x512xf32> to vector<8x128xf32>
    %221 = math.tanh %220 : vector<8x128xf32>
    %222 = arith.mulf %218, %203 : vector<8x128xf32>
    %223 = arith.mulf %217, %221 : vector<8x128xf32>
    %224 = arith.addf %222, %223 : vector<8x128xf32>
    %225 = math.tanh %224 : vector<8x128xf32>
    %226 = arith.mulf %219, %225 : vector<8x128xf32>
    %c80 = arith.constant 80 : index
    %c0_66 = arith.constant 0 : index
    %227 = vector.load %arg11[%c80, %c0_66] : memref<128x512xf32, #tpu.memory_space<vmem>>, vector<8x512xf32>
    %228 = arith.truncf %226 : vector<8x128xf32> to vector<8x128xbf16>
    %c0_67 = arith.constant 0 : index
    %c0_68 = arith.constant 0 : index
    %229 = vector.load %arg4[%c0_67, %c0_68] : memref<128x512xbf16, #tpu.memory_space<vmem>>, vector<128x512xbf16>
    %cst_69 = arith.constant dense<0.000000e+00> : vector<8x512xf32>
    %230 = tpu.matmul %228, %229, %cst_69 {dimension_numbers = #tpu.dot_dimension_numbers<[1], [0], [0], [1], [0, 0, 1, 1], [], []>} : vector<8x128xbf16>, vector<128x512xbf16>, vector<8x512xf32> -> vector<8x512xf32>
    %231 = arith.addf %227, %230 : vector<8x512xf32>
    %232 = vector.extract_strided_slice %231 {offsets = [0, 0], sizes = [8, 384], strides = [1, 1]} : vector<8x512xf32> to vector<8x384xf32>
    %233 = arith.negf %232 : vector<8x384xf32>
    %234 = math.exp %233 : vector<8x384xf32>
    %cst_70 = arith.constant 1.000000e+00 : f32
    %235 = vector.broadcast %cst_70 : f32 to vector<8x384xf32>
    %236 = arith.addf %235, %234 : vector<8x384xf32>
    %237 = arith.divf %235, %236 : vector<8x384xf32>
    %238 = vector.extract_strided_slice %237 {offsets = [0, 0], sizes = [8, 128], strides = [1, 1]} : vector<8x384xf32> to vector<8x128xf32>
    %239 = vector.extract_strided_slice %237 {offsets = [0, 128], sizes = [8, 128], strides = [1, 1]} : vector<8x384xf32> to vector<8x128xf32>
    %240 = vector.extract_strided_slice %237 {offsets = [0, 256], sizes = [8, 128], strides = [1, 1]} : vector<8x384xf32> to vector<8x128xf32>
    %241 = vector.extract_strided_slice %231 {offsets = [0, 384], sizes = [8, 128], strides = [1, 1]} : vector<8x512xf32> to vector<8x128xf32>
    %242 = math.tanh %241 : vector<8x128xf32>
    %243 = arith.mulf %239, %224 : vector<8x128xf32>
    %244 = arith.mulf %238, %242 : vector<8x128xf32>
    %245 = arith.addf %243, %244 : vector<8x128xf32>
    %246 = math.tanh %245 : vector<8x128xf32>
    %247 = arith.mulf %240, %246 : vector<8x128xf32>
    %c88 = arith.constant 88 : index
    %c0_71 = arith.constant 0 : index
    %248 = vector.load %arg11[%c88, %c0_71] : memref<128x512xf32, #tpu.memory_space<vmem>>, vector<8x512xf32>
    %249 = arith.truncf %247 : vector<8x128xf32> to vector<8x128xbf16>
    %c0_72 = arith.constant 0 : index
    %c0_73 = arith.constant 0 : index
    %250 = vector.load %arg4[%c0_72, %c0_73] : memref<128x512xbf16, #tpu.memory_space<vmem>>, vector<128x512xbf16>
    %cst_74 = arith.constant dense<0.000000e+00> : vector<8x512xf32>
    %251 = tpu.matmul %249, %250, %cst_74 {dimension_numbers = #tpu.dot_dimension_numbers<[1], [0], [0], [1], [0, 0, 1, 1], [], []>} : vector<8x128xbf16>, vector<128x512xbf16>, vector<8x512xf32> -> vector<8x512xf32>
    %252 = arith.addf %248, %251 : vector<8x512xf32>
    %253 = vector.extract_strided_slice %252 {offsets = [0, 0], sizes = [8, 384], strides = [1, 1]} : vector<8x512xf32> to vector<8x384xf32>
    %254 = arith.negf %253 : vector<8x384xf32>
    %255 = math.exp %254 : vector<8x384xf32>
    %cst_75 = arith.constant 1.000000e+00 : f32
    %256 = vector.broadcast %cst_75 : f32 to vector<8x384xf32>
    %257 = arith.addf %256, %255 : vector<8x384xf32>
    %258 = arith.divf %256, %257 : vector<8x384xf32>
    %259 = vector.extract_strided_slice %258 {offsets = [0, 0], sizes = [8, 128], strides = [1, 1]} : vector<8x384xf32> to vector<8x128xf32>
    %260 = vector.extract_strided_slice %258 {offsets = [0, 128], sizes = [8, 128], strides = [1, 1]} : vector<8x384xf32> to vector<8x128xf32>
    %261 = vector.extract_strided_slice %258 {offsets = [0, 256], sizes = [8, 128], strides = [1, 1]} : vector<8x384xf32> to vector<8x128xf32>
    %262 = vector.extract_strided_slice %252 {offsets = [0, 384], sizes = [8, 128], strides = [1, 1]} : vector<8x512xf32> to vector<8x128xf32>
    %263 = math.tanh %262 : vector<8x128xf32>
    %264 = arith.mulf %260, %245 : vector<8x128xf32>
    %265 = arith.mulf %259, %263 : vector<8x128xf32>
    %266 = arith.addf %264, %265 : vector<8x128xf32>
    %267 = math.tanh %266 : vector<8x128xf32>
    %268 = arith.mulf %261, %267 : vector<8x128xf32>
    %c96 = arith.constant 96 : index
    %c0_76 = arith.constant 0 : index
    %269 = vector.load %arg11[%c96, %c0_76] : memref<128x512xf32, #tpu.memory_space<vmem>>, vector<8x512xf32>
    %270 = arith.truncf %268 : vector<8x128xf32> to vector<8x128xbf16>
    %c0_77 = arith.constant 0 : index
    %c0_78 = arith.constant 0 : index
    %271 = vector.load %arg4[%c0_77, %c0_78] : memref<128x512xbf16, #tpu.memory_space<vmem>>, vector<128x512xbf16>
    %cst_79 = arith.constant dense<0.000000e+00> : vector<8x512xf32>
    %272 = tpu.matmul %270, %271, %cst_79 {dimension_numbers = #tpu.dot_dimension_numbers<[1], [0], [0], [1], [0, 0, 1, 1], [], []>} : vector<8x128xbf16>, vector<128x512xbf16>, vector<8x512xf32> -> vector<8x512xf32>
    %273 = arith.addf %269, %272 : vector<8x512xf32>
    %274 = vector.extract_strided_slice %273 {offsets = [0, 0], sizes = [8, 384], strides = [1, 1]} : vector<8x512xf32> to vector<8x384xf32>
    %275 = arith.negf %274 : vector<8x384xf32>
    %276 = math.exp %275 : vector<8x384xf32>
    %cst_80 = arith.constant 1.000000e+00 : f32
    %277 = vector.broadcast %cst_80 : f32 to vector<8x384xf32>
    %278 = arith.addf %277, %276 : vector<8x384xf32>
    %279 = arith.divf %277, %278 : vector<8x384xf32>
    %280 = vector.extract_strided_slice %279 {offsets = [0, 0], sizes = [8, 128], strides = [1, 1]} : vector<8x384xf32> to vector<8x128xf32>
    %281 = vector.extract_strided_slice %279 {offsets = [0, 128], sizes = [8, 128], strides = [1, 1]} : vector<8x384xf32> to vector<8x128xf32>
    %282 = vector.extract_strided_slice %279 {offsets = [0, 256], sizes = [8, 128], strides = [1, 1]} : vector<8x384xf32> to vector<8x128xf32>
    %283 = vector.extract_strided_slice %273 {offsets = [0, 384], sizes = [8, 128], strides = [1, 1]} : vector<8x512xf32> to vector<8x128xf32>
    %284 = math.tanh %283 : vector<8x128xf32>
    %285 = arith.mulf %281, %266 : vector<8x128xf32>
    %286 = arith.mulf %280, %284 : vector<8x128xf32>
    %287 = arith.addf %285, %286 : vector<8x128xf32>
    %288 = math.tanh %287 : vector<8x128xf32>
    %289 = arith.mulf %282, %288 : vector<8x128xf32>
    %c104 = arith.constant 104 : index
    %c0_81 = arith.constant 0 : index
    %290 = vector.load %arg11[%c104, %c0_81] : memref<128x512xf32, #tpu.memory_space<vmem>>, vector<8x512xf32>
    %291 = arith.truncf %289 : vector<8x128xf32> to vector<8x128xbf16>
    %c0_82 = arith.constant 0 : index
    %c0_83 = arith.constant 0 : index
    %292 = vector.load %arg4[%c0_82, %c0_83] : memref<128x512xbf16, #tpu.memory_space<vmem>>, vector<128x512xbf16>
    %cst_84 = arith.constant dense<0.000000e+00> : vector<8x512xf32>
    %293 = tpu.matmul %291, %292, %cst_84 {dimension_numbers = #tpu.dot_dimension_numbers<[1], [0], [0], [1], [0, 0, 1, 1], [], []>} : vector<8x128xbf16>, vector<128x512xbf16>, vector<8x512xf32> -> vector<8x512xf32>
    %294 = arith.addf %290, %293 : vector<8x512xf32>
    %295 = vector.extract_strided_slice %294 {offsets = [0, 0], sizes = [8, 384], strides = [1, 1]} : vector<8x512xf32> to vector<8x384xf32>
    %296 = arith.negf %295 : vector<8x384xf32>
    %297 = math.exp %296 : vector<8x384xf32>
    %cst_85 = arith.constant 1.000000e+00 : f32
    %298 = vector.broadcast %cst_85 : f32 to vector<8x384xf32>
    %299 = arith.addf %298, %297 : vector<8x384xf32>
    %300 = arith.divf %298, %299 : vector<8x384xf32>
    %301 = vector.extract_strided_slice %300 {offsets = [0, 0], sizes = [8, 128], strides = [1, 1]} : vector<8x384xf32> to vector<8x128xf32>
    %302 = vector.extract_strided_slice %300 {offsets = [0, 128], sizes = [8, 128], strides = [1, 1]} : vector<8x384xf32> to vector<8x128xf32>
    %303 = vector.extract_strided_slice %300 {offsets = [0, 256], sizes = [8, 128], strides = [1, 1]} : vector<8x384xf32> to vector<8x128xf32>
    %304 = vector.extract_strided_slice %294 {offsets = [0, 384], sizes = [8, 128], strides = [1, 1]} : vector<8x512xf32> to vector<8x128xf32>
    %305 = math.tanh %304 : vector<8x128xf32>
    %306 = arith.mulf %302, %287 : vector<8x128xf32>
    %307 = arith.mulf %301, %305 : vector<8x128xf32>
    %308 = arith.addf %306, %307 : vector<8x128xf32>
    %309 = math.tanh %308 : vector<8x128xf32>
    %310 = arith.mulf %303, %309 : vector<8x128xf32>
    %c112 = arith.constant 112 : index
    %c0_86 = arith.constant 0 : index
    %311 = vector.load %arg11[%c112, %c0_86] : memref<128x512xf32, #tpu.memory_space<vmem>>, vector<8x512xf32>
    %312 = arith.truncf %310 : vector<8x128xf32> to vector<8x128xbf16>
    %c0_87 = arith.constant 0 : index
    %c0_88 = arith.constant 0 : index
    %313 = vector.load %arg4[%c0_87, %c0_88] : memref<128x512xbf16, #tpu.memory_space<vmem>>, vector<128x512xbf16>
    %cst_89 = arith.constant dense<0.000000e+00> : vector<8x512xf32>
    %314 = tpu.matmul %312, %313, %cst_89 {dimension_numbers = #tpu.dot_dimension_numbers<[1], [0], [0], [1], [0, 0, 1, 1], [], []>} : vector<8x128xbf16>, vector<128x512xbf16>, vector<8x512xf32> -> vector<8x512xf32>
    %315 = arith.addf %311, %314 : vector<8x512xf32>
    %316 = vector.extract_strided_slice %315 {offsets = [0, 0], sizes = [8, 384], strides = [1, 1]} : vector<8x512xf32> to vector<8x384xf32>
    %317 = arith.negf %316 : vector<8x384xf32>
    %318 = math.exp %317 : vector<8x384xf32>
    %cst_90 = arith.constant 1.000000e+00 : f32
    %319 = vector.broadcast %cst_90 : f32 to vector<8x384xf32>
    %320 = arith.addf %319, %318 : vector<8x384xf32>
    %321 = arith.divf %319, %320 : vector<8x384xf32>
    %322 = vector.extract_strided_slice %321 {offsets = [0, 0], sizes = [8, 128], strides = [1, 1]} : vector<8x384xf32> to vector<8x128xf32>
    %323 = vector.extract_strided_slice %321 {offsets = [0, 128], sizes = [8, 128], strides = [1, 1]} : vector<8x384xf32> to vector<8x128xf32>
    %324 = vector.extract_strided_slice %321 {offsets = [0, 256], sizes = [8, 128], strides = [1, 1]} : vector<8x384xf32> to vector<8x128xf32>
    %325 = vector.extract_strided_slice %315 {offsets = [0, 384], sizes = [8, 128], strides = [1, 1]} : vector<8x512xf32> to vector<8x128xf32>
    %326 = math.tanh %325 : vector<8x128xf32>
    %327 = arith.mulf %323, %308 : vector<8x128xf32>
    %328 = arith.mulf %322, %326 : vector<8x128xf32>
    %329 = arith.addf %327, %328 : vector<8x128xf32>
    %330 = math.tanh %329 : vector<8x128xf32>
    %331 = arith.mulf %324, %330 : vector<8x128xf32>
    %c120 = arith.constant 120 : index
    %c0_91 = arith.constant 0 : index
    %332 = vector.load %arg11[%c120, %c0_91] : memref<128x512xf32, #tpu.memory_space<vmem>>, vector<8x512xf32>
    %333 = arith.truncf %331 : vector<8x128xf32> to vector<8x128xbf16>
    %c0_92 = arith.constant 0 : index
    %c0_93 = arith.constant 0 : index
    %334 = vector.load %arg4[%c0_92, %c0_93] : memref<128x512xbf16, #tpu.memory_space<vmem>>, vector<128x512xbf16>
    %cst_94 = arith.constant dense<0.000000e+00> : vector<8x512xf32>
    %335 = tpu.matmul %333, %334, %cst_94 {dimension_numbers = #tpu.dot_dimension_numbers<[1], [0], [0], [1], [0, 0, 1, 1], [], []>} : vector<8x128xbf16>, vector<128x512xbf16>, vector<8x512xf32> -> vector<8x512xf32>
    %336 = arith.addf %332, %335 : vector<8x512xf32>
    %337 = vector.extract_strided_slice %336 {offsets = [0, 0], sizes = [8, 384], strides = [1, 1]} : vector<8x512xf32> to vector<8x384xf32>
    %338 = arith.negf %337 : vector<8x384xf32>
    %339 = math.exp %338 : vector<8x384xf32>
    %cst_95 = arith.constant 1.000000e+00 : f32
    %340 = vector.broadcast %cst_95 : f32 to vector<8x384xf32>
    %341 = arith.addf %340, %339 : vector<8x384xf32>
    %342 = arith.divf %340, %341 : vector<8x384xf32>
    %343 = vector.extract_strided_slice %342 {offsets = [0, 0], sizes = [8, 128], strides = [1, 1]} : vector<8x384xf32> to vector<8x128xf32>
    %344 = vector.extract_strided_slice %342 {offsets = [0, 128], sizes = [8, 128], strides = [1, 1]} : vector<8x384xf32> to vector<8x128xf32>
    %345 = vector.extract_strided_slice %342 {offsets = [0, 256], sizes = [8, 128], strides = [1, 1]} : vector<8x384xf32> to vector<8x128xf32>
    %346 = vector.extract_strided_slice %336 {offsets = [0, 384], sizes = [8, 128], strides = [1, 1]} : vector<8x512xf32> to vector<8x128xf32>
    %347 = math.tanh %346 : vector<8x128xf32>
    %348 = arith.mulf %344, %329 : vector<8x128xf32>
    %349 = arith.mulf %343, %347 : vector<8x128xf32>
    %350 = arith.addf %348, %349 : vector<8x128xf32>
    %351 = math.tanh %350 : vector<8x128xf32>
    %352 = arith.mulf %345, %351 : vector<8x128xf32>
    %353 = arith.truncf %352 : vector<8x128xf32> to vector<8x128xbf16>
    %c0_96 = arith.constant 0 : index
    %c0_97 = arith.constant 0 : index
    %354 = vector.load %arg6[%c0_96, %c0_97] : memref<128x64xbf16, #tpu.memory_space<vmem>>, vector<128x64xbf16>
    %cst_98 = arith.constant dense<0.000000e+00> : vector<8x64xf32>
    %355 = tpu.matmul %353, %354, %cst_98 {dimension_numbers = #tpu.dot_dimension_numbers<[1], [0], [0], [1], [0, 0, 1, 1], [], []>} : vector<8x128xbf16>, vector<128x64xbf16>, vector<8x64xf32> -> vector<8x64xf32>
    %c0_99 = arith.constant 0 : index
    %c0_100 = arith.constant 0 : index
    %356 = vector.load %arg7[%c0_99, %c0_100] : memref<1x64xf32, #tpu.memory_space<vmem>>, vector<1x64xf32>
    %357 = vector.broadcast %356 : vector<1x64xf32> to vector<8x64xf32>
    %358 = arith.addf %355, %357 : vector<8x64xf32>
    %cst_101 = arith.constant 0.000000e+00 : f32
    %359 = vector.broadcast %cst_101 : f32 to vector<8x64xf32>
    %360 = arith.maximumf %358, %359 : vector<8x64xf32>
    %361 = arith.truncf %360 : vector<8x64xf32> to vector<8x64xbf16>
    %c0_102 = arith.constant 0 : index
    %c0_103 = arith.constant 0 : index
    %362 = vector.load %arg8[%c0_102, %c0_103] : memref<64x5xbf16, #tpu.memory_space<vmem>>, vector<64x5xbf16>
    %cst_104 = arith.constant dense<0.000000e+00> : vector<8x5xf32>
    %363 = tpu.matmul %361, %362, %cst_104 {dimension_numbers = #tpu.dot_dimension_numbers<[1], [0], [0], [1], [0, 0, 1, 1], [], []>} : vector<8x64xbf16>, vector<64x5xbf16>, vector<8x5xf32> -> vector<8x5xf32>
    %c0_105 = arith.constant 0 : index
    %c0_106 = arith.constant 0 : index
    %364 = vector.load %arg9[%c0_105, %c0_106] : memref<1x5xf32, #tpu.memory_space<vmem>>, vector<1x5xf32>
    %365 = vector.broadcast %364 : vector<1x5xf32> to vector<8x5xf32>
    %366 = arith.addf %363, %365 : vector<8x5xf32>
    %367 = tpu.iota {dimensions = array<i32: 1>} : vector<8x5xi32>
    %c1_i32 = arith.constant 1 : i32
    %368 = vector.broadcast %c1_i32 : i32 to vector<8x5xi32>
    %369 = arith.cmpi eq, %367, %368 : vector<8x5xi32>
    %370 = arith.negf %366 : vector<8x5xf32>
    %371 = math.exp %370 : vector<8x5xf32>
    %cst_107 = arith.constant 1.000000e+00 : f32
    %372 = vector.broadcast %cst_107 : f32 to vector<8x5xf32>
    %373 = arith.addf %372, %371 : vector<8x5xf32>
    %374 = arith.divf %372, %373 : vector<8x5xf32>
    %375 = arith.select %369, %374, %366 : vector<8x5xi1>, vector<8x5xf32>
    %c0_108 = arith.constant 0 : index
    %c0_109 = arith.constant 0 : index
    %376 = vector.load %arg10[%c0_108, %c0_109] : memref<8x5xf32, #tpu.memory_space<vmem>>, vector<8x5xf32>
    tpu.vector_store %arg10[%c0_108, %c0_109], %375 {strides = array<i32>} : memref<8x5xf32, #tpu.memory_space<vmem>>, vector<8x5xf32>,
    return
  }
}

</mosaic_0001>

<bundles_post_ra>
// kernel: hybrid_forward.1
= control target key start
LH: loop header
LB: loop body
LE: loop exit
PB: predicated region body
PF: predicated region fallthrough
CT: control target
= control target key end

     0   :  { %15 = vsyncpa [#allocation4], 0  ;;  %s3607_s13 = smov [#allocation3]   ;;  %s5178_s0 = inlined_call_operand.vmem [shape: bf16[128,3], index: 0, kind: input, shape index: {}]   ;;  %s5179_s1 = inlined_call_operand.vmem [shape: bf16[3,64], index: 1, kind: input, shape index: {}]   ;;  %s5180_s2 = inlined_call_operand.vmem [shape: f32[1,64], index: 2, kind: input, shape index: {}]   ;;  %s5181_s3 = inlined_call_operand.hbm [shape: bf16[64,512], index: 3, kind: input, shape index: {}]   ;;  %s5182_s4 = inlined_call_operand.vmem [shape: bf16[128,512], index: 4, kind: input, shape index: {}]   ;;  %s5183_s5 = inlined_call_operand.vmem [shape: f32[1,512], index: 5, kind: input, shape index: {}]   ;;  %s5184_s6 = inlined_call_operand.vmem [shape: bf16[128,64], index: 6, kind: input, shape index: {}]   ;;  %s5185_s7 = inlined_call_operand.vmem [shape: f32[1,64], index: 7, kind: input, shape index: {}]   ;;  %s5186_s8 = inlined_call_operand.vmem [shape: bf16[64,5], index: 8, kind: input, shape index: {}]   ;;  %s5187_s9 = inlined_call_operand.vmem [shape: f32[1,5], index: 9, kind: input, shape index: {}]   ;;  %s5188_s10 = inlined_call_operand.vmem [shape: f32[8,5], index: 10, kind: output, shape index: {}]  }
   0x1   :  { %s27_s14 = sshll.u32 %s3607_s13, 4  ;;  %s28_s14 = int_to_ptr.vmem [resolvable:$true] %s27_s14 }
   0x2   :  { %s3593_s15 = scalar_lea.vmem %s28_s14, 2048  ;;  %p3598_p1 = scmp.lt.s32.totalorder %s28_s14, %s28_s14 }
   0x3   :  { %p3594_p0 = scmp.ne.s32.totalorder %s28_s14, %s3593_s15  ;;  %p3599_p2 = scmp.lt.s32.totalorder %s3593_s15, %s3593_s15 }
   0x5   :  { %p3600_p3 = por %p3599_p2, %p3598_p1 }
   0x7   :  { %p3601_p4 = pnand %p3600_p3, %p3594_p0 }
   0x9   :  { %3604 = shalt.err (!%p3601_p4)
}
   0xa   :  { %s3608_s16 = smov 256   ;;  %s3609_s17 = smov 16  }
   0xb   :  { %33 = dma.hbm_to_vmem [thread:$0]  %s5181_s3, 2048, %s28_s14, [#allocation4], %s3608_s16, %s3608_s16, %s3609_s17  }
   0xc   :  { %3605 = dma.done.wait [#allocation4], 2048  }
   0xd   :  { %3606 = vsyncadd [#allocation4], 4294965248  ;;  %vm139_vm0 = vcmask 1040384   ;;  %vm140_vm1 = vcmask 1041408   ;;  %v3610_v0 = vmov 65535   ;;  %vm114_vm2 = vcmask 23552  }
   0xe   :  { %v141_v1 = vsel %vm139_vm0, 4294967295, %v3610_v0  ;;  %v66_v3 = vld [vmem:[%s5179_s1] sm:$0x3]  ;;  %v3170_v6 = vld [vmem:[%s5178_s0 + $0x8] sm:$0xff]   ;;  %v3171_v7 = vld [vmem:[%s5178_s0 + $0x10] sm:$0xff]   ;;  %v5190_v29 = vmov 0  }
   0xf   :  { %v142_v2 = vsel %vm140_vm1, %v141_v1, 0  ;;  %v3169_v5 = vld [vmem:[%s5178_s0] sm:$0xff]   ;;  %v3172_v8 = vld [vmem:[%s5178_s0 + $0x18] sm:$0xff]   ;;  %v3174_v14 = vld [vmem:[%s5178_s0 + $0x28] sm:$0xff]   ;;  %442 = vmatprep.mubr.bf16.mxu1 %v5190_v29  ;;  %vm385_vm3 = vcmask 523264   ;;  %vm3613_vm4 = vmmov 0  }
  0x10   :  { %v144_v4 = vand.u32 %v142_v2, %v66_v3  ;;  %3114 = vmatprep.mubr.msk.bf16.mxu0 %vm114_vm2, %v3169_v5  ;;  %v3177_v9 = vld [vmem:[#allocation3 + $0x64] ss:$16 sps:$4 sm:$0xff]   ;;  %v3179_v10 = vld [vmem:[#allocation3 + $0x60] ss:$16 sps:$4 sm:$0xff]   ;;  %v3180_v12 = vld [vmem:[#allocation3 + $0x68] ss:$16 sps:$4 sm:$0xff]  }
  0x11   :  { %v3173_v11 = vld [vmem:[%s5178_s0 + $0x20] sm:$0xff]   ;;  %v3182_v13 = vld [vmem:[#allocation3 + $0x6c] ss:$16 sps:$4 sm:$0xff]   ;;  %418 = vmatprep.subr.bf16.mxu1 %v3177_v9  ;;  %v3175_v15 = vld [vmem:[%s5178_s0 + $0x30] sm:$0xff]   ;;  %vm2937_vm6 = vcmask 39936  }
  0x12   :  { %3112 = vmatprep.subr.bf16.mxu0 %v144_v4  ;;  %419 = vmatpush1.bf16.msra.mxu1 %v3179_v10  ;;  %v3176_v16 = vld [vmem:[%s5178_s0 + $0x38] sm:$0xff]   ;;  %v3183_v17 = vld [vmem:[#allocation3 + $0x44] ss:$16 sps:$4 sm:$0xff]   ;;  %v3185_v19 = vld [vmem:[#allocation3 + $0x40] ss:$16 sps:$4 sm:$0xff]  }
  0x13   :  { %3113 = vmatpush3.bf16.msra.mxu0 %v144_v4  ;;  %v3188_v18 = vld [vmem:[#allocation3 + $0x4c] ss:$16 sps:$4 sm:$0xff]   ;;  %v3186_v20 = vld [vmem:[#allocation3 + $0x48] ss:$16 sps:$4 sm:$0xff]   ;;  %420 = vmatprep.subr.bf16.mxu1 %v3183_v17  ;;  %v3189_v21 = vld [vmem:[#allocation3 + $0x24] ss:$16 sps:$4 sm:$0xff]  }
  0x14   :  { %531 = vmatprep.subr.bf16.mxu0 %v3182_v13  ;;  %v3194_v22 = vld [vmem:[#allocation3 + $0x2c] ss:$16 sps:$4 sm:$0xff]   ;;  %v3191_v23 = vld [vmem:[#allocation3 + $0x20] ss:$16 sps:$4 sm:$0xff]   ;;  %v3192_v24 = vld [vmem:[#allocation3 + $0x28] ss:$16 sps:$4 sm:$0xff]  }
  0x15   :  { %v3195_v25 = vld [vmem:[#allocation3 + $0x4] ss:$16 sps:$4 sm:$0xff]   ;;  %v3200_v26 = vld [vmem:[#allocation3 + $0xc] ss:$16 sps:$4 sm:$0xff]   ;;  %v3197_v27 = vld [vmem:[#allocation3] ss:$16 sps:$4 sm:$0xff]  }
  0x16   :  { %3115 = vmatmul.mubr.msk.bf16.vlgmr.msra.gmra.mxu0 %vm114_vm2, %v3170_v6  ;;  %421 = vmatpush1.bf16.msra.mxu1 %v3185_v19  ;;  %v3198_v28 = vld [vmem:[#allocation3 + $0x8] ss:$16 sps:$4 sm:$0xff]   ;;  %v3712_v30 = vld [vmem:[%s5182_s4 + $0xe4] ss:$16 sps:$4 sm:$0xff]   ;;  %v3718_v31 = vld [vmem:[%s5182_s4 + $0xec] ss:$16 sps:$4 sm:$0xff]  }
  0x17   :  { %3118 = vmatprep.mubr.msk.bf16.mxu0 %vm114_vm2, %v3171_v7  ;;  %532 = vmatpush1.bf16.msra.mxu0 %v3180_v12  ;;  %v3724_v34 = vld [vmem:[%s5180_s2] ss:$0 sm:$0xff]  ;;  %v3737_v46 = vld [vmem:[%s5182_s4 + $0xc4] ss:$16 sps:$4 sm:$0xff]   ;;  %v3742_v48 = vld [vmem:[%s5182_s4 + $0xe8] ss:$16 sps:$4 sm:$0xff]  }
  0x18   :  { %533 = vmatprep.subr.bf16.mxu0 %v3188_v18  ;;  %422 = vmatprep.subr.bf16.mxu1 %v3189_v21  ;;  %v3731_v43 = vld [vmem:[%s5182_s4 + $0xe0] ss:$16 sps:$4 sm:$0xff]   ;;  %v3750_v50 = vld [vmem:[%s5182_s4 + $0xcc] ss:$16 sps:$4 sm:$0xff]   ;;  %v3764_v53 = vld [vmem:[%s5182_s4 + $0xa4] ss:$16 sps:$4 sm:$0xff]  }
  0x19   :  { %v3757_v51 = vld [vmem:[%s5182_s4 + $0xc0] ss:$16 sps:$4 sm:$0xff]   ;;  %v3770_v55 = vld [vmem:[%s5182_s4 + $0xc8] ss:$16 sps:$4 sm:$0xff]   ;;  %v3785_v61 = vld [vmem:[%s5182_s4 + $0xac] ss:$16 sps:$4 sm:$0xff]  }
  0x1a   :  { %423 = vmatpush1.bf16.msra.mxu1 %v3191_v23  ;;  %v3780_v60 = vld [vmem:[%s5182_s4 + $0xa0] ss:$16 sps:$4 sm:$0xff]   ;;  %v3792_v63 = vld [vmem:[%s5182_s4 + $0x84] ss:$16 sps:$4 sm:$0xff]   ;;  %v3798_v0 = vld [vmem:[%s5182_s4 + $0xa8] ss:$16 sps:$4 sm:$0xff]  }
  0x1b   :  { %534 = vmatpush1.bf16.msra.mxu0 %v3186_v20  ;;  %424 = vmatprep.subr.bf16.mxu1 %v3195_v25  ;;  %v3805_v1 = vld [vmem:[%s5182_s4 + $0x8c] ss:$16 sps:$4 sm:$0xff]   ;;  %v3813_v4 = vld [vmem:[%s5182_s4 + $0x80] ss:$16 sps:$4 sm:$0xff]   ;;  %v3820_v6 = vld [vmem:[%s5182_s4 + $0x64] ss:$16 sps:$4 sm:$0xff]  }
  0x1c   :  { %535 = vmatprep.subr.bf16.mxu0 %v3194_v22  ;;  %v3826_v7 = vld [vmem:[%s5182_s4 + $0x88] ss:$16 sps:$4 sm:$0xff]   ;;  %v3840_v12 = vld [vmem:[%s5182_s4 + $0x6c] ss:$16 sps:$4 sm:$0xff]   ;;  %v3867_v19 = vld [vmem:[%s5182_s4 + $0x40] ss:$16 sps:$4 sm:$0xff]  }
  0x1d   :  { %v3874_v21 = vld [vmem:[%s5182_s4 + $0x24] ss:$16 sps:$4 sm:$0xff]   ;;  %v3880_v22 = vld [vmem:[%s5182_s4 + $0x48] ss:$16 sps:$4 sm:$0xff]  }
  0x1e   :  { %3119 = vmatmul.mubr.msk.bf16.gmra.mxu0 %vm114_vm2, %v3172_v8  ;;  %425 = vmatpush1.bf16.msra.mxu1 %v3197_v27  ;;  %v3894_v27 = vld [vmem:[%s5182_s4 + $0x2c] ss:$16 sps:$4 sm:$0xff]  }
  0x1f   :  { %3122 = vmatprep.mubr.msk.bf16.mxu0 %vm114_vm2, %v3173_v11  ;;  %536 = vmatpush1.bf16.msra.mxu0 %v3192_v24  ;;  %v3835_v11 = vld [vmem:[%s5182_s4 + $0x60] ss:$16 sps:$4 sm:$0xff]  }
  0x20   :  { %537 = vmatprep.subr.bf16.mxu0 %v3200_v26  ;;  %896 = vmatprep.subr.bf16.mxu1 %v3712_v30  ;;  %v3889_v26 = vld [vmem:[%s5182_s4 + $0x20] ss:$16 sps:$4 sm:$0xff]  }
  0x23   :  { %538 = vmatpush1.bf16.msra.mxu0 %v3198_v28 }
  0x24   :  { %937 = vmatprep.subr.bf16.mxu0 %v3718_v31 }
  0x26   :  { %3123 = vmatmul.mubr.msk.bf16.gmra.mxu0 %vm114_vm2, %v3174_v14  ;;  %v3846_v14 = vld [vmem:[%s5182_s4 + $0x44] ss:$16 sps:$4 sm:$0xff]  }
  0x27   :  { %3126 = vmatprep.mubr.msk.bf16.mxu0 %vm114_vm2, %v3175_v15  ;;  %v3852_v15 = vld [vmem:[%s5182_s4 + $0x68] ss:$16 sps:$4 sm:$0xff]  }
  0x2e   :  { %3127 = vmatmul.mubr.msk.bf16.gmra.mxu0 %vm114_vm2, %v3176_v16  ;;  %v3859_v16 = vld [vmem:[%s5182_s4 + $0x4c] ss:$16 sps:$4 sm:$0xff]  }
  0x2f   :  { %555 = vmatprep.mubr.bf16.mxu0 %v5190_v29 }
  0xd6   :  { %v3116_v32 = vpop.f32.mrf.mxu0 }
  0xd7   :  { %v189_v49 = vadd.f32 %v3116_v32, %v3724_v34  ;;  %v3901_v32 = vld [vmem:[%s5182_s4 + $0x4] ss:$16 sps:$4 sm:$0xff]  }
  0xd8   :  { %v180_v33 = vpop.f32.mrf.mxu0 }
  0xd9   :  { %v181_v36 = vadd.f32 %v3724_v34, %v180_v33  ;;  %v245_v56 = vmax.f32 %v189_v49, 0.0  ;;  %v3906_v33 = vld [vmem:[%s5182_s4 + $0x28] ss:$16 sps:$4 sm:$0xff]  }
  0xda   :  { %v3117_v35 = vpop.f32.mrf.mxu0 }
  0xdb   :  { %v243_v40 = vmax.f32 %v181_v36, 0.0  ;;  %v192_v44 = vadd.f32 %v3117_v35, %v3724_v34  ;;  %v3913_v35 = vld [vmem:[%s5182_s4 + $0xc] ss:$16 sps:$4 sm:$0xff]  }
  0xdc   :  { %v183_v37 = vpop.f32.mrf.mxu0 }
  0xdd   :  { %v184_v38 = vadd.f32 %v3724_v34, %v183_v37  ;;  %v246_v52 = vmax.f32 %v192_v44, 0.0 }
  0xde   :  { %v3120_v39 = vpop.f32.mrf.mxu0 }
  0xdf   :  { %v244_v41 = vmax.f32 %v184_v38, 0.0  ;;  %v260_v57 = vpack.c.bf16 %v246_v52, %v245_v56  ;;  %v205_v8 = vadd.f32 %v3120_v39, %v3724_v34  ;;  %v3921_v38 = vld [vmem:[%s5182_s4] ss:$16 sps:$4 sm:$0xff]  }
  0xe0   :  { %v196_v42 = vpop.f32.mrf.mxu0 }
  0xe1   :  { %v259_v45 = vpack.c.bf16 %v244_v41, %v243_v40  ;;  %v197_v58 = vadd.f32 %v3724_v34, %v196_v42  ;;  %v249_v17 = vmax.f32 %v205_v8, 0.0  ;;  %v3929_v40 = vld [vmem:[%s5182_s4 + $0x8] ss:$16 sps:$4 sm:$0xff]  }
  0xe2   :  { %v3121_v47 = vpop.f32.mrf.mxu0 }
  0xe3   :  { %2977 = vmatmul.mubr.msk.bf16.vlgmr.msra.gmra.mxu1 %vm385_vm3, %v259_v45  ;;  %2985 = vmatmul.mubr.msk.bf16.vlgmr.msra.gmra.mxu0 %vm385_vm3, %v259_v45  ;;  %v247_v2 = vmax.f32 %v197_v58, 0.0  ;;  %v208_v9 = vadd.f32 %v3121_v47, %v3724_v34 }
  0xe4   :  { %897 = vmatpush1.bf16.msra.mxu1 %v3731_v43  ;;  %452 = vmatprep.mubr.bf16.mxu1 %v5190_v29  ;;  %v199_v54 = vpop.f32.mrf.mxu0 }
  0xe5   :  { %565 = vmatprep.mubr.bf16.mxu0 %v5190_v29  ;;  %898 = vmatprep.subr.bf16.mxu1 %v3737_v46  ;;  %v200_v59 = vadd.f32 %v3724_v34, %v199_v54  ;;  %v250_v18 = vmax.f32 %v208_v9, 0.0 }
  0xe6   :  { %938 = vmatpush1.bf16.msra.mxu0 %v3742_v48  ;;  %v3787_v62 = vpop.f32.mrf.mxu0 }
  0xe7   :  { %939 = vmatprep.subr.bf16.mxu0 %v3750_v50  ;;  %v248_v3 = vmax.f32 %v200_v59, 0.0  ;;  %v262_v23 = vpack.c.bf16 %v250_v18, %v249_v17  ;;  %v221_v41 = vadd.f32 %v3787_v62, %v3724_v34  ;;  %v283_v18 = vld [vmem:[%s5183_s5] sm:$0xf] }
  0xe8   :  { %899 = vmatpush1.bf16.msra.mxu1 %v3757_v51  ;;  %v212_v5 = vpop.f32.mrf.mxu0 }
  0xe9   :  { %900 = vmatprep.subr.bf16.mxu1 %v3764_v53  ;;  %v261_v10 = vpack.c.bf16 %v248_v3, %v247_v2  ;;  %v213_v24 = vadd.f32 %v3724_v34, %v212_v5  ;;  %v253_v47 = vmax.f32 %v221_v41, 0.0 }
  0xea   :  { %940 = vmatpush1.bf16.msra.mxu0 %v3770_v55  ;;  %v3125_v13 = vpop.f32.mrf.mxu0 }
  0xeb   :  { %2978 = vmatmul.mubr.msk.bf16.gmra.mxu1 %vm385_vm3, %v260_v57  ;;  %2986 = vmatmul.mubr.msk.bf16.gmra.mxu0 %vm385_vm3, %v260_v57  ;;  %v251_v36 = vmax.f32 %v213_v24, 0.0  ;;  %v224_v42 = vadd.f32 %v3125_v13, %v3724_v34 }
  0xec   :  { %462 = vmatprep.mubr.bf16.mxu1 %v5190_v29  ;;  %575 = vmatprep.mubr.bf16.mxu0 %v5190_v29  ;;  %v215_v20 = vpop.f32.mrf.mxu0 }
  0xed   :  { %901 = vmatpush1.bf16.msra.mxu1 %v3780_v60  ;;  %941 = vmatprep.subr.bf16.mxu0 %v3785_v61  ;;  %v216_v25 = vadd.f32 %v3724_v34, %v215_v20  ;;  %v254_v49 = vmax.f32 %v224_v42, 0.0 }
  0xee   :  { %902 = vmatprep.subr.bf16.mxu1 %v3792_v63  ;;  %942 = vmatpush1.bf16.msra.mxu0 %v3798_v0  ;;  %v3128_v28 = vpop.f32.mrf.mxu0 }
  0xef   :  { %943 = vmatprep.subr.bf16.mxu0 %v3805_v1  ;;  %v252_v37 = vmax.f32 %v216_v25, 0.0  ;;  %v264_v54 = vpack.c.bf16 %v254_v49, %v253_v47  ;;  %v237_v62 = vadd.f32 %v3128_v28, %v3724_v34 }
  0xf0   :  { %v228_v39 = vpop.f32.mrf.mxu0 }
  0xf1   :  { %903 = vmatpush1.bf16.msra.mxu1 %v3813_v4  ;;  %v263_v44 = vpack.c.bf16 %v252_v37, %v251_v36  ;;  %v229_v56 = vadd.f32 %v3724_v34, %v228_v39  ;;  %v257_v5 = vmax.f32 %v237_v62, 0.0 }
  0xf2   :  { %904 = vmatprep.subr.bf16.mxu1 %v3820_v6  ;;  %944 = vmatpush1.bf16.msra.mxu0 %v3826_v7  ;;  %v3129_v45 = vpop.f32.mrf.mxu0 }
  0xf3   :  { %2979 = vmatmul.mubr.msk.bf16.gmra.mxu1 %vm385_vm3, %v261_v10  ;;  %2987 = vmatmul.mubr.msk.bf16.gmra.mxu0 %vm385_vm3, %v261_v10  ;;  %v255_v58 = vmax.f32 %v229_v56, 0.0  ;;  %v240_v2 = vadd.f32 %v3129_v45, %v3724_v34 }
  0xf4   :  { %472 = vmatprep.mubr.bf16.mxu1 %v5190_v29  ;;  %585 = vmatprep.mubr.bf16.mxu0 %v5190_v29  ;;  %v231_v52 = vpop.f32.mrf.mxu0 }
  0xf5   :  { %905 = vmatpush1.bf16.msra.mxu1 %v3835_v11  ;;  %945 = vmatprep.subr.bf16.mxu0 %v3840_v12  ;;  %v232_v57 = vadd.f32 %v3724_v34, %v231_v52  ;;  %v258_v8 = vmax.f32 %v240_v2, 0.0  ;;  %v5189_v34 = vlaneseq }
  0xf6   :  { %906 = vmatprep.subr.bf16.mxu1 %v3846_v14  ;;  %946 = vmatpush1.bf16.msra.mxu0 %v3852_v15 }
  0xf7   :  { %947 = vmatprep.subr.bf16.mxu0 %v3859_v16  ;;  %v256_v59 = vmax.f32 %v232_v57, 0.0  ;;  %v266_v9 = vpack.c.bf16 %v258_v8, %v257_v5  ;;  %v286_v10 = vshrl.u32 %v5189_v34, 7 }
  0xf9   :  { %907 = vmatpush1.bf16.msra.mxu1 %v3867_v19  ;;  %v265_v3 = vpack.c.bf16 %v256_v59, %v255_v58  ;;  %v287_v13 = vsub.s32 0, %v286_v10  ;;  %v295_v17 = vsub.s32 2, %v286_v10  ;;  %v291_v24 = vsub.s32 1, %v286_v10 }
  0xfa   :  { %908 = vmatprep.subr.bf16.mxu1 %v3874_v21  ;;  %948 = vmatpush1.bf16.msra.mxu0 %v3880_v22  ;;  %v299_v25 = vsub.s32 3, %v286_v10 }
  0xfb   :  { %2980 = vmatmul.mubr.msk.bf16.gmra.mxu1 %vm385_vm3, %v262_v23  ;;  %2988 = vmatmul.mubr.msk.bf16.gmra.mxu0 %vm385_vm3, %v262_v23  ;;  %v4007_v37 = vrot.slane %v283_v18, %v287_v13  ;;  %v4009_v39 = vrot.slane %v283_v18, %v295_v17 }
  0xfc   :  { %482 = vmatprep.mubr.bf16.mxu1 %v5190_v29  ;;  %595 = vmatprep.mubr.bf16.mxu0 %v5190_v29  ;;  %v4013_v45 = vrot.slane %v283_v18, %v299_v25 }
  0xfd   :  { %909 = vmatpush1.bf16.msra.mxu1 %v3889_v26  ;;  %949 = vmatprep.subr.bf16.mxu0 %v3894_v27 }
  0xfe   :  { %910 = vmatprep.subr.bf16.mxu1 %v3901_v32  ;;  %950 = vmatpush1.bf16.msra.mxu0 %v3906_v33 }
  0xff   :  { %951 = vmatprep.subr.bf16.mxu0 %v3913_v35 }
 0x101   :  { %911 = vmatpush1.bf16.msra.mxu1 %v3921_v38 }
 0x102   :  { %952 = vmatpush1.bf16.msra.mxu0 %v3929_v40  ;;  %1011 = vmatprep.subr.bf16.mxu1 %v3712_v30 }
 0x103   :  { %2981 = vmatmul.mubr.msk.bf16.gmra.mxu1 %vm385_vm3, %v263_v44  ;;  %2989 = vmatmul.mubr.msk.bf16.gmra.mxu0 %vm385_vm3, %v263_v44  ;;  %v4011_v44 = vrot.slane %v283_v18, %v291_v24 }
 0x104   :  { %492 = vmatprep.mubr.bf16.mxu1 %v5190_v29  ;;  %605 = vmatprep.mubr.bf16.mxu0 %v5190_v29 }
 0x105   :  { %1052 = vmatprep.subr.bf16.mxu0 %v3718_v31 }
 0x10b   :  { %2982 = vmatmul.mubr.msk.bf16.gmra.mxu1 %vm385_vm3, %v264_v54  ;;  %2990 = vmatmul.mubr.msk.bf16.gmra.mxu0 %vm385_vm3, %v264_v54 }
 0x10c   :  { %502 = vmatprep.mubr.bf16.mxu1 %v5190_v29  ;;  %615 = vmatprep.mubr.bf16.mxu0 %v5190_v29 }
 0x113   :  { %2983 = vmatmul.mubr.msk.bf16.gmra.mxu1 %vm385_vm3, %v265_v3  ;;  %2991 = vmatmul.mubr.msk.bf16.gmra.mxu0 %vm385_vm3, %v265_v3 }
 0x114   :  { %512 = vmatprep.mubr.bf16.mxu1 %v5190_v29  ;;  %625 = vmatprep.mubr.bf16.mxu0 %v5190_v29 }
 0x11b   :  { %2984 = vmatmul.mubr.msk.bf16.gmra.mxu1 %vm385_vm3, %v266_v9  ;;  %2992 = vmatmul.mubr.msk.bf16.gmra.mxu0 %vm385_vm3, %v266_v9 }
 0x11c   :  { %928 = vmatprep.mubr.bf16.mxu1 %v5190_v29  ;;  %969 = vmatprep.mubr.bf16.mxu0 %v5190_v29 }
 0x123   :  { %929 = vmatmul.mubr.bf16.vlgmr.msra.gmra.mxu1 %v5190_v29  ;;  %970 = vmatmul.mubr.bf16.vlgmr.msra.gmra.mxu0 %v5190_v29 }
 0x124   :  { %1012 = vmatpush1.bf16.msra.mxu1 %v3731_v43  ;;  %1053 = vmatpush1.bf16.msra.mxu0 %v3742_v48 }
 0x125   :  { %1013 = vmatprep.subr.bf16.mxu1 %v3737_v46  ;;  %1054 = vmatprep.subr.bf16.mxu0 %v3750_v50 }
 0x126   :  { %1043 = vmatprep.mubr.bf16.mxu1 %v5190_v29  ;;  %1084 = vmatprep.mubr.bf16.mxu0 %v5190_v29 }
 0x128   :  { %1014 = vmatpush1.bf16.msra.mxu1 %v3757_v51  ;;  %1055 = vmatpush1.bf16.msra.mxu0 %v3770_v55 }
 0x129   :  { %1015 = vmatprep.subr.bf16.mxu1 %v3764_v53  ;;  %1056 = vmatprep.subr.bf16.mxu0 %v3785_v61 }
 0x12c   :  { %1016 = vmatpush1.bf16.msra.mxu1 %v3780_v60  ;;  %1057 = vmatpush1.bf16.msra.mxu0 %v3798_v0 }
 0x12d   :  { %1017 = vmatprep.subr.bf16.mxu1 %v3792_v63  ;;  %1058 = vmatprep.subr.bf16.mxu0 %v3805_v1 }
 0x130   :  { %1018 = vmatpush1.bf16.msra.mxu1 %v3813_v4  ;;  %1059 = vmatpush1.bf16.msra.mxu0 %v3826_v7 }
 0x131   :  { %1019 = vmatprep.subr.bf16.mxu1 %v3820_v6  ;;  %1060 = vmatprep.subr.bf16.mxu0 %v3840_v12 }
 0x134   :  { %1020 = vmatpush1.bf16.msra.mxu1 %v3835_v11  ;;  %1061 = vmatpush1.bf16.msra.mxu0 %v3852_v15 }
 0x135   :  { %1021 = vmatprep.subr.bf16.mxu1 %v3846_v14  ;;  %1062 = vmatprep.subr.bf16.mxu0 %v3859_v16 }
 0x138   :  { %1022 = vmatpush1.bf16.msra.mxu1 %v3867_v19  ;;  %1063 = vmatpush1.bf16.msra.mxu0 %v3880_v22 }
 0x139   :  { %1023 = vmatprep.subr.bf16.mxu1 %v3874_v21  ;;  %1064 = vmatprep.subr.bf16.mxu0 %v3894_v27 }
 0x13c   :  { %1024 = vmatpush1.bf16.msra.mxu1 %v3889_v26  ;;  %1065 = vmatpush1.bf16.msra.mxu0 %v3906_v33 }
 0x13d   :  { %1025 = vmatprep.subr.bf16.mxu1 %v3901_v32  ;;  %1066 = vmatprep.subr.bf16.mxu0 %v3913_v35 }
 0x140   :  { %1026 = vmatpush1.bf16.msra.mxu1 %v3921_v38  ;;  %1067 = vmatpush1.bf16.msra.mxu0 %v3929_v40 }
 0x141   :  { %1126 = vmatprep.subr.bf16.mxu1 %v3712_v30  ;;  %1167 = vmatprep.subr.bf16.mxu0 %v3718_v31 }
 0x1a3   :  { %v3999_v20 = vpop.f32.mrf.mxu1  ;;  %v4001_v23 = vpop.f32.mrf.mxu0 }
 0x1a5   :  { %v4003_v28 = vpop.f32.mrf.mxu1  ;;  %v4005_v36 = vpop.f32.mrf.mxu0 }
 0x1a7   :  { %v448_v41 = vpop.f32.mrf.mxu1  ;;  %v561_v42 = vpop.f32.mrf.mxu0 }
 0x1a8   :  { %v4016_v47 = vadd.f32 %v448_v41, %v4007_v37  ;;  %v4019_v49 = vadd.f32 %v561_v42, %v4009_v39 }
 0x1a9   :  { %v450_v52 = vpop.f32.mrf.mxu1  ;;  %v563_v54 = vpop.f32.mrf.mxu0 }
 0x1aa   :  { %v4022_v56 = vadd.f32 %v450_v52, %v4011_v44  ;;  %v4025_v57 = vadd.f32 %v563_v54, %v4013_v45 }
 0x1ab   :  { %v454_v58 = vpop.f32.mrf.mxu1  ;;  %v567_v59 = vpop.f32.mrf.mxu0 }
 0x1ac   :  { %v4028_v62 = vadd.f32 %v454_v58, %v4007_v37  ;;  %v4031_v2 = vadd.f32 %v567_v59, %v4009_v39 }
 0x1ad   :  { %v456_v3 = vpop.f32.mrf.mxu1  ;;  %v569_v5 = vpop.f32.mrf.mxu0 }
 0x1ae   :  { %v4034_v8 = vadd.f32 %v456_v3, %v4011_v44  ;;  %v4037_v9 = vadd.f32 %v569_v5, %v4013_v45 }
 0x1af   :  { %v458_v10 = vpop.f32.mrf.mxu1  ;;  %v571_v13 = vpop.f32.mrf.mxu0 }
 0x1b0   :  { %v4040_v17 = vadd.f32 %v458_v10, %v4007_v37  ;;  %v4043_v18 = vadd.f32 %v571_v13, %v4009_v39 }
 0x1b1   :  { %v460_v24 = vpop.f32.mrf.mxu1  ;;  %v573_v25 = vpop.f32.mrf.mxu0 }
 0x1b2   :  { %5192 = vst [vmem:[#allocation6_spill] sm:$0xff] %v4043_v18  ;;  %v4046_v41 = vadd.f32 %v460_v24, %v4011_v44  ;;  %v4049_v42 = vadd.f32 %v573_v25, %v4013_v45 }
 0x1b3   :  { %v464_v52 = vpop.f32.mrf.mxu1  ;;  %v577_v54 = vpop.f32.mrf.mxu0 }
 0x1b4   :  { %5193 = vst [vmem:[#allocation7_spill] sm:$0xff] %v4046_v41  ;;  %5194 = vst [vmem:[#allocation8_spill] sm:$0xff] %v4049_v42  ;;  %v4052_v58 = vadd.f32 %v464_v52, %v4007_v37  ;;  %v4055_v59 = vadd.f32 %v577_v54, %v4009_v39 }
 0x1b5   :  { %v466_v3 = vpop.f32.mrf.mxu1  ;;  %v579_v5 = vpop.f32.mrf.mxu0 }
 0x1b6   :  { %5195 = vst [vmem:[#allocation9_spill] sm:$0xff] %v4052_v58  ;;  %5196 = vst [vmem:[#allocation10_spill] sm:$0xff] %v4055_v59  ;;  %v4058_v10 = vadd.f32 %v466_v3, %v4011_v44  ;;  %v4061_v13 = vadd.f32 %v579_v5, %v4013_v45 }
 0x1b7   :  { %v468_v24 = vpop.f32.mrf.mxu1  ;;  %v581_v34 = vpop.f32.mrf.mxu0 }
 0x1b8   :  { %5197 = vst [vmem:[#allocation11_spill] sm:$0xff] %v4058_v10  ;;  %5198 = vst [vmem:[#allocation12_spill] sm:$0xff] %v4061_v13  ;;  %v4064_v25 = vadd.f32 %v468_v24, %v4007_v37  ;;  %v4067_v29 = vadd.f32 %v581_v34, %v4009_v39 }
 0x1b9   :  { %v470_v52 = vpop.f32.mrf.mxu1  ;;  %v583_v58 = vpop.f32.mrf.mxu0 }
 0x1ba   :  { %5199 = vst [vmem:[#allocation13_spill] sm:$0xff] %v4064_v25  ;;  %5200 = vst [vmem:[#allocation14_spill] sm:$0xff] %v4067_v29  ;;  %v4070_v54 = vadd.f32 %v470_v52, %v4011_v44  ;;  %v4073_v59 = vadd.f32 %v583_v58, %v4013_v45 }
 0x1bb   :  { %v474_v3 = vpop.f32.mrf.mxu1  ;;  %v587_v10 = vpop.f32.mrf.mxu0 }
 0x1bc   :  { %5201 = vst [vmem:[#allocation15_spill] sm:$0xff] %v4070_v54  ;;  %5202 = vst [vmem:[#allocation16_spill] sm:$0xff] %v4073_v59  ;;  %v4076_v5 = vadd.f32 %v474_v3, %v4007_v37  ;;  %v4079_v13 = vadd.f32 %v587_v10, %v4009_v39 }
 0x1bd   :  { %v476_v24 = vpop.f32.mrf.mxu1  ;;  %v589_v25 = vpop.f32.mrf.mxu0 }
 0x1be   :  { %5203 = vst [vmem:[#allocation17_spill] sm:$0xff] %v4076_v5  ;;  %5204 = vst [vmem:[#allocation18_spill] sm:$0xff] %v4079_v13  ;;  %v4082_v34 = vadd.f32 %v476_v24, %v4011_v44  ;;  %v4085_v29 = vadd.f32 %v589_v25, %v4013_v45 }
 0x1bf   :  { %v478_v52 = vpop.f32.mrf.mxu1  ;;  %v591_v54 = vpop.f32.mrf.mxu0 }
 0x1c0   :  { %5205 = vst [vmem:[#allocation19_spill] sm:$0xff] %v4082_v34  ;;  %5206 = vst [vmem:[#allocation20_spill] sm:$0xff] %v4085_v29  ;;  %v4088_v58 = vadd.f32 %v478_v52, %v4007_v37  ;;  %v4091_v59 = vadd.f32 %v591_v54, %v4009_v39 }
 0x1c1   :  { %v480_v3 = vpop.f32.mrf.mxu1  ;;  %v593_v5 = vpop.f32.mrf.mxu0 }
 0x1c2   :  { %5207 = vst [vmem:[#allocation21_spill] sm:$0xff] %v4088_v58  ;;  %5208 = vst [vmem:[#allocation22_spill] sm:$0xff] %v4091_v59  ;;  %v4094_v10 = vadd.f32 %v480_v3, %v4011_v44  ;;  %v4097_v13 = vadd.f32 %v593_v5, %v4013_v45 }
 0x1c3   :  { %v484_v24 = vpop.f32.mrf.mxu1  ;;  %v597_v34 = vpop.f32.mrf.mxu0 }
 0x1c4   :  { %5209 = vst [vmem:[#allocation23_spill] sm:$0xff] %v4094_v10  ;;  %5210 = vst [vmem:[#allocation24_spill] sm:$0xff] %v4097_v13  ;;  %v4100_v25 = vadd.f32 %v484_v24, %v4007_v37  ;;  %v4103_v29 = vadd.f32 %v597_v34, %v4009_v39 }
 0x1c5   :  { %v486_v52 = vpop.f32.mrf.mxu1  ;;  %v599_v58 = vpop.f32.mrf.mxu0 }
 0x1c6   :  { %5211 = vst [vmem:[#allocation25_spill] sm:$0xff] %v4100_v25  ;;  %5212 = vst [vmem:[#allocation26_spill] sm:$0xff] %v4103_v29  ;;  %v4106_v54 = vadd.f32 %v486_v52, %v4011_v44  ;;  %v4109_v59 = vadd.f32 %v599_v58, %v4013_v45 }
 0x1c7   :  { %v488_v3 = vpop.f32.mrf.mxu1  ;;  %v601_v10 = vpop.f32.mrf.mxu0 }
 0x1c8   :  { %5213 = vst [vmem:[#allocation27_spill] sm:$0xff] %v4106_v54  ;;  %5214 = vst [vmem:[#allocation28_spill] sm:$0xff] %v4109_v59  ;;  %v4112_v5 = vadd.f32 %v488_v3, %v4007_v37  ;;  %v4115_v13 = vadd.f32 %v601_v10, %v4009_v39 }
 0x1c9   :  { %v490_v24 = vpop.f32.mrf.mxu1  ;;  %v603_v25 = vpop.f32.mrf.mxu0 }
 0x1ca   :  { %5215 = vst [vmem:[#allocation29_spill] sm:$0xff] %v4112_v5  ;;  %5216 = vst [vmem:[#allocation30_spill] sm:$0xff] %v4115_v13  ;;  %v4118_v34 = vadd.f32 %v490_v24, %v4011_v44  ;;  %v4121_v29 = vadd.f32 %v603_v25, %v4013_v45 }
 0x1cb   :  { %v494_v52 = vpop.f32.mrf.mxu1  ;;  %v607_v54 = vpop.f32.mrf.mxu0 }
 0x1cc   :  { %5217 = vst [vmem:[#allocation31_spill] sm:$0xff] %v4118_v34  ;;  %5218 = vst [vmem:[#allocation32_spill] sm:$0xff] %v4121_v29  ;;  %v4124_v58 = vadd.f32 %v494_v52, %v4007_v37  ;;  %v4127_v59 = vadd.f32 %v607_v54, %v4009_v39 }
 0x1cd   :  { %v496_v3 = vpop.f32.mrf.mxu1  ;;  %v609_v5 = vpop.f32.mrf.mxu0 }
 0x1ce   :  { %5219 = vst [vmem:[#allocation33_spill] sm:$0xff] %v4124_v58  ;;  %5220 = vst [vmem:[#allocation34_spill] sm:$0xff] %v4127_v59  ;;  %v4130_v10 = vadd.f32 %v496_v3, %v4011_v44  ;;  %v4133_v13 = vadd.f32 %v609_v5, %v4013_v45 }
 0x1cf   :  { %v498_v24 = vpop.f32.mrf.mxu1  ;;  %v611_v34 = vpop.f32.mrf.mxu0 }
 0x1d0   :  { %5221 = vst [vmem:[#allocation35_spill] sm:$0xff] %v4130_v10  ;;  %5222 = vst [vmem:[#allocation36_spill] sm:$0xff] %v4133_v13  ;;  %v4136_v25 = vadd.f32 %v498_v24, %v4007_v37  ;;  %v4139_v29 = vadd.f32 %v611_v34, %v4009_v39 }
 0x1d1   :  { %v500_v52 = vpop.f32.mrf.mxu1  ;;  %v613_v58 = vpop.f32.mrf.mxu0 }
 0x1d2   :  { %5223 = vst [vmem:[#allocation37_spill] sm:$0xff] %v4136_v25  ;;  %5224 = vst [vmem:[#allocation38_spill] sm:$0xff] %v4139_v29  ;;  %v4142_v54 = vadd.f32 %v500_v52, %v4011_v44  ;;  %v4145_v59 = vadd.f32 %v613_v58, %v4013_v45 }
 0x1d3   :  { %v504_v3 = vpop.f32.mrf.mxu1  ;;  %v617_v10 = vpop.f32.mrf.mxu0 }
 0x1d4   :  { %5225 = vst [vmem:[#allocation39_spill] sm:$0xff] %v4142_v54  ;;  %5226 = vst [vmem:[#allocation40_spill] sm:$0xff] %v4145_v59  ;;  %v4148_v5 = vadd.f32 %v504_v3, %v4007_v37  ;;  %v4151_v13 = vadd.f32 %v617_v10, %v4009_v39 }
 0x1d5   :  { %v506_v24 = vpop.f32.mrf.mxu1  ;;  %v619_v25 = vpop.f32.mrf.mxu0 }
 0x1d6   :  { %5227 = vst [vmem:[#allocation41_spill] sm:$0xff] %v4148_v5  ;;  %5228 = vst [vmem:[#allocation42_spill] sm:$0xff] %v4151_v13  ;;  %v4154_v34 = vadd.f32 %v506_v24, %v4011_v44  ;;  %v4157_v29 = vadd.f32 %v619_v25, %v4013_v45 }
 0x1d7   :  { %v508_v52 = vpop.f32.mrf.mxu1  ;;  %v621_v54 = vpop.f32.mrf.mxu0 }
 0x1d8   :  { %5229 = vst [vmem:[#allocation43_spill] sm:$0xff] %v4154_v34  ;;  %5230 = vst [vmem:[#allocation44_spill] sm:$0xff] %v4157_v29  ;;  %v4160_v58 = vadd.f32 %v508_v52, %v4007_v37  ;;  %v4163_v59 = vadd.f32 %v621_v54, %v4009_v39 }
 0x1d9   :  { %v510_v3 = vpop.f32.mrf.mxu1  ;;  %v623_v5 = vpop.f32.mrf.mxu0 }
 0x1da   :  { %5231 = vst [vmem:[#allocation45_spill] sm:$0xff] %v4160_v58  ;;  %5232 = vst [vmem:[#allocation46_spill] sm:$0xff] %v4163_v59  ;;  %v4166_v10 = vadd.f32 %v510_v3, %v4011_v44  ;;  %v4169_v13 = vadd.f32 %v623_v5, %v4013_v45 }
 0x1db   :  { %v514_v24 = vpop.f32.mrf.mxu1  ;;  %v627_v34 = vpop.f32.mrf.mxu0 }
 0x1dc   :  { %5233 = vst [vmem:[#allocation47_spill] sm:$0xff] %v4166_v10  ;;  %5234 = vst [vmem:[#allocation48_spill] sm:$0xff] %v4169_v13  ;;  %v4172_v25 = vadd.f32 %v514_v24, %v4007_v37  ;;  %v4175_v29 = vadd.f32 %v627_v34, %v4009_v39  ;;  %v445_v34 = vadd.f32 %v3999_v20, %v4007_v37 }
 0x1dd   :  { %v516_v52 = vpop.f32.mrf.mxu1  ;;  %v629_v58 = vpop.f32.mrf.mxu0 }
 0x1de   :  { %5235 = vst [vmem:[#allocation49_spill] sm:$0xff] %v4172_v25  ;;  %5236 = vst [vmem:[#allocation50_spill] sm:$0xff] %v4175_v29  ;;  %v4178_v54 = vadd.f32 %v516_v52, %v4011_v44  ;;  %v4181_v59 = vadd.f32 %v629_v58, %v4013_v45 }
 0x1df   :  { %v518_v3 = vpop.f32.mrf.mxu1  ;;  %v631_v10 = vpop.f32.mrf.mxu0 }
 0x1e0   :  { %5237 = vst [vmem:[#allocation51_spill] sm:$0xff] %v4178_v54  ;;  %5238 = vst [vmem:[#allocation52_spill] sm:$0xff] %v4181_v59  ;;  %v4184_v5 = vadd.f32 %v518_v3, %v4007_v37  ;;  %v4187_v13 = vadd.f32 %v631_v10, %v4009_v39  ;;  %v447_v3 = vadd.f32 %v4003_v28, %v4011_v44 }
 0x1e1   :  { %v520_v24 = vpop.f32.mrf.mxu1  ;;  %v633_v25 = vpop.f32.mrf.mxu0 }
 0x1e2   :  { %5239 = vst [vmem:[#allocation53_spill] sm:$0xff] %v4184_v5  ;;  %5240 = vst [vmem:[#allocation54_spill] sm:$0xff] %v4187_v13  ;;  %v4192_v29 = vadd.f32 %v520_v24, %v4011_v44  ;;  %v4195_v52 = vadd.f32 %v633_v25, %v4013_v45  ;;  %v558_v25 = vadd.f32 %v4001_v23, %v4009_v39 }
 0x1e3   :  { %v930_v58 = vpop.f32.mrf.mxu1  ;;  %v971_v59 = vpop.f32.mrf.mxu0 }
 0x1e4   :  { %5241 = vst [vmem:[#allocation55_spill] sm:$0xff] %v4192_v29  ;;  %5242 = vst [vmem:[#allocation56_spill] sm:$0xff] %v4195_v52  ;;  %v978_v5 = vadd.f32 %v930_v58, %v445_v34  ;;  %v980_v52 = vadd.f32 %v971_v59, %v558_v25  ;;  %v560_v29 = vadd.f32 %v4005_v36, %v4013_v45 }
 0x1e5   :  { %v932_v54 = vpop.f32.mrf.mxu1  ;;  %v973_v10 = vpop.f32.mrf.mxu0 }
 0x1e6   :  { %v3025_v13 = vmul.f32 -1.442695, %v978_v5  ;;  %v979_v42 = vadd.f32 %v932_v54, %v447_v3  ;;  %v3027_v28 = vmul.f32 -1.442695, %v980_v52  ;;  %v981_v44 = vadd.f32 %v973_v10, %v560_v29 }
 0x1e7   :  { %v934_v18 = vpop.f32.mrf.mxu1  ;;  %v975_v41 = vpop.f32.mrf.mxu0  ;;  %v5243_v10 = vmov 0  }
 0x1e8   :  { %3261 = vpow2.f32 %v3025_v13  ;;  %v3026_v20 = vmul.f32 -1.442695, %v979_v42 }
 0x1e9   :  { %v935_v37 = vpop.f32.mrf.mxu1  ;;  %v976_v24 = vpop.f32.mrf.mxu0 }
 0x1ea   :  { %3263 = vpow2.f32 %v3026_v20 }
 0x1eb   :  { %3265 = vpow2.f32 %v3027_v28 }
 0x1ec   :  { %3267 = vtanh.f32 %v981_v44 }
 0x1f5   :  { %v3262_v34 = vpop.eup %3261 }
 0x1f6   :  { %v991_v58 = vadd.f32 1.0, %v3262_v34 }
 0x1f7   :  { %v3264_v54 = vpop.eup %3263 }
 0x1f8   :  { %3269 = vrcp.f32 %v991_v58  ;;  %v992_v18 = vadd.f32 1.0, %v3264_v54  ;;  %v3266_v41 = vpop.eup %3265 }
 0x1f9   :  { %v3268_v42 = vpop.eup %3267  ;;  %v993_v23 = vadd.f32 1.0, %v3266_v41 }
 0x1fa   :  { %3271 = vrcp.f32 %v992_v18 }
 0x1fb   :  { %3273 = vrcp.f32 %v993_v23 }
 0x205   :  { %v3270_v13 = vpop.eup %3269 }
 0x206   :  { %v1002_v5 = vmul.f32 %v3270_v13, %v3268_v42 }
 0x207   :  { %v3272_v3 = vpop.eup %3271 }
 0x208   :  { %v1001_v39 = vmul.f32 0.0, %v3272_v3  ;;  %v3274_v29 = vpop.eup %3273 }
 0x20a   :  { %v4203_v59 = vadd.f32 %v1002_v5, %v1001_v39 }
 0x20c   :  { %3275 = vtanh.f32 %v4203_v59 }
 0x219   :  { %v3276_v36 = vpop.eup %3275 }
 0x21a   :  { %v1005_v45 = vmul.f32 %v3276_v36, %v3274_v29 }
 0x21c   :  { %v1010_v52 = vpack.c.bf16 %v1005_v45, %v1005_v45 }
 0x21e   :  { %1044 = vmatmul.mubr.bf16.vlgmr.msra.gmra.mxu1 %v1010_v52  ;;  %1085 = vmatmul.mubr.bf16.vlgmr.msra.gmra.mxu0 %v1010_v52 }
 0x21f   :  { %1127 = vmatpush1.bf16.msra.mxu1 %v3731_v43  ;;  %1168 = vmatpush1.bf16.msra.mxu0 %v3742_v48 }
 0x220   :  { %1128 = vmatprep.subr.bf16.mxu1 %v3737_v46  ;;  %1169 = vmatprep.subr.bf16.mxu0 %v3750_v50 }
 0x221   :  { %1158 = vmatprep.mubr.bf16.mxu1 %v5243_v10  ;;  %1199 = vmatprep.mubr.bf16.mxu0 %v5243_v10 }
 0x223   :  { %1129 = vmatpush1.bf16.msra.mxu1 %v3757_v51  ;;  %1170 = vmatpush1.bf16.msra.mxu0 %v3770_v55 }
 0x224   :  { %1130 = vmatprep.subr.bf16.mxu1 %v3764_v53  ;;  %1171 = vmatprep.subr.bf16.mxu0 %v3785_v61 }
 0x227   :  { %1131 = vmatpush1.bf16.msra.mxu1 %v3780_v60  ;;  %1172 = vmatpush1.bf16.msra.mxu0 %v3798_v0 }
 0x228   :  { %1132 = vmatprep.subr.bf16.mxu1 %v3792_v63  ;;  %1173 = vmatprep.subr.bf16.mxu0 %v3805_v1 }
 0x22b   :  { %1133 = vmatpush1.bf16.msra.mxu1 %v3813_v4  ;;  %1174 = vmatpush1.bf16.msra.mxu0 %v3826_v7 }
 0x22c   :  { %1134 = vmatprep.subr.bf16.mxu1 %v3820_v6  ;;  %1175 = vmatprep.subr.bf16.mxu0 %v3840_v12 }
 0x22f   :  { %1135 = vmatpush1.bf16.msra.mxu1 %v3835_v11  ;;  %1176 = vmatpush1.bf16.msra.mxu0 %v3852_v15 }
 0x230   :  { %1136 = vmatprep.subr.bf16.mxu1 %v3846_v14  ;;  %1177 = vmatprep.subr.bf16.mxu0 %v3859_v16 }
 0x233   :  { %1137 = vmatpush1.bf16.msra.mxu1 %v3867_v19  ;;  %1178 = vmatpush1.bf16.msra.mxu0 %v3880_v22 }
 0x234   :  { %1138 = vmatprep.subr.bf16.mxu1 %v3874_v21  ;;  %1179 = vmatprep.subr.bf16.mxu0 %v3894_v27 }
 0x237   :  { %1139 = vmatpush1.bf16.msra.mxu1 %v3889_v26  ;;  %1180 = vmatpush1.bf16.msra.mxu0 %v3906_v33 }
 0x238   :  { %1140 = vmatprep.subr.bf16.mxu1 %v3901_v32  ;;  %1181 = vmatprep.subr.bf16.mxu0 %v3913_v35 }
 0x23b   :  { %1141 = vmatpush1.bf16.msra.mxu1 %v3921_v38  ;;  %1182 = vmatpush1.bf16.msra.mxu0 %v3929_v40 }
 0x23c   :  { %1241 = vmatprep.subr.bf16.mxu1 %v3712_v30  ;;  %1282 = vmatprep.subr.bf16.mxu0 %v3718_v31 }
 0x2de   :  { %v1045_v20 = vpop.f32.mrf.mxu1  ;;  %v1086_v37 = vpop.f32.mrf.mxu0 }
 0x2df   :  { %v1093_v24 = vadd.f32 %v1045_v20, %v4016_v47  ;;  %v1095_v13 = vadd.f32 %v1086_v37, %v4019_v49 }
 0x2e0   :  { %v1047_v25 = vpop.f32.mrf.mxu1  ;;  %v1088_v28 = vpop.f32.mrf.mxu0 }
 0x2e1   :  { %v3028_v44 = vmul.f32 -1.442695, %v1093_v24  ;;  %v1094_v34 = vadd.f32 %v1047_v25, %v4022_v56  ;;  %v3030_v5 = vmul.f32 -1.442695, %v1095_v13  ;;  %v1096_v3 = vadd.f32 %v1088_v28, %v4025_v57 }
 0x2e2   :  { %v1049_v58 = vpop.f32.mrf.mxu1  ;;  %v1090_v54 = vpop.f32.mrf.mxu0 }
 0x2e3   :  { %3277 = vpow2.f32 %v3028_v44  ;;  %v3029_v18 = vmul.f32 -1.442695, %v1094_v34 }
 0x2e4   :  { %v1050_v41 = vpop.f32.mrf.mxu1  ;;  %v1091_v42 = vpop.f32.mrf.mxu0 }
 0x2e5   :  { %3279 = vpow2.f32 %v3029_v18 }
 0x2e6   :  { %3281 = vpow2.f32 %v3030_v5 }
 0x2e7   :  { %3283 = vtanh.f32 %v1096_v3 }
 0x2f0   :  { %v3278_v23 = vpop.eup %3277 }
 0x2f1   :  { %v1106_v39 = vadd.f32 1.0, %v3278_v23 }
 0x2f2   :  { %v3280_v47 = vpop.eup %3279 }
 0x2f3   :  { %3285 = vrcp.f32 %v1106_v39  ;;  %v1107_v29 = vadd.f32 1.0, %v3280_v47  ;;  %v3282_v56 = vpop.eup %3281 }
 0x2f4   :  { %v3284_v36 = vpop.eup %3283  ;;  %v1108_v24 = vadd.f32 1.0, %v3282_v56 }
 0x2f5   :  { %3287 = vrcp.f32 %v1107_v29 }
 0x2f6   :  { %3289 = vrcp.f32 %v1108_v24 }
 0x300   :  { %v3286_v45 = vpop.eup %3285 }
 0x301   :  { %v1117_v52 = vmul.f32 %v3286_v45, %v3284_v36 }
 0x302   :  { %v3288_v20 = vpop.eup %3287 }
 0x303   :  { %v1116_v25 = vmul.f32 %v3288_v20, %v4203_v59  ;;  %v3290_v57 = vpop.eup %3289 }
 0x305   :  { %v4245_v49 = vadd.f32 %v1117_v52, %v1116_v25 }
 0x307   :  { %3291 = vtanh.f32 %v4245_v49 }
 0x314   :  { %v3292_v37 = vpop.eup %3291 }
 0x315   :  { %v1120_v28 = vmul.f32 %v3292_v37, %v3290_v57 }
 0x317   :  { %v1125_v44 = vpack.c.bf16 %v1120_v28, %v1120_v28 }
 0x319   :  { %1159 = vmatmul.mubr.bf16.vlgmr.msra.gmra.mxu1 %v1125_v44  ;;  %1200 = vmatmul.mubr.bf16.vlgmr.msra.gmra.mxu0 %v1125_v44 }
 0x31a   :  { %1242 = vmatpush1.bf16.msra.mxu1 %v3731_v43  ;;  %1283 = vmatpush1.bf16.msra.mxu0 %v3742_v48 }
 0x31b   :  { %1243 = vmatprep.subr.bf16.mxu1 %v3737_v46  ;;  %1284 = vmatprep.subr.bf16.mxu0 %v3750_v50 }
 0x31c   :  { %1273 = vmatprep.mubr.bf16.mxu1 %v5243_v10  ;;  %1314 = vmatprep.mubr.bf16.mxu0 %v5243_v10 }
 0x31e   :  { %1244 = vmatpush1.bf16.msra.mxu1 %v3757_v51  ;;  %1285 = vmatpush1.bf16.msra.mxu0 %v3770_v55 }
 0x31f   :  { %1245 = vmatprep.subr.bf16.mxu1 %v3764_v53  ;;  %1286 = vmatprep.subr.bf16.mxu0 %v3785_v61 }
 0x322   :  { %1246 = vmatpush1.bf16.msra.mxu1 %v3780_v60  ;;  %1287 = vmatpush1.bf16.msra.mxu0 %v3798_v0 }
 0x323   :  { %1247 = vmatprep.subr.bf16.mxu1 %v3792_v63  ;;  %1288 = vmatprep.subr.bf16.mxu0 %v3805_v1 }
 0x326   :  { %1248 = vmatpush1.bf16.msra.mxu1 %v3813_v4  ;;  %1289 = vmatpush1.bf16.msra.mxu0 %v3826_v7 }
 0x327   :  { %1249 = vmatprep.subr.bf16.mxu1 %v3820_v6  ;;  %1290 = vmatprep.subr.bf16.mxu0 %v3840_v12 }
 0x32a   :  { %1250 = vmatpush1.bf16.msra.mxu1 %v3835_v11  ;;  %1291 = vmatpush1.bf16.msra.mxu0 %v3852_v15 }
 0x32b   :  { %1251 = vmatprep.subr.bf16.mxu1 %v3846_v14  ;;  %1292 = vmatprep.subr.bf16.mxu0 %v3859_v16 }
 0x32e   :  { %1252 = vmatpush1.bf16.msra.mxu1 %v3867_v19  ;;  %1293 = vmatpush1.bf16.msra.mxu0 %v3880_v22 }
 0x32f   :  { %1253 = vmatprep.subr.bf16.mxu1 %v3874_v21  ;;  %1294 = vmatprep.subr.bf16.mxu0 %v3894_v27 }
 0x332   :  { %1254 = vmatpush1.bf16.msra.mxu1 %v3889_v26  ;;  %1295 = vmatpush1.bf16.msra.mxu0 %v3906_v33 }
 0x333   :  { %1255 = vmatprep.subr.bf16.mxu1 %v3901_v32  ;;  %1296 = vmatprep.subr.bf16.mxu0 %v3913_v35 }
 0x336   :  { %1256 = vmatpush1.bf16.msra.mxu1 %v3921_v38  ;;  %1297 = vmatpush1.bf16.msra.mxu0 %v3929_v40 }
 0x337   :  { %1356 = vmatprep.subr.bf16.mxu1 %v3712_v30  ;;  %1397 = vmatprep.subr.bf16.mxu0 %v3718_v31 }
 0x3d9   :  { %v1160_v59 = vpop.f32.mrf.mxu1  ;;  %v1201_v34 = vpop.f32.mrf.mxu0 }
 0x3da   :  { %v1208_v58 = vadd.f32 %v1160_v59, %v4028_v62  ;;  %v1210_v30 = vadd.f32 %v1201_v34, %v4031_v2 }
 0x3db   :  { %v1162_v54 = vpop.f32.mrf.mxu1  ;;  %v1203_v18 = vpop.f32.mrf.mxu0 }
 0x3dc   :  { %v3031_v41 = vmul.f32 -1.442695, %v1208_v58  ;;  %v1209_v42 = vadd.f32 %v1162_v54, %v4034_v8  ;;  %v3033_v47 = vmul.f32 -1.442695, %v1210_v30  ;;  %v1211_v31 = vadd.f32 %v1203_v18, %v4037_v9  ;;  %v4345_v18 = vld [vmem:[%s5182_s4 + $0xe0] ss:$16 sps:$4 sm:$0xff]  }
 0x3dd   :  { %v1164_v13 = vpop.f32.mrf.mxu1  ;;  %v1205_v5 = vpop.f32.mrf.mxu0  ;;  %v4395_v30 = vld [vmem:[%s5182_s4 + $0xa0] ss:$16 sps:$4 sm:$0xff]  }
 0x3de   :  { %3293 = vpow2.f32 %v3031_v41  ;;  %v3032_v3 = vmul.f32 -1.442695, %v1209_v42  ;;  %v4351_v41 = vld [vmem:[%s5182_s4 + $0xe8] ss:$16 sps:$4 sm:$0xff]   ;;  %v4357_v42 = vld [vmem:[%s5182_s4 + $0xc4] ss:$16 sps:$4 sm:$0xff]  }
 0x3df   :  { %v1165_v23 = vpop.f32.mrf.mxu1  ;;  %v1206_v39 = vpop.f32.mrf.mxu0  ;;  %v4363_v13 = vld [vmem:[%s5182_s4 + $0xcc] ss:$16 sps:$4 sm:$0xff]   ;;  %v4371_v5 = vld [vmem:[%s5182_s4 + $0xc0] ss:$16 sps:$4 sm:$0xff]  }
 0x3e0   :  { %3295 = vpow2.f32 %v3032_v3  ;;  %v4377_v3 = vld [vmem:[%s5182_s4 + $0xc8] ss:$16 sps:$4 sm:$0xff]   ;;  %v4383_v23 = vld [vmem:[%s5182_s4 + $0xa4] ss:$16 sps:$4 sm:$0xff]   ;;  %v4389_v39 = vld [vmem:[%s5182_s4 + $0xac] ss:$16 sps:$4 sm:$0xff]  }
 0x3e1   :  { %3297 = vpow2.f32 %v3033_v47  ;;  %v4401_v47 = vld [vmem:[%s5182_s4 + $0xa8] ss:$16 sps:$4 sm:$0xff]  }
 0x3e2   :  { %3299 = vtanh.f32 %v1211_v31  ;;  %v4407_v31 = vld [vmem:[%s5182_s4 + $0x84] ss:$16 sps:$4 sm:$0xff]  }
 0x3eb   :  { %v3294_v29 = vpop.eup %3293 }
 0x3ec   :  { %v1221_v56 = vadd.f32 1.0, %v3294_v29  ;;  %v4413_v29 = vld [vmem:[%s5182_s4 + $0x8c] ss:$16 sps:$4 sm:$0xff]  }
 0x3ed   :  { %v3296_v62 = vpop.eup %3295 }
 0x3ee   :  { %3301 = vrcp.f32 %v1221_v56  ;;  %v1222_v36 = vadd.f32 1.0, %v3296_v62  ;;  %v3298_v8 = vpop.eup %3297  ;;  %v4419_v56 = vld [vmem:[%s5182_s4 + $0x80] ss:$16 sps:$4 sm:$0xff]   ;;  %v4425_v62 = vld [vmem:[%s5182_s4 + $0x88] ss:$16 sps:$4 sm:$0xff]  }
 0x3ef   :  { %v3300_v45 = vpop.eup %3299  ;;  %v1223_v25 = vadd.f32 1.0, %v3298_v8  ;;  %v4437_v8 = vld [vmem:[%s5182_s4 + $0x6c] ss:$16 sps:$4 sm:$0xff]  }
 0x3f0   :  { %3303 = vrcp.f32 %v1222_v36  ;;  %v4431_v36 = vld [vmem:[%s5182_s4 + $0x64] ss:$16 sps:$4 sm:$0xff]  }
 0x3f1   :  { %3305 = vrcp.f32 %v1223_v25  ;;  %v4467_v25 = vld [vmem:[%s5182_s4 + $0x40] ss:$16 sps:$4 sm:$0xff]  }
 0x3fb   :  { %v3302_v52 = vpop.eup %3301 }
 0x3fc   :  { %v1232_v20 = vmul.f32 %v3302_v52, %v3300_v45  ;;  %v4443_v45 = vld [vmem:[%s5182_s4 + $0x60] ss:$16 sps:$4 sm:$0xff]   ;;  %v4449_v52 = vld [vmem:[%s5182_s4 + $0x68] ss:$16 sps:$4 sm:$0xff]  }
 0x3fd   :  { %v3304_v24 = vpop.eup %3303 }
 0x3fe   :  { %v1231_v57 = vmul.f32 %v3304_v24, %v4245_v49  ;;  %v3306_v9 = vpop.eup %3305  ;;  %v4461_v24 = vld [vmem:[%s5182_s4 + $0x4c] ss:$16 sps:$4 sm:$0xff]  }
 0x400   :  { %v4287_v2 = vadd.f32 %v1232_v20, %v1231_v57  ;;  %v4455_v20 = vld [vmem:[%s5182_s4 + $0x44] ss:$16 sps:$4 sm:$0xff]   ;;  %v4473_v57 = vld [vmem:[%s5182_s4 + $0x48] ss:$16 sps:$4 sm:$0xff]  }
 0x402   :  { %3307 = vtanh.f32 %v4287_v2 }
 0x40f   :  { %v3308_v37 = vpop.eup %3307 }
 0x410   :  { %v1235_v28 = vmul.f32 %v3308_v37, %v3306_v9  ;;  %v4485_v9 = vld [vmem:[%s5182_s4 + $0x2c] ss:$16 sps:$4 sm:$0xff]   ;;  %v4491_v37 = vld [vmem:[%s5182_s4 + $0x20] ss:$16 sps:$4 sm:$0xff]  }
 0x412   :  { %v1240_v44 = vpack.c.bf16 %v1235_v28, %v1235_v28  ;;  %v4497_v28 = vld [vmem:[%s5182_s4 + $0x28] ss:$16 sps:$4 sm:$0xff]  }
 0x414   :  { %1274 = vmatmul.mubr.bf16.vlgmr.msra.gmra.mxu1 %v1240_v44  ;;  %1315 = vmatmul.mubr.bf16.vlgmr.msra.gmra.mxu0 %v1240_v44  ;;  %v4503_v44 = vld [vmem:[%s5182_s4 + $0x4] ss:$16 sps:$4 sm:$0xff]  }
 0x415   :  { %1357 = vmatpush1.bf16.msra.mxu1 %v3731_v43  ;;  %1398 = vmatpush1.bf16.msra.mxu0 %v3742_v48  ;;  %v4325_v43 = vld [vmem:[%s5182_s4 + $0xe4] ss:$16 sps:$4 sm:$0xff]  }
 0x416   :  { %1358 = vmatprep.subr.bf16.mxu1 %v3737_v46  ;;  %1399 = vmatprep.subr.bf16.mxu0 %v3750_v50  ;;  %v4331_v46 = vld [vmem:[%s5182_s4 + $0xec] ss:$16 sps:$4 sm:$0xff]  }
 0x417   :  { %1388 = vmatprep.mubr.bf16.mxu1 %v5243_v10  ;;  %1429 = vmatprep.mubr.bf16.mxu0 %v5243_v10 }
 0x419   :  { %1359 = vmatpush1.bf16.msra.mxu1 %v3757_v51  ;;  %1400 = vmatpush1.bf16.msra.mxu0 %v3770_v55 }
 0x41a   :  { %1360 = vmatprep.subr.bf16.mxu1 %v3764_v53  ;;  %1401 = vmatprep.subr.bf16.mxu0 %v3785_v61  ;;  %v5244_v61 = vld [vmem:[#allocation7_spill] sm:$0xff] }
 0x41d   :  { %1361 = vmatpush1.bf16.msra.mxu1 %v3780_v60  ;;  %1402 = vmatpush1.bf16.msra.mxu0 %v3798_v0 }
 0x41e   :  { %1362 = vmatprep.subr.bf16.mxu1 %v3792_v63  ;;  %1403 = vmatprep.subr.bf16.mxu0 %v3805_v1 }
 0x421   :  { %1363 = vmatpush1.bf16.msra.mxu1 %v3813_v4  ;;  %1404 = vmatpush1.bf16.msra.mxu0 %v3826_v7 }
 0x422   :  { %1364 = vmatprep.subr.bf16.mxu1 %v3820_v6  ;;  %1405 = vmatprep.subr.bf16.mxu0 %v3840_v12 }
 0x425   :  { %1365 = vmatpush1.bf16.msra.mxu1 %v3835_v11  ;;  %1406 = vmatpush1.bf16.msra.mxu0 %v3852_v15  ;;  %v5245_v11 = vld [vmem:[#allocation6_spill] sm:$0xff]  ;;  %v5246_v15 = vld [vmem:[#allocation8_spill] sm:$0xff] }
 0x426   :  { %1366 = vmatprep.subr.bf16.mxu1 %v3846_v14  ;;  %1407 = vmatprep.subr.bf16.mxu0 %v3859_v16 }
 0x429   :  { %1367 = vmatpush1.bf16.msra.mxu1 %v3867_v19  ;;  %1408 = vmatpush1.bf16.msra.mxu0 %v3880_v22 }
 0x42a   :  { %1368 = vmatprep.subr.bf16.mxu1 %v3874_v21  ;;  %1409 = vmatprep.subr.bf16.mxu0 %v3894_v27 }
 0x42d   :  { %1369 = vmatpush1.bf16.msra.mxu1 %v3889_v26  ;;  %1410 = vmatpush1.bf16.msra.mxu0 %v3906_v33 }
 0x42e   :  { %1370 = vmatprep.subr.bf16.mxu1 %v3901_v32  ;;  %1411 = vmatprep.subr.bf16.mxu0 %v3913_v35 }
 0x431   :  { %1371 = vmatpush1.bf16.msra.mxu1 %v3921_v38  ;;  %1412 = vmatpush1.bf16.msra.mxu0 %v3929_v40 }
 0x432   :  { %1471 = vmatprep.subr.bf16.mxu1 %v4325_v43  ;;  %1512 = vmatprep.subr.bf16.mxu0 %v4331_v46 }
 0x4d4   :  { %v1275_v48 = vpop.f32.mrf.mxu1  ;;  %v1316_v50 = vpop.f32.mrf.mxu0 }
 0x4d5   :  { %v1323_v51 = vadd.f32 %v1275_v48, %v4040_v17  ;;  %v1325_v12 = vadd.f32 %v1316_v50, %v5245_v11  ;;  %v4509_v48 = vld [vmem:[%s5182_s4 + $0xc] ss:$16 sps:$4 sm:$0xff]   ;;  %v4515_v50 = vld [vmem:[%s5182_s4] ss:$16 sps:$4 sm:$0xff]  }
 0x4d6   :  { %v1277_v53 = vpop.f32.mrf.mxu1  ;;  %v1318_v55 = vpop.f32.mrf.mxu0 }
 0x4d7   :  { %v3034_v60 = vmul.f32 -1.442695, %v1323_v51  ;;  %v1324_v63 = vadd.f32 %v1277_v53, %v5244_v61  ;;  %v3036_v14 = vmul.f32 -1.442695, %v1325_v12  ;;  %v1326_v16 = vadd.f32 %v1318_v55, %v5246_v15  ;;  %v4521_v51 = vld [vmem:[%s5182_s4 + $0x8] ss:$16 sps:$4 sm:$0xff]  }
 0x4d8   :  { %v1279_v0 = vpop.f32.mrf.mxu1  ;;  %v1320_v1 = vpop.f32.mrf.mxu0 }
 0x4d9   :  { %3309 = vpow2.f32 %v3034_v60  ;;  %v3035_v4 = vmul.f32 -1.442695, %v1324_v63  ;;  %v5247_v60 = vld [vmem:[#allocation9_spill] sm:$0xff] }
 0x4da   :  { %v1280_v6 = vpop.f32.mrf.mxu1  ;;  %v1321_v7 = vpop.f32.mrf.mxu0 }
 0x4db   :  { %3311 = vpow2.f32 %v3035_v4  ;;  %v5248_v4 = vld [vmem:[#allocation11_spill] sm:$0xff] }
 0x4dc   :  { %3313 = vpow2.f32 %v3036_v14 }
 0x4dd   :  { %3315 = vtanh.f32 %v1326_v16  ;;  %v5249_v16 = vld [vmem:[#allocation10_spill] sm:$0xff] }
 0x4e6   :  { %v3310_v19 = vpop.eup %3309 }
 0x4e7   :  { %v1336_v21 = vadd.f32 1.0, %v3310_v19 }
 0x4e8   :  { %v3312_v22 = vpop.eup %3311 }
 0x4e9   :  { %3317 = vrcp.f32 %v1336_v21  ;;  %v1337_v26 = vadd.f32 1.0, %v3312_v22  ;;  %v3314_v27 = vpop.eup %3313  ;;  %v5250_v22 = vld [vmem:[#allocation12_spill] sm:$0xff] }
 0x4ea   :  { %v3316_v32 = vpop.eup %3315  ;;  %v1338_v40 = vadd.f32 1.0, %v3314_v27 }
 0x4eb   :  { %3319 = vrcp.f32 %v1337_v26 }
 0x4ec   :  { %3321 = vrcp.f32 %v1338_v40 }
 0x4f6   :  { %v3318_v33 = vpop.eup %3317 }
 0x4f7   :  { %v1347_v35 = vmul.f32 %v3318_v33, %v3316_v32 }
 0x4f8   :  { %v3320_v38 = vpop.eup %3319 }
 0x4f9   :  { %v1346_v17 = vmul.f32 %v3320_v38, %v4287_v2  ;;  %v3322_v59 = vpop.eup %3321  ;;  %v4479_v2 = vld [vmem:[%s5182_s4 + $0x24] ss:$16 sps:$4 sm:$0xff]  }
 0x4fb   :  { %v4339_v49 = vadd.f32 %v1347_v35, %v1346_v17 }
 0x4fd   :  { %3323 = vtanh.f32 %v4339_v49 }
 0x50a   :  { %v3324_v34 = vpop.eup %3323 }
 0x50b   :  { %v1350_v58 = vmul.f32 %v3324_v34, %v3322_v59 }
 0x50d   :  { %v1355_v54 = vpack.c.bf16 %v1350_v58, %v1350_v58 }
 0x50f   :  { %1389 = vmatmul.mubr.bf16.vlgmr.msra.gmra.mxu1 %v1355_v54  ;;  %1430 = vmatmul.mubr.bf16.vlgmr.msra.gmra.mxu0 %v1355_v54 }
 0x510   :  { %1472 = vmatpush1.bf16.msra.mxu1 %v4345_v18  ;;  %1513 = vmatpush1.bf16.msra.mxu0 %v4351_v41 }
 0x511   :  { %1473 = vmatprep.subr.bf16.mxu1 %v4357_v42  ;;  %1514 = vmatprep.subr.bf16.mxu0 %v4363_v13 }
 0x512   :  { %1503 = vmatprep.mubr.bf16.mxu1 %v5243_v10  ;;  %1544 = vmatprep.mubr.bf16.mxu0 %v5243_v10 }
 0x514   :  { %1474 = vmatpush1.bf16.msra.mxu1 %v4371_v5  ;;  %1515 = vmatpush1.bf16.msra.mxu0 %v4377_v3 }
 0x515   :  { %1475 = vmatprep.subr.bf16.mxu1 %v4383_v23  ;;  %1516 = vmatprep.subr.bf16.mxu0 %v4389_v39 }
 0x518   :  { %1476 = vmatpush1.bf16.msra.mxu1 %v4395_v30  ;;  %1517 = vmatpush1.bf16.msra.mxu0 %v4401_v47 }
 0x519   :  { %1477 = vmatprep.subr.bf16.mxu1 %v4407_v31  ;;  %1518 = vmatprep.subr.bf16.mxu0 %v4413_v29 }
 0x51c   :  { %1478 = vmatpush1.bf16.msra.mxu1 %v4419_v56  ;;  %1519 = vmatpush1.bf16.msra.mxu0 %v4425_v62 }
 0x51d   :  { %1479 = vmatprep.subr.bf16.mxu1 %v4431_v36  ;;  %1520 = vmatprep.subr.bf16.mxu0 %v4437_v8 }
 0x520   :  { %1480 = vmatpush1.bf16.msra.mxu1 %v4443_v45  ;;  %1521 = vmatpush1.bf16.msra.mxu0 %v4449_v52 }
 0x521   :  { %1481 = vmatprep.subr.bf16.mxu1 %v4455_v20  ;;  %1522 = vmatprep.subr.bf16.mxu0 %v4461_v24 }
 0x524   :  { %1482 = vmatpush1.bf16.msra.mxu1 %v4467_v25  ;;  %1523 = vmatpush1.bf16.msra.mxu0 %v4473_v57 }
 0x525   :  { %1483 = vmatprep.subr.bf16.mxu1 %v4479_v2  ;;  %1524 = vmatprep.subr.bf16.mxu0 %v4485_v9 }
 0x528   :  { %1484 = vmatpush1.bf16.msra.mxu1 %v4491_v37  ;;  %1525 = vmatpush1.bf16.msra.mxu0 %v4497_v28 }
 0x529   :  { %1485 = vmatprep.subr.bf16.mxu1 %v4503_v44  ;;  %1526 = vmatprep.subr.bf16.mxu0 %v4509_v48 }
 0x52c   :  { %1486 = vmatpush1.bf16.msra.mxu1 %v4515_v50  ;;  %1527 = vmatpush1.bf16.msra.mxu0 %v4521_v51 }
 0x52d   :  { %1586 = vmatprep.subr.bf16.mxu1 %v4325_v43  ;;  %1627 = vmatprep.subr.bf16.mxu0 %v4331_v46 }
 0x5cf   :  { %v1390_v53 = vpop.f32.mrf.mxu1  ;;  %v1431_v55 = vpop.f32.mrf.mxu0 }
 0x5d0   :  { %v1438_v61 = vadd.f32 %v1390_v53, %v5247_v60  ;;  %v1440_v19 = vadd.f32 %v1431_v55, %v5249_v16 }
 0x5d1   :  { %v1392_v63 = vpop.f32.mrf.mxu1  ;;  %v1433_v0 = vpop.f32.mrf.mxu0 }
 0x5d2   :  { %v3037_v1 = vmul.f32 -1.442695, %v1438_v61  ;;  %v1439_v6 = vadd.f32 %v1392_v63, %v5248_v4  ;;  %v3039_v21 = vmul.f32 -1.442695, %v1440_v19  ;;  %v1441_v26 = vadd.f32 %v1433_v0, %v5250_v22 }
 0x5d3   :  { %v1394_v7 = vpop.f32.mrf.mxu1  ;;  %v1435_v11 = vpop.f32.mrf.mxu0 }
 0x5d4   :  { %3325 = vpow2.f32 %v3037_v1  ;;  %v3038_v12 = vmul.f32 -1.442695, %v1439_v6  ;;  %v5251_v1 = vld [vmem:[#allocation13_spill] sm:$0xff] }
 0x5d5   :  { %v1395_v14 = vpop.f32.mrf.mxu1  ;;  %v1436_v15 = vpop.f32.mrf.mxu0 }
 0x5d6   :  { %3327 = vpow2.f32 %v3038_v12  ;;  %v5252_v12 = vld [vmem:[#allocation15_spill] sm:$0xff] }
 0x5d7   :  { %3329 = vpow2.f32 %v3039_v21 }
 0x5d8   :  { %3331 = vtanh.f32 %v1441_v26  ;;  %v5253_v26 = vld [vmem:[#allocation14_spill] sm:$0xff] }
 0x5e1   :  { %v3326_v27 = vpop.eup %3325 }
 0x5e2   :  { %v1451_v32 = vadd.f32 1.0, %v3326_v27 }
 0x5e3   :  { %v3328_v33 = vpop.eup %3327 }
 0x5e4   :  { %3333 = vrcp.f32 %v1451_v32  ;;  %v1452_v35 = vadd.f32 1.0, %v3328_v33  ;;  %v3330_v38 = vpop.eup %3329  ;;  %v5254_v33 = vld [vmem:[#allocation16_spill] sm:$0xff] }
 0x5e5   :  { %v3332_v40 = vpop.eup %3331  ;;  %v1453_v58 = vadd.f32 1.0, %v3330_v38 }
 0x5e6   :  { %3335 = vrcp.f32 %v1452_v35 }
 0x5e7   :  { %3337 = vrcp.f32 %v1453_v58 }
 0x5f1   :  { %v3334_v17 = vpop.eup %3333 }
 0x5f2   :  { %v1462_v59 = vmul.f32 %v3334_v17, %v3332_v40 }
 0x5f3   :  { %v3336_v34 = vpop.eup %3335 }
 0x5f4   :  { %v1461_v54 = vmul.f32 %v3336_v34, %v4339_v49  ;;  %v3338_v55 = vpop.eup %3337 }
 0x5f6   :  { %v4531_v53 = vadd.f32 %v1462_v59, %v1461_v54 }
 0x5f8   :  { %3339 = vtanh.f32 %v4531_v53 }
 0x605   :  { %v3340_v60 = vpop.eup %3339 }
 0x606   :  { %v1465_v61 = vmul.f32 %v3340_v60, %v3338_v55 }
 0x608   :  { %v1470_v63 = vpack.c.bf16 %v1465_v61, %v1465_v61 }
 0x60a   :  { %1504 = vmatmul.mubr.bf16.vlgmr.msra.gmra.mxu1 %v1470_v63  ;;  %1545 = vmatmul.mubr.bf16.vlgmr.msra.gmra.mxu0 %v1470_v63 }
 0x60b   :  { %1587 = vmatpush1.bf16.msra.mxu1 %v4345_v18  ;;  %1628 = vmatpush1.bf16.msra.mxu0 %v4351_v41 }
 0x60c   :  { %1588 = vmatprep.subr.bf16.mxu1 %v4357_v42  ;;  %1629 = vmatprep.subr.bf16.mxu0 %v4363_v13 }
 0x60d   :  { %1618 = vmatprep.mubr.bf16.mxu1 %v5243_v10  ;;  %1659 = vmatprep.mubr.bf16.mxu0 %v5243_v10 }
 0x60f   :  { %1589 = vmatpush1.bf16.msra.mxu1 %v4371_v5  ;;  %1630 = vmatpush1.bf16.msra.mxu0 %v4377_v3 }
 0x610   :  { %1590 = vmatprep.subr.bf16.mxu1 %v4383_v23  ;;  %1631 = vmatprep.subr.bf16.mxu0 %v4389_v39 }
 0x613   :  { %1591 = vmatpush1.bf16.msra.mxu1 %v4395_v30  ;;  %1632 = vmatpush1.bf16.msra.mxu0 %v4401_v47 }
 0x614   :  { %1592 = vmatprep.subr.bf16.mxu1 %v4407_v31  ;;  %1633 = vmatprep.subr.bf16.mxu0 %v4413_v29 }
 0x617   :  { %1593 = vmatpush1.bf16.msra.mxu1 %v4419_v56  ;;  %1634 = vmatpush1.bf16.msra.mxu0 %v4425_v62 }
 0x618   :  { %1594 = vmatprep.subr.bf16.mxu1 %v4431_v36  ;;  %1635 = vmatprep.subr.bf16.mxu0 %v4437_v8 }
 0x61b   :  { %1595 = vmatpush1.bf16.msra.mxu1 %v4443_v45  ;;  %1636 = vmatpush1.bf16.msra.mxu0 %v4449_v52 }
 0x61c   :  { %1596 = vmatprep.subr.bf16.mxu1 %v4455_v20  ;;  %1637 = vmatprep.subr.bf16.mxu0 %v4461_v24 }
 0x61f   :  { %1597 = vmatpush1.bf16.msra.mxu1 %v4467_v25  ;;  %1638 = vmatpush1.bf16.msra.mxu0 %v4473_v57 }
 0x620   :  { %1598 = vmatprep.subr.bf16.mxu1 %v4479_v2  ;;  %1639 = vmatprep.subr.bf16.mxu0 %v4485_v9 }
 0x623   :  { %1599 = vmatpush1.bf16.msra.mxu1 %v4491_v37  ;;  %1640 = vmatpush1.bf16.msra.mxu0 %v4497_v28 }
 0x624   :  { %1600 = vmatprep.subr.bf16.mxu1 %v4503_v44  ;;  %1641 = vmatprep.subr.bf16.mxu0 %v4509_v48 }
 0x627   :  { %1601 = vmatpush1.bf16.msra.mxu1 %v4515_v50  ;;  %1642 = vmatpush1.bf16.msra.mxu0 %v4521_v51 }
 0x628   :  { %1701 = vmatprep.subr.bf16.mxu1 %v4325_v43  ;;  %1742 = vmatprep.subr.bf16.mxu0 %v4331_v46 }
 0x6ca   :  { %v1505_v49 = vpop.f32.mrf.mxu1  ;;  %v1546_v0 = vpop.f32.mrf.mxu0 }
 0x6cb   :  { %v1553_v4 = vadd.f32 %v1505_v49, %v5251_v1  ;;  %v1555_v27 = vadd.f32 %v1546_v0, %v5253_v26 }
 0x6cc   :  { %v1507_v6 = vpop.f32.mrf.mxu1  ;;  %v1548_v7 = vpop.f32.mrf.mxu0 }
 0x6cd   :  { %v3040_v11 = vmul.f32 -1.442695, %v1553_v4  ;;  %v1554_v14 = vadd.f32 %v1507_v6, %v5252_v12  ;;  %v3042_v32 = vmul.f32 -1.442695, %v1555_v27  ;;  %v1556_v35 = vadd.f32 %v1548_v7, %v5254_v33 }
 0x6ce   :  { %v1509_v15 = vpop.f32.mrf.mxu1  ;;  %v1550_v16 = vpop.f32.mrf.mxu0 }
 0x6cf   :  { %3341 = vpow2.f32 %v3040_v11  ;;  %v3041_v19 = vmul.f32 -1.442695, %v1554_v14  ;;  %v5255_v11 = vld [vmem:[#allocation17_spill] sm:$0xff] }
 0x6d0   :  { %v1510_v21 = vpop.f32.mrf.mxu1  ;;  %v1551_v22 = vpop.f32.mrf.mxu0 }
 0x6d1   :  { %3343 = vpow2.f32 %v3041_v19  ;;  %v5256_v19 = vld [vmem:[#allocation19_spill] sm:$0xff] }
 0x6d2   :  { %3345 = vpow2.f32 %v3042_v32 }
 0x6d3   :  { %3347 = vtanh.f32 %v1556_v35  ;;  %v5257_v35 = vld [vmem:[#allocation18_spill] sm:$0xff] }
 0x6dc   :  { %v3342_v38 = vpop.eup %3341 }
 0x6dd   :  { %v1566_v40 = vadd.f32 1.0, %v3342_v38 }
 0x6de   :  { %v3344_v17 = vpop.eup %3343 }
 0x6df   :  { %3349 = vrcp.f32 %v1566_v40  ;;  %v1567_v59 = vadd.f32 1.0, %v3344_v17  ;;  %v3346_v34 = vpop.eup %3345  ;;  %v5258_v17 = vld [vmem:[#allocation20_spill] sm:$0xff] }
 0x6e0   :  { %v3348_v58 = vpop.eup %3347  ;;  %v1568_v61 = vadd.f32 1.0, %v3346_v34 }
 0x6e1   :  { %3351 = vrcp.f32 %v1567_v59 }
 0x6e2   :  { %3353 = vrcp.f32 %v1568_v61 }
 0x6ec   :  { %v3350_v54 = vpop.eup %3349 }
 0x6ed   :  { %v1577_v55 = vmul.f32 %v3350_v54, %v3348_v58 }
 0x6ee   :  { %v3352_v60 = vpop.eup %3351 }
 0x6ef   :  { %v1576_v63 = vmul.f32 %v3352_v60, %v4531_v53  ;;  %v3354_v0 = vpop.eup %3353 }
 0x6f1   :  { %v4573_v49 = vadd.f32 %v1577_v55, %v1576_v63 }
 0x6f3   :  { %3355 = vtanh.f32 %v4573_v49 }
 0x700   :  { %v3356_v1 = vpop.eup %3355 }
 0x701   :  { %v1580_v4 = vmul.f32 %v3356_v1, %v3354_v0 }
 0x703   :  { %v1585_v6 = vpack.c.bf16 %v1580_v4, %v1580_v4 }
 0x705   :  { %1619 = vmatmul.mubr.bf16.vlgmr.msra.gmra.mxu1 %v1585_v6  ;;  %1660 = vmatmul.mubr.bf16.vlgmr.msra.gmra.mxu0 %v1585_v6 }
 0x706   :  { %1702 = vmatpush1.bf16.msra.mxu1 %v4345_v18  ;;  %1743 = vmatpush1.bf16.msra.mxu0 %v4351_v41 }
 0x707   :  { %1703 = vmatprep.subr.bf16.mxu1 %v4357_v42  ;;  %1744 = vmatprep.subr.bf16.mxu0 %v4363_v13 }
 0x708   :  { %1733 = vmatprep.mubr.bf16.mxu1 %v5243_v10  ;;  %1774 = vmatprep.mubr.bf16.mxu0 %v5243_v10 }
 0x70a   :  { %1704 = vmatpush1.bf16.msra.mxu1 %v4371_v5  ;;  %1745 = vmatpush1.bf16.msra.mxu0 %v4377_v3 }
 0x70b   :  { %1705 = vmatprep.subr.bf16.mxu1 %v4383_v23  ;;  %1746 = vmatprep.subr.bf16.mxu0 %v4389_v39 }
 0x70e   :  { %1706 = vmatpush1.bf16.msra.mxu1 %v4395_v30  ;;  %1747 = vmatpush1.bf16.msra.mxu0 %v4401_v47 }
 0x70f   :  { %1707 = vmatprep.subr.bf16.mxu1 %v4407_v31  ;;  %1748 = vmatprep.subr.bf16.mxu0 %v4413_v29 }
 0x712   :  { %1708 = vmatpush1.bf16.msra.mxu1 %v4419_v56  ;;  %1749 = vmatpush1.bf16.msra.mxu0 %v4425_v62 }
 0x713   :  { %1709 = vmatprep.subr.bf16.mxu1 %v4431_v36  ;;  %1750 = vmatprep.subr.bf16.mxu0 %v4437_v8 }
 0x716   :  { %1710 = vmatpush1.bf16.msra.mxu1 %v4443_v45  ;;  %1751 = vmatpush1.bf16.msra.mxu0 %v4449_v52 }
 0x717   :  { %1711 = vmatprep.subr.bf16.mxu1 %v4455_v20  ;;  %1752 = vmatprep.subr.bf16.mxu0 %v4461_v24 }
 0x71a   :  { %1712 = vmatpush1.bf16.msra.mxu1 %v4467_v25  ;;  %1753 = vmatpush1.bf16.msra.mxu0 %v4473_v57 }
 0x71b   :  { %1713 = vmatprep.subr.bf16.mxu1 %v4479_v2  ;;  %1754 = vmatprep.subr.bf16.mxu0 %v4485_v9 }
 0x71e   :  { %1714 = vmatpush1.bf16.msra.mxu1 %v4491_v37  ;;  %1755 = vmatpush1.bf16.msra.mxu0 %v4497_v28 }
 0x71f   :  { %1715 = vmatprep.subr.bf16.mxu1 %v4503_v44  ;;  %1756 = vmatprep.subr.bf16.mxu0 %v4509_v48 }
 0x722   :  { %1716 = vmatpush1.bf16.msra.mxu1 %v4515_v50  ;;  %1757 = vmatpush1.bf16.msra.mxu0 %v4521_v51 }
 0x723   :  { %1816 = vmatprep.subr.bf16.mxu1 %v4325_v43  ;;  %1857 = vmatprep.subr.bf16.mxu0 %v4331_v46 }
 0x7c5   :  { %v1620_v53 = vpop.f32.mrf.mxu1  ;;  %v1661_v7 = vpop.f32.mrf.mxu0 }
 0x7c6   :  { %v1668_v12 = vadd.f32 %v1620_v53, %v5255_v11  ;;  %v1670_v38 = vadd.f32 %v1661_v7, %v5257_v35 }
 0x7c7   :  { %v1622_v14 = vpop.f32.mrf.mxu1  ;;  %v1663_v15 = vpop.f32.mrf.mxu0 }
 0x7c8   :  { %v3043_v16 = vmul.f32 -1.442695, %v1668_v12  ;;  %v1669_v21 = vadd.f32 %v1622_v14, %v5256_v19  ;;  %v3045_v40 = vmul.f32 -1.442695, %v1670_v38  ;;  %v1671_v59 = vadd.f32 %v1663_v15, %v5258_v17 }
 0x7c9   :  { %v1624_v22 = vpop.f32.mrf.mxu1  ;;  %v1665_v26 = vpop.f32.mrf.mxu0 }
 0x7ca   :  { %3357 = vpow2.f32 %v3043_v16  ;;  %v3044_v27 = vmul.f32 -1.442695, %v1669_v21  ;;  %v5259_v16 = vld [vmem:[#allocation21_spill] sm:$0xff] }
 0x7cb   :  { %v1625_v32 = vpop.f32.mrf.mxu1  ;;  %v1666_v33 = vpop.f32.mrf.mxu0 }
 0x7cc   :  { %3359 = vpow2.f32 %v3044_v27  ;;  %v5260_v27 = vld [vmem:[#allocation23_spill] sm:$0xff] }
 0x7cd   :  { %3361 = vpow2.f32 %v3045_v40 }
 0x7ce   :  { %3363 = vtanh.f32 %v1671_v59  ;;  %v5261_v59 = vld [vmem:[#allocation22_spill] sm:$0xff] }
 0x7d7   :  { %v3358_v34 = vpop.eup %3357 }
 0x7d8   :  { %v1681_v58 = vadd.f32 1.0, %v3358_v34 }
 0x7d9   :  { %v3360_v54 = vpop.eup %3359 }
 0x7da   :  { %3365 = vrcp.f32 %v1681_v58  ;;  %v1682_v55 = vadd.f32 1.0, %v3360_v54  ;;  %v3362_v60 = vpop.eup %3361  ;;  %v5262_v54 = vld [vmem:[#allocation24_spill] sm:$0xff] }
 0x7db   :  { %v3364_v61 = vpop.eup %3363  ;;  %v1683_v4 = vadd.f32 1.0, %v3362_v60 }
 0x7dc   :  { %3367 = vrcp.f32 %v1682_v55 }
 0x7dd   :  { %3369 = vrcp.f32 %v1683_v4 }
 0x7e7   :  { %v3366_v63 = vpop.eup %3365 }
 0x7e8   :  { %v1692_v0 = vmul.f32 %v3366_v63, %v3364_v61 }
 0x7e9   :  { %v3368_v1 = vpop.eup %3367 }
 0x7ea   :  { %v1691_v6 = vmul.f32 %v3368_v1, %v4573_v49  ;;  %v3370_v7 = vpop.eup %3369 }
 0x7ec   :  { %v4615_v53 = vadd.f32 %v1692_v0, %v1691_v6 }
 0x7ee   :  { %3371 = vtanh.f32 %v4615_v53 }
 0x7fb   :  { %v3372_v11 = vpop.eup %3371 }
 0x7fc   :  { %v1695_v12 = vmul.f32 %v3372_v11, %v3370_v7 }
 0x7fe   :  { %v1700_v14 = vpack.c.bf16 %v1695_v12, %v1695_v12 }
 0x800   :  { %1734 = vmatmul.mubr.bf16.vlgmr.msra.gmra.mxu1 %v1700_v14  ;;  %1775 = vmatmul.mubr.bf16.vlgmr.msra.gmra.mxu0 %v1700_v14 }
 0x801   :  { %1817 = vmatpush1.bf16.msra.mxu1 %v4345_v18  ;;  %1858 = vmatpush1.bf16.msra.mxu0 %v4351_v41 }
 0x802   :  { %1818 = vmatprep.subr.bf16.mxu1 %v4357_v42  ;;  %1859 = vmatprep.subr.bf16.mxu0 %v4363_v13 }
 0x803   :  { %1848 = vmatprep.mubr.bf16.mxu1 %v5243_v10  ;;  %1889 = vmatprep.mubr.bf16.mxu0 %v5243_v10 }
 0x805   :  { %1819 = vmatpush1.bf16.msra.mxu1 %v4371_v5  ;;  %1860 = vmatpush1.bf16.msra.mxu0 %v4377_v3 }
 0x806   :  { %1820 = vmatprep.subr.bf16.mxu1 %v4383_v23  ;;  %1861 = vmatprep.subr.bf16.mxu0 %v4389_v39 }
 0x809   :  { %1821 = vmatpush1.bf16.msra.mxu1 %v4395_v30  ;;  %1862 = vmatpush1.bf16.msra.mxu0 %v4401_v47 }
 0x80a   :  { %1822 = vmatprep.subr.bf16.mxu1 %v4407_v31  ;;  %1863 = vmatprep.subr.bf16.mxu0 %v4413_v29 }
 0x80d   :  { %1823 = vmatpush1.bf16.msra.mxu1 %v4419_v56  ;;  %1864 = vmatpush1.bf16.msra.mxu0 %v4425_v62 }
 0x80e   :  { %1824 = vmatprep.subr.bf16.mxu1 %v4431_v36  ;;  %1865 = vmatprep.subr.bf16.mxu0 %v4437_v8 }
 0x811   :  { %1825 = vmatpush1.bf16.msra.mxu1 %v4443_v45  ;;  %1866 = vmatpush1.bf16.msra.mxu0 %v4449_v52 }
 0x812   :  { %1826 = vmatprep.subr.bf16.mxu1 %v4455_v20  ;;  %1867 = vmatprep.subr.bf16.mxu0 %v4461_v24 }
 0x815   :  { %1827 = vmatpush1.bf16.msra.mxu1 %v4467_v25  ;;  %1868 = vmatpush1.bf16.msra.mxu0 %v4473_v57 }
 0x816   :  { %1828 = vmatprep.subr.bf16.mxu1 %v4479_v2  ;;  %1869 = vmatprep.subr.bf16.mxu0 %v4485_v9 }
 0x819   :  { %1829 = vmatpush1.bf16.msra.mxu1 %v4491_v37  ;;  %1870 = vmatpush1.bf16.msra.mxu0 %v4497_v28 }
 0x81a   :  { %1830 = vmatprep.subr.bf16.mxu1 %v4503_v44  ;;  %1871 = vmatprep.subr.bf16.mxu0 %v4509_v48 }
 0x81d   :  { %1831 = vmatpush1.bf16.msra.mxu1 %v4515_v50  ;;  %1872 = vmatpush1.bf16.msra.mxu0 %v4521_v51 }
 0x81e   :  { %1931 = vmatprep.subr.bf16.mxu1 %v4325_v43  ;;  %1972 = vmatprep.subr.bf16.mxu0 %v4331_v46 }
 0x8c0   :  { %v1735_v49 = vpop.f32.mrf.mxu1  ;;  %v1776_v15 = vpop.f32.mrf.mxu0 }
 0x8c1   :  { %v1783_v19 = vadd.f32 %v1735_v49, %v5259_v16  ;;  %v1785_v34 = vadd.f32 %v1776_v15, %v5261_v59 }
 0x8c2   :  { %v1737_v21 = vpop.f32.mrf.mxu1  ;;  %v1778_v22 = vpop.f32.mrf.mxu0 }
 0x8c3   :  { %v3046_v26 = vmul.f32 -1.442695, %v1783_v19  ;;  %v1784_v32 = vadd.f32 %v1737_v21, %v5260_v27  ;;  %v3048_v58 = vmul.f32 -1.442695, %v1785_v34  ;;  %v1786_v55 = vadd.f32 %v1778_v22, %v5262_v54 }
 0x8c4   :  { %v1739_v33 = vpop.f32.mrf.mxu1  ;;  %v1780_v35 = vpop.f32.mrf.mxu0 }
 0x8c5   :  { %3373 = vpow2.f32 %v3046_v26  ;;  %v3047_v38 = vmul.f32 -1.442695, %v1784_v32  ;;  %v5263_v26 = vld [vmem:[#allocation25_spill] sm:$0xff] }
 0x8c6   :  { %v1740_v40 = vpop.f32.mrf.mxu1  ;;  %v1781_v17 = vpop.f32.mrf.mxu0 }
 0x8c7   :  { %3375 = vpow2.f32 %v3047_v38  ;;  %v5264_v38 = vld [vmem:[#allocation27_spill] sm:$0xff] }
 0x8c8   :  { %3377 = vpow2.f32 %v3048_v58 }
 0x8c9   :  { %3379 = vtanh.f32 %v1786_v55  ;;  %v5265_v55 = vld [vmem:[#allocation26_spill] sm:$0xff] }
 0x8d2   :  { %v3374_v60 = vpop.eup %3373 }
 0x8d3   :  { %v1796_v61 = vadd.f32 1.0, %v3374_v60 }
 0x8d4   :  { %v3376_v63 = vpop.eup %3375 }
 0x8d5   :  { %3381 = vrcp.f32 %v1796_v61  ;;  %v1797_v0 = vadd.f32 1.0, %v3376_v63  ;;  %v3378_v1 = vpop.eup %3377  ;;  %v5266_v63 = vld [vmem:[#allocation28_spill] sm:$0xff] }
 0x8d6   :  { %v3380_v4 = vpop.eup %3379  ;;  %v1798_v12 = vadd.f32 1.0, %v3378_v1 }
 0x8d7   :  { %3383 = vrcp.f32 %v1797_v0 }
 0x8d8   :  { %3385 = vrcp.f32 %v1798_v12 }
 0x8e2   :  { %v3382_v6 = vpop.eup %3381 }
 0x8e3   :  { %v1807_v7 = vmul.f32 %v3382_v6, %v3380_v4 }
 0x8e4   :  { %v3384_v11 = vpop.eup %3383 }
 0x8e5   :  { %v1806_v14 = vmul.f32 %v3384_v11, %v4615_v53  ;;  %v3386_v15 = vpop.eup %3385 }
 0x8e7   :  { %v4657_v49 = vadd.f32 %v1807_v7, %v1806_v14 }
 0x8e9   :  { %3387 = vtanh.f32 %v4657_v49 }
 0x8f6   :  { %v3388_v16 = vpop.eup %3387 }
 0x8f7   :  { %v1810_v19 = vmul.f32 %v3388_v16, %v3386_v15 }
 0x8f9   :  { %v1815_v21 = vpack.c.bf16 %v1810_v19, %v1810_v19 }
 0x8fb   :  { %1849 = vmatmul.mubr.bf16.vlgmr.msra.gmra.mxu1 %v1815_v21  ;;  %1890 = vmatmul.mubr.bf16.vlgmr.msra.gmra.mxu0 %v1815_v21 }
 0x8fc   :  { %1932 = vmatpush1.bf16.msra.mxu1 %v4345_v18  ;;  %1973 = vmatpush1.bf16.msra.mxu0 %v4351_v41 }
 0x8fd   :  { %1933 = vmatprep.subr.bf16.mxu1 %v4357_v42  ;;  %1974 = vmatprep.subr.bf16.mxu0 %v4363_v13 }
 0x8fe   :  { %1963 = vmatprep.mubr.bf16.mxu1 %v5243_v10  ;;  %2004 = vmatprep.mubr.bf16.mxu0 %v5243_v10 }
 0x900   :  { %1934 = vmatpush1.bf16.msra.mxu1 %v4371_v5  ;;  %1975 = vmatpush1.bf16.msra.mxu0 %v4377_v3 }
 0x901   :  { %1935 = vmatprep.subr.bf16.mxu1 %v4383_v23  ;;  %1976 = vmatprep.subr.bf16.mxu0 %v4389_v39 }
 0x904   :  { %1936 = vmatpush1.bf16.msra.mxu1 %v4395_v30  ;;  %1977 = vmatpush1.bf16.msra.mxu0 %v4401_v47 }
 0x905   :  { %1937 = vmatprep.subr.bf16.mxu1 %v4407_v31  ;;  %1978 = vmatprep.subr.bf16.mxu0 %v4413_v29 }
 0x908   :  { %1938 = vmatpush1.bf16.msra.mxu1 %v4419_v56  ;;  %1979 = vmatpush1.bf16.msra.mxu0 %v4425_v62 }
 0x909   :  { %1939 = vmatprep.subr.bf16.mxu1 %v4431_v36  ;;  %1980 = vmatprep.subr.bf16.mxu0 %v4437_v8 }
 0x90c   :  { %1940 = vmatpush1.bf16.msra.mxu1 %v4443_v45  ;;  %1981 = vmatpush1.bf16.msra.mxu0 %v4449_v52 }
 0x90d   :  { %1941 = vmatprep.subr.bf16.mxu1 %v4455_v20  ;;  %1982 = vmatprep.subr.bf16.mxu0 %v4461_v24 }
 0x910   :  { %1942 = vmatpush1.bf16.msra.mxu1 %v4467_v25  ;;  %1983 = vmatpush1.bf16.msra.mxu0 %v4473_v57 }
 0x911   :  { %1943 = vmatprep.subr.bf16.mxu1 %v4479_v2  ;;  %1984 = vmatprep.subr.bf16.mxu0 %v4485_v9 }
 0x914   :  { %1944 = vmatpush1.bf16.msra.mxu1 %v4491_v37  ;;  %1985 = vmatpush1.bf16.msra.mxu0 %v4497_v28 }
 0x915   :  { %1945 = vmatprep.subr.bf16.mxu1 %v4503_v44  ;;  %1986 = vmatprep.subr.bf16.mxu0 %v4509_v48 }
 0x918   :  { %1946 = vmatpush1.bf16.msra.mxu1 %v4515_v50  ;;  %1987 = vmatpush1.bf16.msra.mxu0 %v4521_v51 }
 0x919   :  { %2046 = vmatprep.subr.bf16.mxu1 %v4325_v43  ;;  %2087 = vmatprep.subr.bf16.mxu0 %v4331_v46 }
 0x9bb   :  { %v1850_v53 = vpop.f32.mrf.mxu1  ;;  %v1891_v22 = vpop.f32.mrf.mxu0 }
 0x9bc   :  { %v1898_v27 = vadd.f32 %v1850_v53, %v5263_v26  ;;  %v1900_v60 = vadd.f32 %v1891_v22, %v5265_v55 }
 0x9bd   :  { %v1852_v32 = vpop.f32.mrf.mxu1  ;;  %v1893_v33 = vpop.f32.mrf.mxu0 }
 0x9be   :  { %v3049_v35 = vmul.f32 -1.442695, %v1898_v27  ;;  %v1899_v40 = vadd.f32 %v1852_v32, %v5264_v38  ;;  %v3051_v61 = vmul.f32 -1.442695, %v1900_v60  ;;  %v1901_v0 = vadd.f32 %v1893_v33, %v5266_v63 }
 0x9bf   :  { %v1854_v17 = vpop.f32.mrf.mxu1  ;;  %v1895_v59 = vpop.f32.mrf.mxu0 }
 0x9c0   :  { %3389 = vpow2.f32 %v3049_v35  ;;  %v3050_v34 = vmul.f32 -1.442695, %v1899_v40  ;;  %v5267_v35 = vld [vmem:[#allocation29_spill] sm:$0xff] }
 0x9c1   :  { %v1855_v58 = vpop.f32.mrf.mxu1  ;;  %v1896_v54 = vpop.f32.mrf.mxu0 }
 0x9c2   :  { %3391 = vpow2.f32 %v3050_v34  ;;  %v5268_v34 = vld [vmem:[#allocation31_spill] sm:$0xff] }
 0x9c3   :  { %3393 = vpow2.f32 %v3051_v61 }
 0x9c4   :  { %3395 = vtanh.f32 %v1901_v0  ;;  %v5269_v0 = vld [vmem:[#allocation30_spill] sm:$0xff] }
 0x9cd   :  { %v3390_v1 = vpop.eup %3389 }
 0x9ce   :  { %v1911_v4 = vadd.f32 1.0, %v3390_v1 }
 0x9cf   :  { %v3392_v6 = vpop.eup %3391 }
 0x9d0   :  { %3397 = vrcp.f32 %v1911_v4  ;;  %v1912_v7 = vadd.f32 1.0, %v3392_v6  ;;  %v3394_v11 = vpop.eup %3393 }
 0x9d1   :  { %v3396_v12 = vpop.eup %3395  ;;  %v1913_v19 = vadd.f32 1.0, %v3394_v11 }
 0x9d2   :  { %3399 = vrcp.f32 %v1912_v7 }
 0x9d3   :  { %3401 = vrcp.f32 %v1913_v19 }
 0x9dd   :  { %v3398_v14 = vpop.eup %3397 }
 0x9de   :  { %v1922_v15 = vmul.f32 %v3398_v14, %v3396_v12 }
 0x9df   :  { %v3400_v16 = vpop.eup %3399 }
 0x9e0   :  { %v1921_v21 = vmul.f32 %v3400_v16, %v4657_v49  ;;  %v3402_v22 = vpop.eup %3401 }
 0x9e2   :  { %v4699_v53 = vadd.f32 %v1922_v15, %v1921_v21 }
 0x9e4   :  { %3403 = vtanh.f32 %v4699_v53 }
 0x9f1   :  { %v3404_v26 = vpop.eup %3403 }
 0x9f2   :  { %v1925_v27 = vmul.f32 %v3404_v26, %v3402_v22 }
 0x9f4   :  { %v1930_v32 = vpack.c.bf16 %v1925_v27, %v1925_v27 }
 0x9f6   :  { %1964 = vmatmul.mubr.bf16.vlgmr.msra.gmra.mxu1 %v1930_v32  ;;  %2005 = vmatmul.mubr.bf16.vlgmr.msra.gmra.mxu0 %v1930_v32 }
 0x9f7   :  { %2047 = vmatpush1.bf16.msra.mxu1 %v4345_v18  ;;  %2088 = vmatpush1.bf16.msra.mxu0 %v4351_v41 }
 0x9f8   :  { %2048 = vmatprep.subr.bf16.mxu1 %v4357_v42  ;;  %2089 = vmatprep.subr.bf16.mxu0 %v4363_v13 }
 0x9f9   :  { %2078 = vmatprep.mubr.bf16.mxu1 %v5243_v10  ;;  %2119 = vmatprep.mubr.bf16.mxu0 %v5243_v10 }
 0x9fb   :  { %2049 = vmatpush1.bf16.msra.mxu1 %v4371_v5  ;;  %2090 = vmatpush1.bf16.msra.mxu0 %v4377_v3 }
 0x9fc   :  { %2050 = vmatprep.subr.bf16.mxu1 %v4383_v23  ;;  %2091 = vmatprep.subr.bf16.mxu0 %v4389_v39 }
 0x9ff   :  { %2051 = vmatpush1.bf16.msra.mxu1 %v4395_v30  ;;  %2092 = vmatpush1.bf16.msra.mxu0 %v4401_v47 }
 0xa00   :  { %2052 = vmatprep.subr.bf16.mxu1 %v4407_v31  ;;  %2093 = vmatprep.subr.bf16.mxu0 %v4413_v29 }
 0xa03   :  { %2053 = vmatpush1.bf16.msra.mxu1 %v4419_v56  ;;  %2094 = vmatpush1.bf16.msra.mxu0 %v4425_v62 }
 0xa04   :  { %2054 = vmatprep.subr.bf16.mxu1 %v4431_v36  ;;  %2095 = vmatprep.subr.bf16.mxu0 %v4437_v8 }
 0xa07   :  { %2055 = vmatpush1.bf16.msra.mxu1 %v4443_v45  ;;  %2096 = vmatpush1.bf16.msra.mxu0 %v4449_v52 }
 0xa08   :  { %2056 = vmatprep.subr.bf16.mxu1 %v4455_v20  ;;  %2097 = vmatprep.subr.bf16.mxu0 %v4461_v24 }
 0xa0b   :  { %2057 = vmatpush1.bf16.msra.mxu1 %v4467_v25  ;;  %2098 = vmatpush1.bf16.msra.mxu0 %v4473_v57 }
 0xa0c   :  { %2058 = vmatprep.subr.bf16.mxu1 %v4479_v2  ;;  %2099 = vmatprep.subr.bf16.mxu0 %v4485_v9 }
 0xa0f   :  { %2059 = vmatpush1.bf16.msra.mxu1 %v4491_v37  ;;  %2100 = vmatpush1.bf16.msra.mxu0 %v4497_v28 }
 0xa10   :  { %2060 = vmatprep.subr.bf16.mxu1 %v4503_v44  ;;  %2101 = vmatprep.subr.bf16.mxu0 %v4509_v48 }
 0xa13   :  { %2061 = vmatpush1.bf16.msra.mxu1 %v4515_v50  ;;  %2102 = vmatpush1.bf16.msra.mxu0 %v4521_v51 }
 0xa14   :  { %2161 = vmatprep.subr.bf16.mxu1 %v4325_v43  ;;  %2202 = vmatprep.subr.bf16.mxu0 %v4331_v46  ;;  %v5270_v46 = vld [vmem:[#allocation32_spill] sm:$0xff] }
 0xab6   :  { %v1965_v49 = vpop.f32.mrf.mxu1  ;;  %v2006_v33 = vpop.f32.mrf.mxu0 }
 0xab7   :  { %v2013_v38 = vadd.f32 %v1965_v49, %v5267_v35  ;;  %v2015_v43 = vadd.f32 %v2006_v33, %v5269_v0  ;;  %v4831_v0 = vld [vmem:[%s5182_s4 + $0xc8] ss:$16 sps:$4 sm:$0xff]  }
 0xab8   :  { %v1967_v40 = vpop.f32.mrf.mxu1  ;;  %v2008_v17 = vpop.f32.mrf.mxu0 }
 0xab9   :  { %v3052_v59 = vmul.f32 -1.442695, %v2013_v38  ;;  %v2014_v58 = vadd.f32 %v1967_v40, %v5268_v34  ;;  %v3054_v1 = vmul.f32 -1.442695, %v2015_v43  ;;  %v2016_v4 = vadd.f32 %v2008_v17, %v5270_v46  ;;  %v4837_v43 = vld [vmem:[%s5182_s4 + $0xa4] ss:$16 sps:$4 sm:$0xff]  }
 0xaba   :  { %v1969_v54 = vpop.f32.mrf.mxu1  ;;  %v2010_v55 = vpop.f32.mrf.mxu0  ;;  %v4849_v46 = vld [vmem:[%s5182_s4 + $0xa0] ss:$16 sps:$4 sm:$0xff]  }
 0xabb   :  { %3405 = vpow2.f32 %v3052_v59  ;;  %v3053_v60 = vmul.f32 -1.442695, %v2014_v58  ;;  %v4799_v54 = vld [vmem:[%s5182_s4 + $0xe0] ss:$16 sps:$4 sm:$0xff]   ;;  %v4805_v55 = vld [vmem:[%s5182_s4 + $0xe8] ss:$16 sps:$4 sm:$0xff]  }
 0xabc   :  { %v1970_v61 = vpop.f32.mrf.mxu1  ;;  %v2011_v63 = vpop.f32.mrf.mxu0 }
 0xabd   :  { %3407 = vpow2.f32 %v3053_v60  ;;  %v4811_v60 = vld [vmem:[%s5182_s4 + $0xc4] ss:$16 sps:$4 sm:$0xff]   ;;  %v4817_v61 = vld [vmem:[%s5182_s4 + $0xcc] ss:$16 sps:$4 sm:$0xff]   ;;  %v4825_v63 = vld [vmem:[%s5182_s4 + $0xc0] ss:$16 sps:$4 sm:$0xff]  }
 0xabe   :  { %3409 = vpow2.f32 %v3054_v1  ;;  %v4843_v1 = vld [vmem:[%s5182_s4 + $0xac] ss:$16 sps:$4 sm:$0xff]  }
 0xabf   :  { %3411 = vtanh.f32 %v2016_v4  ;;  %v4855_v4 = vld [vmem:[%s5182_s4 + $0xa8] ss:$16 sps:$4 sm:$0xff]  }
 0xac8   :  { %v3406_v6 = vpop.eup %3405 }
 0xac9   :  { %v2026_v7 = vadd.f32 1.0, %v3406_v6  ;;  %v4861_v6 = vld [vmem:[%s5182_s4 + $0x84] ss:$16 sps:$4 sm:$0xff]  }
 0xaca   :  { %v3408_v11 = vpop.eup %3407 }
 0xacb   :  { %3413 = vrcp.f32 %v2026_v7  ;;  %v2027_v12 = vadd.f32 1.0, %v3408_v11  ;;  %v3410_v14 = vpop.eup %3409  ;;  %v4867_v7 = vld [vmem:[%s5182_s4 + $0x8c] ss:$16 sps:$4 sm:$0xff]   ;;  %v4873_v11 = vld [vmem:[%s5182_s4 + $0x80] ss:$16 sps:$4 sm:$0xff]  }
 0xacc   :  { %v3412_v15 = vpop.eup %3411  ;;  %v2028_v22 = vadd.f32 1.0, %v3410_v14  ;;  %v4885_v14 = vld [vmem:[%s5182_s4 + $0x64] ss:$16 sps:$4 sm:$0xff]  }
 0xacd   :  { %3415 = vrcp.f32 %v2027_v12  ;;  %v4879_v12 = vld [vmem:[%s5182_s4 + $0x88] ss:$16 sps:$4 sm:$0xff]  }
 0xace   :  { %3417 = vrcp.f32 %v2028_v22  ;;  %v4915_v22 = vld [vmem:[%s5182_s4 + $0x4c] ss:$16 sps:$4 sm:$0xff]  }
 0xad8   :  { %v3414_v16 = vpop.eup %3413 }
 0xad9   :  { %v2037_v19 = vmul.f32 %v3414_v16, %v3412_v15  ;;  %v4891_v15 = vld [vmem:[%s5182_s4 + $0x6c] ss:$16 sps:$4 sm:$0xff]   ;;  %v4897_v16 = vld [vmem:[%s5182_s4 + $0x60] ss:$16 sps:$4 sm:$0xff]  }
 0xada   :  { %v3416_v21 = vpop.eup %3415 }
 0xadb   :  { %v2036_v26 = vmul.f32 %v3416_v21, %v4699_v53  ;;  %v3418_v32 = vpop.eup %3417  ;;  %v4909_v21 = vld [vmem:[%s5182_s4 + $0x44] ss:$16 sps:$4 sm:$0xff]  }
 0xadd   :  { %v4741_v27 = vadd.f32 %v2037_v19, %v2036_v26  ;;  %v4903_v19 = vld [vmem:[%s5182_s4 + $0x68] ss:$16 sps:$4 sm:$0xff]   ;;  %v4921_v26 = vld [vmem:[%s5182_s4 + $0x40] ss:$16 sps:$4 sm:$0xff]  }
 0xadf   :  { %3419 = vtanh.f32 %v4741_v27 }
 0xaec   :  { %v3420_v49 = vpop.eup %3419 }
 0xaed   :  { %v2040_v33 = vmul.f32 %v3420_v49, %v3418_v32  ;;  %v4933_v32 = vld [vmem:[%s5182_s4 + $0x24] ss:$16 sps:$4 sm:$0xff]   ;;  %v4939_v49 = vld [vmem:[%s5182_s4 + $0x2c] ss:$16 sps:$4 sm:$0xff]  }
 0xaef   :  { %v2045_v35 = vpack.c.bf16 %v2040_v33, %v2040_v33  ;;  %v4945_v33 = vld [vmem:[%s5182_s4 + $0x20] ss:$16 sps:$4 sm:$0xff]  }
 0xaf1   :  { %2079 = vmatmul.mubr.bf16.vlgmr.msra.gmra.mxu1 %v2045_v35  ;;  %2120 = vmatmul.mubr.bf16.vlgmr.msra.gmra.mxu0 %v2045_v35  ;;  %v4951_v35 = vld [vmem:[%s5182_s4 + $0x28] ss:$16 sps:$4 sm:$0xff]  }
 0xaf2   :  { %2162 = vmatpush1.bf16.msra.mxu1 %v4345_v18  ;;  %2203 = vmatpush1.bf16.msra.mxu0 %v4351_v41  ;;  %v4779_v18 = vld [vmem:[%s5182_s4 + $0xe4] ss:$16 sps:$4 sm:$0xff]   ;;  %v4785_v41 = vld [vmem:[%s5182_s4 + $0xec] ss:$16 sps:$4 sm:$0xff]  }
 0xaf3   :  { %2163 = vmatprep.subr.bf16.mxu1 %v4357_v42  ;;  %2204 = vmatprep.subr.bf16.mxu0 %v4363_v13 }
 0xaf4   :  { %2193 = vmatprep.mubr.bf16.mxu1 %v5243_v10  ;;  %2234 = vmatprep.mubr.bf16.mxu0 %v5243_v10 }
 0xaf6   :  { %2164 = vmatpush1.bf16.msra.mxu1 %v4371_v5  ;;  %2205 = vmatpush1.bf16.msra.mxu0 %v4377_v3  ;;  %v5271_v5 = vld [vmem:[#allocation33_spill] sm:$0xff] }
 0xaf7   :  { %2165 = vmatprep.subr.bf16.mxu1 %v4383_v23  ;;  %2206 = vmatprep.subr.bf16.mxu0 %v4389_v39 }
 0xafa   :  { %2166 = vmatpush1.bf16.msra.mxu1 %v4395_v30  ;;  %2207 = vmatpush1.bf16.msra.mxu0 %v4401_v47  ;;  %v5272_v47 = vld [vmem:[#allocation35_spill] sm:$0xff] }
 0xafb   :  { %2167 = vmatprep.subr.bf16.mxu1 %v4407_v31  ;;  %2208 = vmatprep.subr.bf16.mxu0 %v4413_v29 }
 0xafe   :  { %2168 = vmatpush1.bf16.msra.mxu1 %v4419_v56  ;;  %2209 = vmatpush1.bf16.msra.mxu0 %v4425_v62 }
 0xaff   :  { %2169 = vmatprep.subr.bf16.mxu1 %v4431_v36  ;;  %2210 = vmatprep.subr.bf16.mxu0 %v4437_v8 }
 0xb02   :  { %2170 = vmatpush1.bf16.msra.mxu1 %v4443_v45  ;;  %2211 = vmatpush1.bf16.msra.mxu0 %v4449_v52  ;;  %v5273_v45 = vld [vmem:[#allocation34_spill] sm:$0xff] }
 0xb03   :  { %2171 = vmatprep.subr.bf16.mxu1 %v4455_v20  ;;  %2212 = vmatprep.subr.bf16.mxu0 %v4461_v24  ;;  %v5274_v24 = vld [vmem:[#allocation36_spill] sm:$0xff] }
 0xb06   :  { %2172 = vmatpush1.bf16.msra.mxu1 %v4467_v25  ;;  %2213 = vmatpush1.bf16.msra.mxu0 %v4473_v57 }
 0xb07   :  { %2173 = vmatprep.subr.bf16.mxu1 %v4479_v2  ;;  %2214 = vmatprep.subr.bf16.mxu0 %v4485_v9 }
 0xb0a   :  { %2174 = vmatpush1.bf16.msra.mxu1 %v4491_v37  ;;  %2215 = vmatpush1.bf16.msra.mxu0 %v4497_v28 }
 0xb0b   :  { %2175 = vmatprep.subr.bf16.mxu1 %v4503_v44  ;;  %2216 = vmatprep.subr.bf16.mxu0 %v4509_v48 }
 0xb0e   :  { %2176 = vmatpush1.bf16.msra.mxu1 %v4515_v50  ;;  %2217 = vmatpush1.bf16.msra.mxu0 %v4521_v51 }
 0xb0f   :  { %2276 = vmatprep.subr.bf16.mxu1 %v4779_v18  ;;  %2317 = vmatprep.subr.bf16.mxu0 %v4785_v41 }
 0xbb1   :  { %v2080_v42 = vpop.f32.mrf.mxu1  ;;  %v2121_v13 = vpop.f32.mrf.mxu0 }
 0xbb2   :  { %v2128_v3 = vadd.f32 %v2080_v42, %v5271_v5  ;;  %v2130_v52 = vadd.f32 %v2121_v13, %v5273_v45  ;;  %v4957_v42 = vld [vmem:[%s5182_s4 + $0x4] ss:$16 sps:$4 sm:$0xff]   ;;  %v4963_v13 = vld [vmem:[%s5182_s4 + $0xc] ss:$16 sps:$4 sm:$0xff]   ;;  %v4969_v5 = vld [vmem:[%s5182_s4] ss:$16 sps:$4 sm:$0xff]  }
 0xbb3   :  { %v2082_v23 = vpop.f32.mrf.mxu1  ;;  %v2123_v39 = vpop.f32.mrf.mxu0 }
 0xbb4   :  { %v3055_v30 = vmul.f32 -1.442695, %v2128_v3  ;;  %v2129_v31 = vadd.f32 %v2082_v23, %v5272_v47  ;;  %v3057_v20 = vmul.f32 -1.442695, %v2130_v52  ;;  %v2131_v25 = vadd.f32 %v2123_v39, %v5274_v24  ;;  %v4975_v3 = vld [vmem:[%s5182_s4 + $0x8] ss:$16 sps:$4 sm:$0xff]  }
 0xbb5   :  { %v2084_v29 = vpop.f32.mrf.mxu1  ;;  %v2125_v56 = vpop.f32.mrf.mxu0 }
 0xbb6   :  { %3421 = vpow2.f32 %v3055_v30  ;;  %v3056_v62 = vmul.f32 -1.442695, %v2129_v31  ;;  %v5275_v30 = vld [vmem:[#allocation37_spill] sm:$0xff] }
 0xbb7   :  { %v2085_v36 = vpop.f32.mrf.mxu1  ;;  %v2126_v8 = vpop.f32.mrf.mxu0 }
 0xbb8   :  { %3423 = vpow2.f32 %v3056_v62  ;;  %v5276_v62 = vld [vmem:[#allocation39_spill] sm:$0xff] }
 0xbb9   :  { %3425 = vpow2.f32 %v3057_v20 }
 0xbba   :  { %3427 = vtanh.f32 %v2131_v25  ;;  %v5277_v25 = vld [vmem:[#allocation38_spill] sm:$0xff] }
 0xbc3   :  { %v3422_v57 = vpop.eup %3421 }
 0xbc4   :  { %v2141_v2 = vadd.f32 1.0, %v3422_v57 }
 0xbc5   :  { %v3424_v9 = vpop.eup %3423 }
 0xbc6   :  { %3429 = vrcp.f32 %v2141_v2  ;;  %v2142_v37 = vadd.f32 1.0, %v3424_v9  ;;  %v3426_v28 = vpop.eup %3425  ;;  %v5278_v9 = vld [vmem:[#allocation40_spill] sm:$0xff] }
 0xbc7   :  { %v3428_v44 = vpop.eup %3427  ;;  %v2143_v53 = vadd.f32 1.0, %v3426_v28 }
 0xbc8   :  { %3431 = vrcp.f32 %v2142_v37 }
 0xbc9   :  { %3433 = vrcp.f32 %v2143_v53 }
 0xbd3   :  { %v3430_v48 = vpop.eup %3429 }
 0xbd4   :  { %v2152_v50 = vmul.f32 %v3430_v48, %v3428_v44 }
 0xbd5   :  { %v3432_v51 = vpop.eup %3431 }
 0xbd6   :  { %v2151_v38 = vmul.f32 %v3432_v51, %v4741_v27  ;;  %v3434_v17 = vpop.eup %3433  ;;  %v4927_v27 = vld [vmem:[%s5182_s4 + $0x48] ss:$16 sps:$4 sm:$0xff]  }
 0xbd8   :  { %v4793_v40 = vadd.f32 %v2152_v50, %v2151_v38 }
 0xbda   :  { %3435 = vtanh.f32 %v4793_v40 }
 0xbe7   :  { %v3436_v59 = vpop.eup %3435 }
 0xbe8   :  { %v2155_v34 = vmul.f32 %v3436_v59, %v3434_v17 }
 0xbea   :  { %v2160_v58 = vpack.c.bf16 %v2155_v34, %v2155_v34 }
 0xbec   :  { %2194 = vmatmul.mubr.bf16.vlgmr.msra.gmra.mxu1 %v2160_v58  ;;  %2235 = vmatmul.mubr.bf16.vlgmr.msra.gmra.mxu0 %v2160_v58 }
 0xbed   :  { %2277 = vmatpush1.bf16.msra.mxu1 %v4799_v54  ;;  %2318 = vmatpush1.bf16.msra.mxu0 %v4805_v55 }
 0xbee   :  { %2278 = vmatprep.subr.bf16.mxu1 %v4811_v60  ;;  %2319 = vmatprep.subr.bf16.mxu0 %v4817_v61 }
 0xbef   :  { %2308 = vmatprep.mubr.bf16.mxu1 %v5243_v10  ;;  %2349 = vmatprep.mubr.bf16.mxu0 %v5243_v10 }
 0xbf1   :  { %2279 = vmatpush1.bf16.msra.mxu1 %v4825_v63  ;;  %2320 = vmatpush1.bf16.msra.mxu0 %v4831_v0 }
 0xbf2   :  { %2280 = vmatprep.subr.bf16.mxu1 %v4837_v43  ;;  %2321 = vmatprep.subr.bf16.mxu0 %v4843_v1 }
 0xbf5   :  { %2281 = vmatpush1.bf16.msra.mxu1 %v4849_v46  ;;  %2322 = vmatpush1.bf16.msra.mxu0 %v4855_v4 }
 0xbf6   :  { %2282 = vmatprep.subr.bf16.mxu1 %v4861_v6  ;;  %2323 = vmatprep.subr.bf16.mxu0 %v4867_v7 }
 0xbf9   :  { %2283 = vmatpush1.bf16.msra.mxu1 %v4873_v11  ;;  %2324 = vmatpush1.bf16.msra.mxu0 %v4879_v12 }
 0xbfa   :  { %2284 = vmatprep.subr.bf16.mxu1 %v4885_v14  ;;  %2325 = vmatprep.subr.bf16.mxu0 %v4891_v15 }
 0xbfd   :  { %2285 = vmatpush1.bf16.msra.mxu1 %v4897_v16  ;;  %2326 = vmatpush1.bf16.msra.mxu0 %v4903_v19 }
 0xbfe   :  { %2286 = vmatprep.subr.bf16.mxu1 %v4909_v21  ;;  %2327 = vmatprep.subr.bf16.mxu0 %v4915_v22 }
 0xc01   :  { %2287 = vmatpush1.bf16.msra.mxu1 %v4921_v26  ;;  %2328 = vmatpush1.bf16.msra.mxu0 %v4927_v27 }
 0xc02   :  { %2288 = vmatprep.subr.bf16.mxu1 %v4933_v32  ;;  %2329 = vmatprep.subr.bf16.mxu0 %v4939_v49 }
 0xc05   :  { %2289 = vmatpush1.bf16.msra.mxu1 %v4945_v33  ;;  %2330 = vmatpush1.bf16.msra.mxu0 %v4951_v35 }
 0xc06   :  { %2290 = vmatprep.subr.bf16.mxu1 %v4957_v42  ;;  %2331 = vmatprep.subr.bf16.mxu0 %v4963_v13 }
 0xc09   :  { %2291 = vmatpush1.bf16.msra.mxu1 %v4969_v5  ;;  %2332 = vmatpush1.bf16.msra.mxu0 %v4975_v3 }
 0xc0a   :  { %2391 = vmatprep.subr.bf16.mxu1 %v4779_v18  ;;  %2432 = vmatprep.subr.bf16.mxu0 %v4785_v41 }
 0xcac   :  { %v2195_v23 = vpop.f32.mrf.mxu1  ;;  %v2236_v39 = vpop.f32.mrf.mxu0 }
 0xcad   :  { %v2243_v47 = vadd.f32 %v2195_v23, %v5275_v30  ;;  %v2245_v57 = vadd.f32 %v2236_v39, %v5277_v25 }
 0xcae   :  { %v2197_v31 = vpop.f32.mrf.mxu1  ;;  %v2238_v29 = vpop.f32.mrf.mxu0 }
 0xcaf   :  { %v3058_v56 = vmul.f32 -1.442695, %v2243_v47  ;;  %v2244_v36 = vadd.f32 %v2197_v31, %v5276_v62  ;;  %v3060_v2 = vmul.f32 -1.442695, %v2245_v57  ;;  %v2246_v37 = vadd.f32 %v2238_v29, %v5278_v9 }
 0xcb0   :  { %v2199_v8 = vpop.f32.mrf.mxu1  ;;  %v2240_v45 = vpop.f32.mrf.mxu0 }
 0xcb1   :  { %3437 = vpow2.f32 %v3058_v56  ;;  %v3059_v52 = vmul.f32 -1.442695, %v2244_v36  ;;  %v5279_v56 = vld [vmem:[#allocation41_spill] sm:$0xff] }
 0xcb2   :  { %v2200_v20 = vpop.f32.mrf.mxu1  ;;  %v2241_v24 = vpop.f32.mrf.mxu0 }
 0xcb3   :  { %3439 = vpow2.f32 %v3059_v52  ;;  %v5280_v52 = vld [vmem:[#allocation43_spill] sm:$0xff] }
 0xcb4   :  { %3441 = vpow2.f32 %v3060_v2 }
 0xcb5   :  { %3443 = vtanh.f32 %v2246_v37  ;;  %v5281_v37 = vld [vmem:[#allocation42_spill] sm:$0xff] }
 0xcbe   :  { %v3438_v28 = vpop.eup %3437 }
 0xcbf   :  { %v2256_v44 = vadd.f32 1.0, %v3438_v28 }
 0xcc0   :  { %v3440_v48 = vpop.eup %3439 }
 0xcc1   :  { %3445 = vrcp.f32 %v2256_v44  ;;  %v2257_v50 = vadd.f32 1.0, %v3440_v48  ;;  %v3442_v51 = vpop.eup %3441  ;;  %v5282_v48 = vld [vmem:[#allocation44_spill] sm:$0xff] }
 0xcc2   :  { %v3444_v53 = vpop.eup %3443  ;;  %v2258_v34 = vadd.f32 1.0, %v3442_v51 }
 0xcc3   :  { %3447 = vrcp.f32 %v2257_v50 }
 0xcc4   :  { %3449 = vrcp.f32 %v2258_v34 }
 0xcce   :  { %v3446_v38 = vpop.eup %3445 }
 0xccf   :  { %v2267_v17 = vmul.f32 %v3446_v38, %v3444_v53 }
 0xcd0   :  { %v3448_v59 = vpop.eup %3447 }
 0xcd1   :  { %v2266_v58 = vmul.f32 %v3448_v59, %v4793_v40  ;;  %v3450_v39 = vpop.eup %3449 }
 0xcd3   :  { %v4985_v23 = vadd.f32 %v2267_v17, %v2266_v58 }
 0xcd5   :  { %3451 = vtanh.f32 %v4985_v23 }
 0xce2   :  { %v3452_v30 = vpop.eup %3451 }
 0xce3   :  { %v2270_v47 = vmul.f32 %v3452_v30, %v3450_v39 }
 0xce5   :  { %v2275_v31 = vpack.c.bf16 %v2270_v47, %v2270_v47 }
 0xce7   :  { %2309 = vmatmul.mubr.bf16.vlgmr.msra.gmra.mxu1 %v2275_v31  ;;  %2350 = vmatmul.mubr.bf16.vlgmr.msra.gmra.mxu0 %v2275_v31 }
 0xce8   :  { %2392 = vmatpush1.bf16.msra.mxu1 %v4799_v54  ;;  %2433 = vmatpush1.bf16.msra.mxu0 %v4805_v55 }
 0xce9   :  { %2393 = vmatprep.subr.bf16.mxu1 %v4811_v60  ;;  %2434 = vmatprep.subr.bf16.mxu0 %v4817_v61 }
 0xcea   :  { %2423 = vmatprep.mubr.bf16.mxu1 %v5243_v10  ;;  %2464 = vmatprep.mubr.bf16.mxu0 %v5243_v10 }
 0xcec   :  { %2394 = vmatpush1.bf16.msra.mxu1 %v4825_v63  ;;  %2435 = vmatpush1.bf16.msra.mxu0 %v4831_v0 }
 0xced   :  { %2395 = vmatprep.subr.bf16.mxu1 %v4837_v43  ;;  %2436 = vmatprep.subr.bf16.mxu0 %v4843_v1 }
 0xcf0   :  { %2396 = vmatpush1.bf16.msra.mxu1 %v4849_v46  ;;  %2437 = vmatpush1.bf16.msra.mxu0 %v4855_v4 }
 0xcf1   :  { %2397 = vmatprep.subr.bf16.mxu1 %v4861_v6  ;;  %2438 = vmatprep.subr.bf16.mxu0 %v4867_v7 }
 0xcf4   :  { %2398 = vmatpush1.bf16.msra.mxu1 %v4873_v11  ;;  %2439 = vmatpush1.bf16.msra.mxu0 %v4879_v12 }
 0xcf5   :  { %2399 = vmatprep.subr.bf16.mxu1 %v4885_v14  ;;  %2440 = vmatprep.subr.bf16.mxu0 %v4891_v15 }
 0xcf8   :  { %2400 = vmatpush1.bf16.msra.mxu1 %v4897_v16  ;;  %2441 = vmatpush1.bf16.msra.mxu0 %v4903_v19 }
 0xcf9   :  { %2401 = vmatprep.subr.bf16.mxu1 %v4909_v21  ;;  %2442 = vmatprep.subr.bf16.mxu0 %v4915_v22 }
 0xcfc   :  { %2402 = vmatpush1.bf16.msra.mxu1 %v4921_v26  ;;  %2443 = vmatpush1.bf16.msra.mxu0 %v4927_v27 }
 0xcfd   :  { %2403 = vmatprep.subr.bf16.mxu1 %v4933_v32  ;;  %2444 = vmatprep.subr.bf16.mxu0 %v4939_v49 }
 0xd00   :  { %2404 = vmatpush1.bf16.msra.mxu1 %v4945_v33  ;;  %2445 = vmatpush1.bf16.msra.mxu0 %v4951_v35 }
 0xd01   :  { %2405 = vmatprep.subr.bf16.mxu1 %v4957_v42  ;;  %2446 = vmatprep.subr.bf16.mxu0 %v4963_v13 }
 0xd04   :  { %2406 = vmatpush1.bf16.msra.mxu1 %v4969_v5  ;;  %2447 = vmatpush1.bf16.msra.mxu0 %v4975_v3 }
 0xd05   :  { %2506 = vmatprep.subr.bf16.mxu1 %v4779_v18  ;;  %2547 = vmatprep.subr.bf16.mxu0 %v4785_v41 }
 0xda7   :  { %v2310_v40 = vpop.f32.mrf.mxu1  ;;  %v2351_v29 = vpop.f32.mrf.mxu0 }
 0xda8   :  { %v2358_v62 = vadd.f32 %v2310_v40, %v5279_v56  ;;  %v2360_v28 = vadd.f32 %v2351_v29, %v5281_v37 }
 0xda9   :  { %v2312_v36 = vpop.f32.mrf.mxu1  ;;  %v2353_v8 = vpop.f32.mrf.mxu0 }
 0xdaa   :  { %v3061_v45 = vmul.f32 -1.442695, %v2358_v62  ;;  %v2359_v20 = vadd.f32 %v2312_v36, %v5280_v52  ;;  %v3063_v44 = vmul.f32 -1.442695, %v2360_v28  ;;  %v2361_v50 = vadd.f32 %v2353_v8, %v5282_v48 }
 0xdab   :  { %v2314_v24 = vpop.f32.mrf.mxu1  ;;  %v2355_v25 = vpop.f32.mrf.mxu0 }
 0xdac   :  { %3453 = vpow2.f32 %v3061_v45  ;;  %v3062_v57 = vmul.f32 -1.442695, %v2359_v20  ;;  %v5283_v45 = vld [vmem:[#allocation45_spill] sm:$0xff] }
 0xdad   :  { %v2315_v2 = vpop.f32.mrf.mxu1  ;;  %v2356_v9 = vpop.f32.mrf.mxu0 }
 0xdae   :  { %3455 = vpow2.f32 %v3062_v57  ;;  %v5284_v57 = vld [vmem:[#allocation47_spill] sm:$0xff] }
 0xdaf   :  { %3457 = vpow2.f32 %v3063_v44 }
 0xdb0   :  { %3459 = vtanh.f32 %v2361_v50  ;;  %v5285_v50 = vld [vmem:[#allocation46_spill] sm:$0xff] }
 0xdb9   :  { %v3454_v51 = vpop.eup %3453 }
 0xdba   :  { %v2371_v53 = vadd.f32 1.0, %v3454_v51 }
 0xdbb   :  { %v3456_v38 = vpop.eup %3455 }
 0xdbc   :  { %3461 = vrcp.f32 %v2371_v53  ;;  %v2372_v17 = vadd.f32 1.0, %v3456_v38  ;;  %v3458_v59 = vpop.eup %3457 }
 0xdbd   :  { %v3460_v34 = vpop.eup %3459  ;;  %v2373_v47 = vadd.f32 1.0, %v3458_v59 }
 0xdbe   :  { %3463 = vrcp.f32 %v2372_v17 }
 0xdbf   :  { %3465 = vrcp.f32 %v2373_v47 }
 0xdc9   :  { %v3462_v58 = vpop.eup %3461 }
 0xdca   :  { %v2382_v39 = vmul.f32 %v3462_v58, %v3460_v34 }
 0xdcb   :  { %v3464_v30 = vpop.eup %3463 }
 0xdcc   :  { %v2381_v31 = vmul.f32 %v3464_v30, %v4985_v23  ;;  %v3466_v29 = vpop.eup %3465 }
 0xdce   :  { %v5027_v40 = vadd.f32 %v2382_v39, %v2381_v31 }
 0xdd0   :  { %3467 = vtanh.f32 %v5027_v40 }
 0xddd   :  { %v3468_v56 = vpop.eup %3467 }
 0xdde   :  { %v2385_v62 = vmul.f32 %v3468_v56, %v3466_v29 }
 0xde0   :  { %v2390_v36 = vpack.c.bf16 %v2385_v62, %v2385_v62 }
 0xde2   :  { %2424 = vmatmul.mubr.bf16.vlgmr.msra.gmra.mxu1 %v2390_v36  ;;  %2465 = vmatmul.mubr.bf16.vlgmr.msra.gmra.mxu0 %v2390_v36 }
 0xde3   :  { %2507 = vmatpush1.bf16.msra.mxu1 %v4799_v54  ;;  %2548 = vmatpush1.bf16.msra.mxu0 %v4805_v55 }
 0xde4   :  { %2508 = vmatprep.subr.bf16.mxu1 %v4811_v60  ;;  %2549 = vmatprep.subr.bf16.mxu0 %v4817_v61 }
 0xde5   :  { %2538 = vmatprep.mubr.bf16.mxu1 %v5243_v10  ;;  %2579 = vmatprep.mubr.bf16.mxu0 %v5243_v10 }
 0xde7   :  { %2509 = vmatpush1.bf16.msra.mxu1 %v4825_v63  ;;  %2550 = vmatpush1.bf16.msra.mxu0 %v4831_v0 }
 0xde8   :  { %2510 = vmatprep.subr.bf16.mxu1 %v4837_v43  ;;  %2551 = vmatprep.subr.bf16.mxu0 %v4843_v1 }
 0xdeb   :  { %2511 = vmatpush1.bf16.msra.mxu1 %v4849_v46  ;;  %2552 = vmatpush1.bf16.msra.mxu0 %v4855_v4 }
 0xdec   :  { %2512 = vmatprep.subr.bf16.mxu1 %v4861_v6  ;;  %2553 = vmatprep.subr.bf16.mxu0 %v4867_v7 }
 0xdef   :  { %2513 = vmatpush1.bf16.msra.mxu1 %v4873_v11  ;;  %2554 = vmatpush1.bf16.msra.mxu0 %v4879_v12 }
 0xdf0   :  { %2514 = vmatprep.subr.bf16.mxu1 %v4885_v14  ;;  %2555 = vmatprep.subr.bf16.mxu0 %v4891_v15 }
 0xdf3   :  { %2515 = vmatpush1.bf16.msra.mxu1 %v4897_v16  ;;  %2556 = vmatpush1.bf16.msra.mxu0 %v4903_v19 }
 0xdf4   :  { %2516 = vmatprep.subr.bf16.mxu1 %v4909_v21  ;;  %2557 = vmatprep.subr.bf16.mxu0 %v4915_v22 }
 0xdf7   :  { %2517 = vmatpush1.bf16.msra.mxu1 %v4921_v26  ;;  %2558 = vmatpush1.bf16.msra.mxu0 %v4927_v27 }
 0xdf8   :  { %2518 = vmatprep.subr.bf16.mxu1 %v4933_v32  ;;  %2559 = vmatprep.subr.bf16.mxu0 %v4939_v49 }
 0xdfb   :  { %2519 = vmatpush1.bf16.msra.mxu1 %v4945_v33  ;;  %2560 = vmatpush1.bf16.msra.mxu0 %v4951_v35 }
 0xdfc   :  { %2520 = vmatprep.subr.bf16.mxu1 %v4957_v42  ;;  %2561 = vmatprep.subr.bf16.mxu0 %v4963_v13 }
 0xdff   :  { %2521 = vmatpush1.bf16.msra.mxu1 %v4969_v5  ;;  %2562 = vmatpush1.bf16.msra.mxu0 %v4975_v3 }
 0xe00   :  { %2621 = vmatprep.subr.bf16.mxu1 %v4779_v18  ;;  %2662 = vmatprep.subr.bf16.mxu0 %v4785_v41  ;;  %v5286_v41 = vld [vmem:[#allocation48_spill] sm:$0xff] }
 0xea2   :  { %v2425_v23 = vpop.f32.mrf.mxu1  ;;  %v2466_v8 = vpop.f32.mrf.mxu0 }
 0xea3   :  { %v2473_v52 = vadd.f32 %v2425_v23, %v5283_v45  ;;  %v2475_v18 = vadd.f32 %v2466_v8, %v5285_v50  ;;  %v3256_v50 = vld [vmem:[%s5184_s6] sm:$0xff]  }
 0xea4   :  { %v2427_v20 = vpop.f32.mrf.mxu1  ;;  %v2468_v24 = vpop.f32.mrf.mxu0 }
 0xea5   :  { %v3064_v25 = vmul.f32 -1.442695, %v2473_v52  ;;  %v2474_v2 = vadd.f32 %v2427_v20, %v5284_v57  ;;  %v3066_v51 = vmul.f32 -1.442695, %v2475_v18  ;;  %v2476_v53 = vadd.f32 %v2468_v24, %v5286_v41  ;;  %v3257_v18 = vld [vmem:[%s5186_s8 + $0x18] sm:$0xff]  }
 0xea6   :  { %v2429_v9 = vpop.f32.mrf.mxu1  ;;  %v2470_v37 = vpop.f32.mrf.mxu0  ;;  %v3612_v57 = vmov 0.0  }
 0xea7   :  { %3469 = vpow2.f32 %v3064_v25  ;;  %v3065_v28 = vmul.f32 -1.442695, %v2474_v2  ;;  %v3249_v25 = vld [vmem:[%s5184_s6 + $0x38] sm:$0xff]   ;;  %v3250_v2 = vld [vmem:[%s5184_s6 + $0x30] sm:$0xff]   ;;  %v3251_v9 = vld [vmem:[%s5184_s6 + $0x28] sm:$0xff]  }
 0xea8   :  { %v2430_v44 = vpop.f32.mrf.mxu1  ;;  %v2471_v48 = vpop.f32.mrf.mxu0  ;;  %v3252_v37 = vld [vmem:[%s5184_s6 + $0x20] sm:$0xff]  }
 0xea9   :  { %3471 = vpow2.f32 %v3065_v28  ;;  %v3253_v28 = vld [vmem:[%s5184_s6 + $0x18] sm:$0xff]   ;;  %v3254_v44 = vld [vmem:[%s5184_s6 + $0x10] sm:$0xff]   ;;  %v3255_v48 = vld [vmem:[%s5184_s6 + $0x8] sm:$0xff]  }
 0xeaa   :  { %3473 = vpow2.f32 %v3066_v51  ;;  %v3258_v51 = vld [vmem:[%s5186_s8 + $0x10] sm:$0xff]  }
 0xeab   :  { %3475 = vtanh.f32 %v2476_v53 }
 0xeb4   :  { %v3470_v38 = vpop.eup %3469 }
 0xeb5   :  { %v2486_v17 = vadd.f32 1.0, %v3470_v38  ;;  %v5291_v38 = vld [vmem:[#allocation53_spill] sm:$0xff] }
 0xeb6   :  { %v3472_v59 = vpop.eup %3471 }
 0xeb7   :  { %3477 = vrcp.f32 %v2486_v17  ;;  %v2487_v34 = vadd.f32 1.0, %v3472_v59  ;;  %v3474_v58 = vpop.eup %3473 }
 0xeb8   :  { %v3476_v39 = vpop.eup %3475  ;;  %v2488_v29 = vadd.f32 1.0, %v3474_v58 }
 0xeb9   :  { %3479 = vrcp.f32 %v2487_v34 }
 0xeba   :  { %3481 = vrcp.f32 %v2488_v29 }
 0xec4   :  { %v3478_v30 = vpop.eup %3477 }
 0xec5   :  { %v2497_v47 = vmul.f32 %v3478_v30, %v3476_v39  ;;  %v5292_v39 = vld [vmem:[#allocation55_spill] sm:$0xff] }
 0xec6   :  { %v3480_v31 = vpop.eup %3479 }
 0xec7   :  { %v2496_v56 = vmul.f32 %v3480_v31, %v5027_v40  ;;  %v3482_v36 = vpop.eup %3481 }
 0xec9   :  { %v5069_v62 = vadd.f32 %v2497_v47, %v2496_v56 }
 0xecb   :  { %3483 = vtanh.f32 %v5069_v62 }
 0xed8   :  { %v3484_v23 = vpop.eup %3483 }
 0xed9   :  { %v2500_v8 = vmul.f32 %v3484_v23, %v3482_v36  ;;  %v5293_v36 = vld [vmem:[#allocation54_spill] sm:$0xff] }
 0xedb   :  { %v2505_v45 = vpack.c.bf16 %v2500_v8, %v2500_v8 }
 0xedd   :  { %2539 = vmatmul.mubr.bf16.vlgmr.msra.gmra.mxu1 %v2505_v45  ;;  %2580 = vmatmul.mubr.bf16.vlgmr.msra.gmra.mxu0 %v2505_v45  ;;  %v5294_v45 = vld [vmem:[#allocation56_spill] sm:$0xff] }
 0xede   :  { %2622 = vmatpush1.bf16.msra.mxu1 %v4799_v54  ;;  %2663 = vmatpush1.bf16.msra.mxu0 %v4805_v55  ;;  %v5287_v55 = vld [vmem:[#allocation49_spill] sm:$0xff] }
 0xedf   :  { %2623 = vmatprep.subr.bf16.mxu1 %v4811_v60  ;;  %2664 = vmatprep.subr.bf16.mxu0 %v4817_v61 }
 0xee0   :  { %2653 = vmatprep.mubr.bf16.mxu1 %v5243_v10  ;;  %2694 = vmatprep.mubr.bf16.mxu0 %v5243_v10 }
 0xee2   :  { %2624 = vmatpush1.bf16.msra.mxu1 %v4825_v63  ;;  %2665 = vmatpush1.bf16.msra.mxu0 %v4831_v0 }
 0xee3   :  { %2625 = vmatprep.subr.bf16.mxu1 %v4837_v43  ;;  %2666 = vmatprep.subr.bf16.mxu0 %v4843_v1  ;;  %v5288_v43 = vld [vmem:[#allocation51_spill] sm:$0xff] }
 0xee6   :  { %2626 = vmatpush1.bf16.msra.mxu1 %v4849_v46  ;;  %2667 = vmatpush1.bf16.msra.mxu0 %v4855_v4 }
 0xee7   :  { %2627 = vmatprep.subr.bf16.mxu1 %v4861_v6  ;;  %2668 = vmatprep.subr.bf16.mxu0 %v4867_v7 }
 0xeea   :  { %2628 = vmatpush1.bf16.msra.mxu1 %v4873_v11  ;;  %2669 = vmatpush1.bf16.msra.mxu0 %v4879_v12  ;;  %v5289_v12 = vld [vmem:[#allocation50_spill] sm:$0xff] }
 0xeeb   :  { %2629 = vmatprep.subr.bf16.mxu1 %v4885_v14  ;;  %2670 = vmatprep.subr.bf16.mxu0 %v4891_v15 }
 0xeee   :  { %2630 = vmatpush1.bf16.msra.mxu1 %v4897_v16  ;;  %2671 = vmatpush1.bf16.msra.mxu0 %v4903_v19  ;;  %v5290_v16 = vld [vmem:[#allocation52_spill] sm:$0xff] }
 0xeef   :  { %2631 = vmatprep.subr.bf16.mxu1 %v4909_v21  ;;  %2672 = vmatprep.subr.bf16.mxu0 %v4915_v22 }
 0xef2   :  { %2632 = vmatpush1.bf16.msra.mxu1 %v4921_v26  ;;  %2673 = vmatpush1.bf16.msra.mxu0 %v4927_v27 }
 0xef3   :  { %2633 = vmatprep.subr.bf16.mxu1 %v4933_v32  ;;  %2674 = vmatprep.subr.bf16.mxu0 %v4939_v49 }
 0xef6   :  { %2634 = vmatpush1.bf16.msra.mxu1 %v4945_v33  ;;  %2675 = vmatpush1.bf16.msra.mxu0 %v4951_v35 }
 0xef7   :  { %2635 = vmatprep.subr.bf16.mxu1 %v4957_v42  ;;  %2676 = vmatprep.subr.bf16.mxu0 %v4963_v13 }
 0xefa   :  { %2636 = vmatpush1.bf16.msra.mxu1 %v4969_v5  ;;  %2677 = vmatpush1.bf16.msra.mxu0 %v4975_v3 }
 0xefb   :  { %3130 = vmatprep.subr.bf16.mxu1 %v3612_v57  ;;  %3150 = vmatprep.subr.bf16.mxu0 %v3612_v57 }
 0xf9d   :  { %v2540_v10 = vpop.f32.mrf.mxu1  ;;  %v2581_v54 = vpop.f32.mrf.mxu0 }
 0xf9e   :  { %v2588_v60 = vadd.f32 %v2540_v10, %v5287_v55  ;;  %v2590_v14 = vadd.f32 %v2581_v54, %v5289_v12 }
 0xf9f   :  { %v2542_v61 = vpop.f32.mrf.mxu1  ;;  %v2583_v63 = vpop.f32.mrf.mxu0 }
 0xfa0   :  { %v3067_v0 = vmul.f32 -1.442695, %v2588_v60  ;;  %v2589_v1 = vadd.f32 %v2542_v61, %v5288_v43  ;;  %v3069_v15 = vmul.f32 -1.442695, %v2590_v14  ;;  %v2591_v19 = vadd.f32 %v2583_v63, %v5290_v16  ;;  %v3259_v16 = vld [vmem:[%s5186_s8 + $0x8] sm:$0xff]  }
 0xfa1   :  { %v2544_v46 = vpop.f32.mrf.mxu1  ;;  %v2585_v4 = vpop.f32.mrf.mxu0 }
 0xfa2   :  { %3485 = vpow2.f32 %v3067_v0  ;;  %v3068_v6 = vmul.f32 -1.442695, %v2589_v1 }
 0xfa3   :  { %v2545_v7 = vpop.f32.mrf.mxu1  ;;  %v2586_v11 = vpop.f32.mrf.mxu0 }
 0xfa4   :  { %3487 = vpow2.f32 %v3068_v6 }
 0xfa5   :  { %3489 = vpow2.f32 %v3069_v15 }
 0xfa6   :  { %3491 = vtanh.f32 %v2591_v19  ;;  %v3260_v19 = vld [vmem:[%s5186_s8] sm:$0xff]  }
 0xfaf   :  { %v3486_v21 = vpop.eup %3485 }
 0xfb0   :  { %v2601_v22 = vadd.f32 1.0, %v3486_v21  ;;  %v3073_v21 = vld [vmem:[%s5185_s7] ss:$0 sm:$0xff] }
 0xfb1   :  { %v3488_v26 = vpop.eup %3487 }
 0xfb2   :  { %3493 = vrcp.f32 %v2601_v22  ;;  %v2602_v27 = vadd.f32 1.0, %v3488_v26  ;;  %v3490_v32 = vpop.eup %3489 }
 0xfb3   :  { %v3492_v49 = vpop.eup %3491  ;;  %v2603_v13 = vadd.f32 1.0, %v3490_v32 }
 0xfb4   :  { %3495 = vrcp.f32 %v2602_v27 }
 0xfb5   :  { %3497 = vrcp.f32 %v2603_v13 }
 0xfbf   :  { %v3494_v33 = vpop.eup %3493 }
 0xfc0   :  { %v2612_v35 = vmul.f32 %v3494_v33, %v3492_v49 }
 0xfc1   :  { %v3496_v42 = vpop.eup %3495 }
 0xfc2   :  { %v2611_v5 = vmul.f32 %v3496_v42, %v5069_v62  ;;  %v3498_v40 = vpop.eup %3497  ;;  %v3082_v42 = vld [vmem:[%s5187_s9] ss:$0 sm:$0xff] }
 0xfc4   :  { %v5109_v3 = vadd.f32 %v2612_v35, %v2611_v5 }
 0xfc6   :  { %3499 = vtanh.f32 %v5109_v3 }
 0xfd3   :  { %v3500_v52 = vpop.eup %3499 }
 0xfd4   :  { %v2615_v20 = vmul.f32 %v3500_v52, %v3498_v40 }
 0xfd6   :  { %v2620_v24 = vpack.c.bf16 %v2615_v20, %v2615_v20 }
 0xfd8   :  { %2654 = vmatmul.mubr.bf16.vlgmr.msra.gmra.mxu1 %v2620_v24  ;;  %2695 = vmatmul.mubr.bf16.vlgmr.msra.gmra.mxu0 %v2620_v24 }
 0xfd9   :  { %3131 = vmatpush3.bf16.msra.mxu1 %v3249_v25  ;;  %3146 = vmatprep.mubr.msk.bf16.mxu1 %vm3613_vm4, %v3612_v57 }
 0xfda   :  { %3132 = vmatprep.subr.bf16.mxu1 %v3612_v57  ;;  %3158 = vmatprep.mubr.msk.bf16.mxu0 %vm3613_vm4, %v3612_v57 }
 0xfdb   :  { %3151 = vmatpush3.bf16.msra.mxu0 %v3257_v18 }
 0xfdc   :  { %3152 = vmatprep.subr.bf16.mxu0 %v3612_v57 }
 0xfdd   :  { %3133 = vmatpush3.bf16.msra.mxu1 %v3250_v2 }
 0xfde   :  { %3134 = vmatprep.subr.bf16.mxu1 %v3612_v57 }
 0xfdf   :  { %3153 = vmatpush3.bf16.msra.mxu0 %v3258_v51 }
 0xfe0   :  { %3154 = vmatprep.subr.bf16.mxu0 %v3612_v57 }
 0xfe1   :  { %3135 = vmatpush3.bf16.msra.mxu1 %v3251_v9 }
 0xfe2   :  { %3136 = vmatprep.subr.bf16.mxu1 %v3612_v57 }
 0xfe3   :  { %3155 = vmatpush3.bf16.msra.mxu0 %v3259_v16 }
 0xfe4   :  { %3156 = vmatprep.subr.bf16.mxu0 %v3612_v57 }
 0xfe5   :  { %3137 = vmatpush3.bf16.msra.mxu1 %v3252_v37 }
 0xfe6   :  { %3138 = vmatprep.subr.bf16.mxu1 %v3612_v57 }
 0xfe7   :  { %3157 = vmatpush3.bf16.msra.mxu0 %v3260_v19 }
 0xfe9   :  { %3139 = vmatpush3.bf16.msra.mxu1 %v3253_v28 }
 0xfea   :  { %3140 = vmatprep.subr.bf16.mxu1 %v3612_v57 }
 0xfed   :  { %3141 = vmatpush3.bf16.msra.mxu1 %v3254_v44 }
 0xfee   :  { %3142 = vmatprep.subr.bf16.mxu1 %v3612_v57 }
 0xff1   :  { %3143 = vmatpush3.bf16.msra.mxu1 %v3255_v48 }
 0xff2   :  { %3144 = vmatprep.subr.bf16.mxu1 %v3612_v57  ;;  %v5295_v57 = vlaneseq }
 0xff4   :  { %v2928_v2 = vand.u32 127, %v5295_v57 }
 0xff5   :  { %3145 = vmatpush3.bf16.msra.mxu1 %v3256_v50 }
 0xff6   :  { %vm2929_vm5 = vcmp.eq.s32.totalorder %v2928_v2, 1 }
0x1098   :  { %v2655_v41 = vpop.f32.mrf.mxu1  ;;  %v2696_v53 = vpop.f32.mrf.mxu0 }
0x1099   :  { %v2703_v17 = vadd.f32 %v2655_v41, %v5291_v38  ;;  %v2705_v23 = vadd.f32 %v2696_v53, %v5293_v36 }
0x109a   :  { %v2657_v59 = vpop.f32.mrf.mxu1  ;;  %v2698_v34 = vpop.f32.mrf.mxu0 }
0x109b   :  { %v3070_v58 = vmul.f32 -1.442695, %v2703_v17  ;;  %v2704_v30 = vadd.f32 %v2657_v59, %v5292_v39  ;;  %v3072_v8 = vmul.f32 -1.442695, %v2705_v23  ;;  %v2706_v10 = vadd.f32 %v2698_v34, %v5294_v45 }
0x109c   :  { %v2659_v47 = vpop.f32.mrf.mxu1  ;;  %v2700_v31 = vpop.f32.mrf.mxu0 }
0x109d   :  { %3501 = vpow2.f32 %v3070_v58  ;;  %v3071_v29 = vmul.f32 -1.442695, %v2704_v30 }
0x109e   :  { %v2660_v56 = vpop.f32.mrf.mxu1  ;;  %v2701_v62 = vpop.f32.mrf.mxu0 }
0x109f   :  { %3503 = vpow2.f32 %v3071_v29 }
0x10a0   :  { %3505 = vpow2.f32 %v3072_v8 }
0x10a1   :  { %3507 = vtanh.f32 %v2706_v10 }
0x10aa   :  { %v3502_v54 = vpop.eup %3501 }
0x10ab   :  { %v2716_v55 = vadd.f32 1.0, %v3502_v54 }
0x10ac   :  { %v3504_v60 = vpop.eup %3503 }
0x10ad   :  { %3509 = vrcp.f32 %v2716_v55  ;;  %v2717_v61 = vadd.f32 1.0, %v3504_v60  ;;  %v3506_v63 = vpop.eup %3505 }
0x10ae   :  { %v3508_v0 = vpop.eup %3507  ;;  %v2718_v4 = vadd.f32 1.0, %v3506_v63 }
0x10af   :  { %3511 = vrcp.f32 %v2717_v61 }
0x10b0   :  { %3513 = vrcp.f32 %v2718_v4 }
0x10ba   :  { %v3510_v43 = vpop.eup %3509 }
0x10bb   :  { %v2727_v1 = vmul.f32 %v3510_v43, %v3508_v0 }
0x10bc   :  { %v3512_v46 = vpop.eup %3511 }
0x10bd   :  { %v2726_v6 = vmul.f32 %v3512_v46, %v5109_v3  ;;  %v3514_v11 = vpop.eup %3513 }
0x10bf   :  { %v2728_v7 = vadd.f32 %v2727_v1, %v2726_v6 }
0x10c1   :  { %3515 = vtanh.f32 %v2728_v7 }
0x10ce   :  { %v3516_v12 = vpop.eup %3515 }
0x10cf   :  { %v2730_v14 = vmul.f32 %v3516_v12, %v3514_v11 }
0x10d1   :  { %v2731_v15 = vpack.c.bf16 %v2730_v14, %v2730_v14 }
0x10d3   :  { %3147 = vmatmul.mubr.bf16.vlgmr.msra.gmra.mxu1 %v2731_v15 }
0x1193   :  { %v2837_v22 = vpop.f32.mrf.mxu1 }
0x1194   :  { %v2838_v26 = vadd.f32 %v3073_v21, %v2837_v22 }
0x1195   :  { %v3148_v27 = vpop.f32.mrf.mxu1 }
0x1196   :  { %v2843_v32 = vmax.f32 %v2838_v26, 0.0 }
0x1197   :  { %v2840_v49 = vpop.f32.mrf.mxu1 }
0x1198   :  { %v2844_v33 = vpack.c.bf16 %v2843_v32, %v2843_v32 }
0x1199   :  { %v3149_v35 = vpop.f32.mrf.mxu1 }
0x119a   :  { %3159 = vmatmul.mubr.msk.bf16.vlgmr.msra.gmra.mxu0 %vm385_vm3, %v2844_v33 }
0x125a   :  { %v2921_v13 = vpop.f32.mrf.mxu0 }
0x125b   :  { %v2922_v5 = vadd.f32 %v3082_v42, %v2921_v13 }
0x125c   :  { %v3160_v3 = vpop.f32.mrf.mxu0 }
0x125d   :  { %v3088_v40 = vmul.f32 -1.442695, %v2922_v5 }
0x125e   :  { %v2924_v52 = vpop.f32.mrf.mxu0 }
0x125f   :  { %3517 = vpow2.f32 %v3088_v40 }
0x1260   :  { %v3161_v20 = vpop.f32.mrf.mxu0 }
0x126c   :  { %v3518_v24 = vpop.eup %3517 }
0x126d   :  { %v2933_v25 = vadd.f32 1.0, %v3518_v24 }
0x126f   :  { %3519 = vrcp.f32 %v2933_v25 }
0x127c   :  { %v3520_v9 = vpop.eup %3519 }
0x127d   :  { %v2936_v37 = vsel %vm2929_vm5, %v3520_v9, %v2922_v5 }
0x127e   :  { %2938 = vst.msk [vmem:[%s5188_s10] sm:$0xff] %vm2937_vm6, %v2936_v37 }
0x127f   :  { %2943 = vsyncpa [#allocation4], 1 }

</bundles_post_ra>
